<compile_context>
chip_gen: v7x
topology: tpu7x:2x2x1
jax: 0.10.0
libtpu: 0.0.40
codegen_flags: <defaults>
</compile_context>

<pallas_src>
import functools

import jax
import jax.numpy as jnp
from jax.experimental import pallas as pl
from jax.experimental.pallas import tpu as pltpu

MAX_BLOCK_ROWS = 512          # 512-row tiles already reach ~85% of HBM roofline
MAX_BLOCK_COLS = 2048
VMEM_LIMIT_BYTES = 48 * 1024 * 1024   # > v5e 16MiB scoped default, < v7x 64MiB physical


def _compiler_params(n_grid_dims=1):
    return pltpu.CompilerParams(
        dimension_semantics=("parallel",) * n_grid_dims,
        vmem_limit_bytes=VMEM_LIMIT_BYTES)


def _row_block(rows, max_rows=MAX_BLOCK_ROWS):
    """Return (block_rows, padded_rows).

    block divides padded_rows and is a multiple of 8 (or the full dim).  Prefers
    >=2 grid steps so a 'parallel' grid can use both v7x TensorCores.  When no
    suitable divisor exists the rows are padded (never an unbounded block)."""
    if rows <= max_rows:
        half = rows // 2
        if rows % 2 == 0 and half >= 8 and half % 8 == 0:
            return half, rows
        return rows, rows
    cap = max_rows - (max_rows % 8)
    for b in range(cap, 7, -8):
        if rows % b == 0:
            return b, rows
    padded = -(-rows // cap) * cap
    return cap, padded


def _col_block(cols, max_cols=MAX_BLOCK_COLS):
    if cols <= max_cols:
        return cols
    cap = max_cols - (max_cols % 128)
    for b in range(cap, 127, -128):
        if cols % b == 0:
            return b
    return cols  # TODO(synk): rare awkward widths fall back to the full dim


def _pad_rows(x, padded_rows):
    rows = x.shape[0]
    if padded_rows == rows:
        return x
    return jnp.pad(x, ((0, padded_rows - rows), (0, 0)))


def _gelu(x):
    # tanh-approximate GELU (see TODO above); identical in kernels and reference.
    c = 0.7978845608028654  # sqrt(2/pi)
    return 0.5 * x * (1.0 + jnp.tanh(c * (x + 0.044715 * x * x * x)))


def _layernorm(x, gamma, beta, eps):
    mean = jnp.mean(x, axis=-1, keepdims=True)
    xc = x - mean
    var = jnp.mean(xc * xc, axis=-1, keepdims=True)
    return xc * jax.lax.rsqrt(var + eps) * gamma + beta


# ---------------------------------------------------------------------------
# Kernels
# ---------------------------------------------------------------------------
def _linear_kernel(x_ref, w_ref, b_ref, o_ref):
    y = jnp.dot(x_ref[...], w_ref[...], preferred_element_type=jnp.float32)
    o_ref[...] = (y + b_ref[...]).astype(o_ref.dtype)


def _temporal_kernel(*refs, gated, eps):
    # One (b, n) unit: x (P, H).  LN over H, FFN over P via pre-transposed weights
    # (Pef,P)@(P,H) matmuls so H stays lane-dense, SiLU gate, residual add.
    if gated:
        (x_ref, g_ref, b_ref, w1t_ref, b1_ref, w2t_ref, b2_ref,
         wgt_ref, bg_ref, o_ref) = refs
    else:
        (x_ref, g_ref, b_ref, w1t_ref, b1_ref, w2t_ref, b2_ref, o_ref) = refs
        wgt_ref = bg_ref = None
    x = x_ref[...].astype(jnp.float32)                              # (P, H)
    xn = _layernorm(x, g_ref[...], b_ref[...], eps)
    h = _gelu(jnp.dot(w1t_ref[...], xn,
                      preferred_element_type=jnp.float32) + b1_ref[...])   # (Pef, H)
    z = jnp.dot(w2t_ref[...], h,
                preferred_element_type=jnp.float32) + b2_ref[...]          # (P, H)
    if gated:
        g = jnp.dot(wgt_ref[...], z,
                    preferred_element_type=jnp.float32) + bg_ref[...]
        z = z * (g * jax.nn.sigmoid(g))          # z * silu(gate(z))
    o_ref[...] = (z + x).astype(o_ref.dtype)


def _dim_mixer_kernel(*refs, gated, eps):
    # Fused: LN(H) + FFN(H, GELU) + SiLU gate + residual, and additionally the
    # graph mixer's LayerNorm of the result (second output) so no separate LN pass.
    if gated:
        (x_ref, g_ref, b_ref, w1_ref, b1_ref, w2_ref, b2_ref,
         wg_ref, bg_ref, g2_ref, bn2_ref, o_ref, o2_ref) = refs
    else:
        (x_ref, g_ref, b_ref, w1_ref, b1_ref, w2_ref, b2_ref,
         g2_ref, bn2_ref, o_ref, o2_ref) = refs
        wg_ref = bg_ref = None
    x = x_ref[...].astype(jnp.float32)                              # (blk, H)
    xn = _layernorm(x, g_ref[...], b_ref[...], eps)
    h = _gelu(jnp.dot(xn, w1_ref[...],
                      preferred_element_type=jnp.float32) + b1_ref[...])
    z = jnp.dot(h, w2_ref[...],
                preferred_element_type=jnp.float32) + b2_ref[...]
    if gated:
        g = jnp.dot(z, wg_ref[...],
                    preferred_element_type=jnp.float32) + bg_ref[...]
        z = z * (g * jax.nn.sigmoid(g))
    y = z + x
    o_ref[...] = y.astype(o_ref.dtype)
    o2_ref[...] = _layernorm(y, g2_ref[...], bn2_ref[...], eps).astype(o2_ref.dtype)


def _graphmix_kernel(a_ref, x_ref, o_ref):
    # mixed[b] = a_norm @ xn[b], xn[b]: (N, P*H) — lane-dense, no transposes.
    o_ref[...] = jnp.dot(a_ref[...], x_ref[...],
                         preferred_element_type=jnp.float32).astype(o_ref.dtype)


def _graph_ffn_kernel(*refs, gated):
    # Fused: FFN(H, GELU) + SiLU gate + residual (input is already graph-mixed+LN'd).
    if gated:
        (x_ref, res_ref, w1_ref, b1_ref, w2_ref, b2_ref,
         wg_ref, bg_ref, o_ref) = refs
    else:
        (x_ref, res_ref, w1_ref, b1_ref, w2_ref, b2_ref, o_ref) = refs
        wg_ref = bg_ref = None
    x = x_ref[...].astype(jnp.float32)
    h = _gelu(jnp.dot(x, w1_ref[...],
                      preferred_element_type=jnp.float32) + b1_ref[...])
    z = jnp.dot(h, w2_ref[...],
                preferred_element_type=jnp.float32) + b2_ref[...]
    if gated:
        g = jnp.dot(z, wg_ref[...],
                    preferred_element_type=jnp.float32) + bg_ref[...]
        z = z * (g * jax.nn.sigmoid(g))
    o_ref[...] = (z + res_ref[...]).astype(o_ref.dtype)


# ---------------------------------------------------------------------------
# Pallas wrappers
# ---------------------------------------------------------------------------
def pallas_linear(x2d, w, b):
    rows, din = x2d.shape
    dout = w.shape[1]
    blk, padded = _row_block(rows)
    out = pl.pallas_call(
        _linear_kernel,
        out_shape=jax.ShapeDtypeStruct((padded, dout), x2d.dtype),
        grid=(padded // blk,),
        in_specs=[
            pl.BlockSpec((blk, din), lambda i: (i, 0)),
            pl.BlockSpec((din, dout), lambda i: (0, 0)),
            pl.BlockSpec((1, dout), lambda i: (0, 0)),
        ],
        out_specs=pl.BlockSpec((blk, dout), lambda i: (i, 0)),
        compiler_params=_compiler_params(1),
    )(_pad_rows(x2d, padded), w, b.reshape(1, dout))
    return out[:rows] if padded != rows else out


def pallas_temporal_mixer(x, norm, ffn, gate, eps=1e-5):
    """Fused LN + patch-FFN + gate + residual; grid over B*N, H lane-dense."""
    B, N, P, H = x.shape
    gamma, beta = norm
    w1, b1, w2, b2 = ffn
    Pef = w1.shape[1]
    gated = gate is not None
    x3 = x.reshape(B * N, P, H)

    inputs = [x3, gamma.reshape(1, H), beta.reshape(1, H),
              w1.T, b1.reshape(Pef, 1), w2.T, b2.reshape(P, 1)]
    in_specs = [
        pl.BlockSpec((None, P, H), lambda i: (i, 0, 0)),
        pl.BlockSpec((1, H), lambda i: (0, 0)),
        pl.BlockSpec((1, H), lambda i: (0, 0)),
        pl.BlockSpec((Pef, P), lambda i: (0, 0)),
        pl.BlockSpec((Pef, 1), lambda i: (0, 0)),
        pl.BlockSpec((P, Pef), lambda i: (0, 0)),
        pl.BlockSpec((P, 1), lambda i: (0, 0)),
    ]
    if gated:
        wg, bg = gate
        inputs += [wg.T, bg.reshape(P, 1)]
        in_specs += [pl.BlockSpec((P, P), lambda i: (0, 0)),
                     pl.BlockSpec((P, 1), lambda i: (0, 0))]

    out = pl.pallas_call(
        functools.partial(_temporal_kernel, gated=gated, eps=eps),
        out_shape=jax.ShapeDtypeStruct((B * N, P, H), x.dtype),
        grid=(B * N,),
        in_specs=in_specs,
        out_specs=pl.BlockSpec((None, P, H), lambda i: (i, 0, 0)),
        compiler_params=_compiler_params(1),
    )(*inputs)
    return out.reshape(B, N, P, H)


def pallas_dim_mixer(x2d, norm, ffn, gate, norm2, eps=1e-5):
    """Fused LN + FFN + gate + residual; also emits LN_graph(result) as 2nd output."""
    rows, H = x2d.shape
    gamma, beta = norm
    w1, b1, w2, b2 = ffn
    g2, bn2 = norm2
    Hef = w1.shape[1]
    gated = gate is not None
    blk, padded = _row_block(rows)

    inputs = [_pad_rows(x2d, padded), gamma.reshape(1, H), beta.reshape(1, H),
              w1, b1.reshape(1, Hef), w2, b2.reshape(1, H)]
    in_specs = [
        pl.BlockSpec((blk, H), lambda i: (i, 0)),
        pl.BlockSpec((1, H), lambda i: (0, 0)),
        pl.BlockSpec((1, H), lambda i: (0, 0)),
        pl.BlockSpec((H, Hef), lambda i: (0, 0)),
        pl.BlockSpec((1, Hef), lambda i: (0, 0)),
        pl.BlockSpec((Hef, H), lambda i: (0, 0)),
        pl.BlockSpec((1, H), lambda i: (0, 0)),
    ]
    if gated:
        wg, bg = gate
        inputs += [wg, bg.reshape(1, H)]
        in_specs += [pl.BlockSpec((H, H), lambda i: (0, 0)),
                     pl.BlockSpec((1, H), lambda i: (0, 0))]
    inputs += [g2.reshape(1, H), bn2.reshape(1, H)]
    in_specs += [pl.BlockSpec((1, H), lambda i: (0, 0)),
                 pl.BlockSpec((1, H), lambda i: (0, 0))]

    y, yn = pl.pallas_call(
        functools.partial(_dim_mixer_kernel, gated=gated, eps=eps),
        out_shape=(jax.ShapeDtypeStruct((padded, H), x2d.dtype),
                   jax.ShapeDtypeStruct((padded, H), x2d.dtype)),
        grid=(padded // blk,),
        in_specs=in_specs,
        out_specs=(pl.BlockSpec((blk, H), lambda i: (i, 0)),
                   pl.BlockSpec((blk, H), lambda i: (i, 0))),
        compiler_params=_compiler_params(1),
    )(*inputs)
    if padded != rows:
        y, yn = y[:rows], yn[:rows]
    return y, yn


def pallas_graph_mix(a_norm, xg):
    """mixed[b] = a_norm @ xg[b]; xg: (B, N, P*H). No HBM transposes needed."""
    B, N, PH = xg.shape
    bm = _col_block(PH)
    return pl.pallas_call(
        _graphmix_kernel,
        out_shape=jax.ShapeDtypeStruct((B, N, PH), xg.dtype),
        grid=(B, PH // bm),
        in_specs=[
            pl.BlockSpec((N, N), lambda b, j: (0, 0)),
            pl.BlockSpec((None, N, bm), lambda b, j: (b, 0, j)),
        ],
        out_specs=pl.BlockSpec((None, N, bm), lambda b, j: (b, 0, j)),
        compiler_params=_compiler_params(2),
    )(a_norm, xg)


def pallas_graph_ffn(x2d, res2d, ffn, gate):
    rows, H = x2d.shape
    w1, b1, w2, b2 = ffn
    Hef = w1.shape[1]
    gated = gate is not None
    blk, padded = _row_block(rows)

    inputs = [_pad_rows(x2d, padded), _pad_rows(res2d, padded),
              w1, b1.reshape(1, Hef), w2, b2.reshape(1, H)]
    in_specs = [
        pl.BlockSpec((blk, H), lambda i: (i, 0)),
        pl.BlockSpec((blk, H), lambda i: (i, 0)),
        pl.BlockSpec((H, Hef), lambda i: (0, 0)),
        pl.BlockSpec((1, Hef), lambda i: (0, 0)),
        pl.BlockSpec((Hef, H), lambda i: (0, 0)),
        pl.BlockSpec((1, H), lambda i: (0, 0)),
    ]
    if gated:
        wg, bg = gate
        inputs += [wg, bg.reshape(1, H)]
        in_specs += [pl.BlockSpec((H, H), lambda i: (0, 0)),
                     pl.BlockSpec((1, H), lambda i: (0, 0))]

    out = pl.pallas_call(
        functools.partial(_graph_ffn_kernel, gated=gated),
        out_shape=jax.ShapeDtypeStruct((padded, H), x2d.dtype),
        grid=(padded // blk,),
        in_specs=in_specs,
        out_specs=pl.BlockSpec((blk, H), lambda i: (i, 0)),
        compiler_params=_compiler_params(1),
    )(*inputs)
    return out[:rows] if padded != rows else out


# ---------------------------------------------------------------------------
# Parameters
# ---------------------------------------------------------------------------
def _linear_init(key, din, dout):
    k1, k2 = jax.random.split(key)
    bound = float(din) ** -0.5
    w = jax.random.uniform(k1, (din, dout), jnp.float32, -bound, bound)
    b = jax.random.uniform(k2, (dout,), jnp.float32, -bound, bound)
    return w, b


def init_params(key, cfg):
    H, P, L = cfg["hidden_dim"], cfg["num_patches"], cfg["patch_length"]
    ef, nl = cfg["expansion_factor"], cfg["num_layers"]
    gated = cfg["gated_attn"]
    keys = iter(jax.random.split(key, 64))

    def norm_p():
        return (jnp.ones((H,), jnp.float32), jnp.zeros((H,), jnp.float32))

    params = {
        "patch": _linear_init(next(keys), L, H),
        "pe": jax.random.normal(next(keys), (P, H), jnp.float32),
        "layers": [],
        "downsample": [],
    }
    for i in range(nl):
        Pi = P // 2 ** i
        lp = {
            "t_norm": norm_p(),
            "t_ffn": _linear_init(next(keys), Pi, Pi * ef) + _linear_init(next(keys), Pi * ef, Pi),
            "t_gate": _linear_init(next(keys), Pi, Pi) if gated else None,
            "f_norm": norm_p(),
            "f_ffn": _linear_init(next(keys), H, H * ef) + _linear_init(next(keys), H * ef, H),
            "f_gate": _linear_init(next(keys), H, H) if gated else None,
            "g_norm": norm_p(),
            "g_ffn": _linear_init(next(keys), H, H * ef) + _linear_init(next(keys), H * ef, H),
            "g_gate": _linear_init(next(keys), H, H) if gated else None,
        }
        params["layers"].append(lp)
    for _ in range(nl - 1):
        params["downsample"].append(_linear_init(next(keys), H * cfg["downsample_factor"], H))
    return params


# ---------------------------------------------------------------------------
# Forward passes
# ---------------------------------------------------------------------------
def stmixer_forward(params, x_in, adj, cfg):
    """Pallas-backed STMixerEncoder.forward (inference)."""
    df = cfg["downsample_factor"]
    B, N, P, L = x_in.shape

    w, b = params["patch"]
    H = w.shape[1]
    x = pallas_linear(x_in.reshape(-1, L), w, b).reshape(B, N, P, H)
    if cfg["add_position"]:
        x = x + params["pe"][None, None, :, :]

    # Row-normalized adjacency (matches torch: adj / adj.sum(1).view(-1, 1)).
    a_norm = adj / jnp.sum(adj, axis=1, keepdims=True)

    x_all = []
    for idx in range(cfg["num_layers"]):
        lp = params["layers"][idx]
        B_, N_, P_, H_ = x.shape

        # --- Temporal mixer (over patches; skipped when P == 1) ---
        if P_ > 1:
            x = pallas_temporal_mixer(x, lp["t_norm"], lp["t_ffn"], lp["t_gate"])

        rows = B_ * N_ * P_

        # --- Dimension (feature) mixer + fused graph-LN of its output ---
        y2d, yn2d = pallas_dim_mixer(x.reshape(rows, H_), lp["f_norm"],
                                     lp["f_ffn"], lp["f_gate"], lp["g_norm"])

        # --- Graph mixer: adjacency mix (no transposes) + fused FFN/gate/residual ---
        mixed = pallas_graph_mix(a_norm, yn2d.reshape(B_, N_, P_ * H_))
        x = pallas_graph_ffn(mixed.reshape(rows, H_), y2d,
                             lp["g_ffn"], lp["g_gate"]).reshape(B_, N_, P_, H_)

        x_all.append(x)

        # --- DownSample ---
        if x.shape[-2] > 1:
            dw, db = params["downsample"][idx]
            xr = x.reshape(-1, H_ * df)             # == view(B, N, P//df, H*df)
            x = pallas_linear(xr, dw, db).reshape(B_, N_, P_ // df, H_)

    return x, x_all


def _layernorm_ref(x, g, b, eps=1e-5):
    mean = jnp.mean(x, axis=-1, keepdims=True)
    xc = x - mean
    var = jnp.mean(xc * xc, axis=-1, keepdims=True)
    return xc * jax.lax.rsqrt(var + eps) * g + b


def _ffn_ref(x, res, ffn, gate):
    w1, b1, w2, b2 = ffn
    z = _gelu(x @ w1 + b1) @ w2 + b2
    if gate is not None:
        wg, bg = gate
        g = z @ wg + bg
        z = z * (g * jax.nn.sigmoid(g))
    return z + res


def stmixer_forward_ref(params, x_in, adj, cfg):
    """Pure-JAX reference with identical math (dropout = identity)."""
    H = cfg["hidden_dim"]
    df = cfg["downsample_factor"]
    w, b = params["patch"]
    x = x_in @ w + b
    if cfg["add_position"]:
        x = x + params["pe"]
    a = adj / jnp.sum(adj, axis=1, keepdims=True)

    x_all = []
    for idx in range(cfg["num_layers"]):
        lp = params["layers"][idx]
        B, N, P, _ = x.shape
        if P > 1:
            res = x
            xn = _layernorm_ref(x, *lp["t_norm"])
            yt = _ffn_ref(jnp.swapaxes(xn, 2, 3), 0.0, lp["t_ffn"], lp["t_gate"])
            x = jnp.swapaxes(yt, 2, 3) + res
        x = _ffn_ref(_layernorm_ref(x, *lp["f_norm"]), x, lp["f_ffn"], lp["f_gate"])
        res = x
        xn = _layernorm_ref(x, *lp["g_norm"])
        mixed = jnp.einsum("kn,bnph->bkph", a, xn)
        x = _ffn_ref(mixed, res, lp["g_ffn"], lp["g_gate"])
        x_all.append(x)
        if x.shape[-2] > 1:
            dw, db = params["downsample"][idx]
            x = x.reshape(B, N, P // df, H * df) @ dw + db
    return x, x_all


# ---------------------------------------------------------------------------
if __name__ == "__main__":
    cfg = dict(
        hidden_dim=32,
        patch_length=16,
        num_patches=4,        # reaches 1 patch at the last layer (valid torch config)
        num_layers=3,
        downsample_factor=2,
        expansion_factor=2,
        gated_attn=True,
        add_position="learnable",
        dropout=0.0,          # identity at inference
    )
    B, N = 2, 4

    key = jax.random.PRNGKey(0)
    kp, kx, ka = jax.random.split(key, 3)
    x_in = jax.random.normal(kx, (B, N, cfg["num_patches"], cfg["patch_length"]), jnp.float32)
    adj = jax.random.uniform(ka, (N, N), jnp.float32, 0.1, 1.0) + jnp.eye(N, dtype=jnp.float32)
    params = init_params(kp, cfg)

    fwd = jax.jit(lambda p, x, a: stmixer_forward(p, x, a, cfg))
    out, out_all = fwd(params, x_in, adj)
    out = jax.block_until_ready(out)
    out_all = [jax.block_until_ready(t) for t in out_all]

    ref, ref_all = stmixer_forward_ref(params, x_in, adj, cfg)

    # Tolerance accounts for MXU f32 multi-pass vs XLA default matmul precision.
    assert out.shape == ref.shape == (B, N, 1, cfg["hidden_dim"])
    assert jnp.allclose(out, ref, atol=2e-2, rtol=2e-2), float(jnp.max(jnp.abs(out - ref)))
    assert len(out_all) == len(ref_all) == cfg["num_layers"]
    for o, r in zip(out_all, ref_all):
        assert o.shape == r.shape
        assert jnp.allclose(o, r, atol=2e-2, rtol=2e-2), float(jnp.max(jnp.abs(o - r)))

    print("KERNEL_OK")
</pallas_src>

<mosaic_0001>
module attributes {stable_mosaic.version = 11 : i64} {
  func.func @_linear_kernel(%arg0: i32, %arg1: memref<16x16xf32, #tpu.memory_space<vmem>>, %arg2: memref<16x32xf32, #tpu.memory_space<vmem>>, %arg3: memref<1x32xf32, #tpu.memory_space<vmem>>, %arg4: memref<16x32xf32, #tpu.memory_space<vmem>>) attributes {dimension_semantics = [#tpu.dimension_semantics<parallel>], iteration_bounds = array<i64: 2>, scalar_prefetch = 0 : i64, scratch_operands = 0 : i64, tpu.core_type = #tpu.core_type<tc>, window_params = [{transform_indices = @transform_0, window_bounds = array<i64: 16, 16>}, {pipeline_mode = #tpu.pipeline_mode<synchronous>, transform_indices = @transform_1, window_bounds = array<i64: 16, 32>}, {pipeline_mode = #tpu.pipeline_mode<synchronous>, transform_indices = @transform_2, window_bounds = array<i64: 1, 32>}, {transform_indices = @transform_3, window_bounds = array<i64: 16, 32>}]} {
    %c0 = arith.constant 0 : index
    %c0_0 = arith.constant 0 : index
    %0 = vector.load %arg1[%c0, %c0_0] : memref<16x16xf32, #tpu.memory_space<vmem>>, vector<16x16xf32>
    %c0_1 = arith.constant 0 : index
    %c0_2 = arith.constant 0 : index
    %1 = vector.load %arg2[%c0_1, %c0_2] : memref<16x32xf32, #tpu.memory_space<vmem>>, vector<16x32xf32>
    %cst = arith.constant dense<0.000000e+00> : vector<16x32xf32>
    %2 = tpu.matmul %0, %1, %cst {dimension_numbers = #tpu.dot_dimension_numbers<[1], [0], [0], [1], [0, 0, 1, 1], [], []>} : vector<16x16xf32>, vector<16x32xf32>, vector<16x32xf32> -> vector<16x32xf32>
    %c0_3 = arith.constant 0 : index
    %c0_4 = arith.constant 0 : index
    %3 = vector.load %arg3[%c0_3, %c0_4] : memref<1x32xf32, #tpu.memory_space<vmem>>, vector<1x32xf32>
    %4 = vector.broadcast %3 : vector<1x32xf32> to vector<16x32xf32>
    %5 = arith.addf %2, %4 : vector<16x32xf32>
    %c0_5 = arith.constant 0 : index
    %c0_6 = arith.constant 0 : index
    %6 = vector.load %arg4[%c0_5, %c0_6] : memref<16x32xf32, #tpu.memory_space<vmem>>, vector<16x32xf32>
    tpu.vector_store %arg4[%c0_5, %c0_6], %5 {strides = array<i32>} : memref<16x32xf32, #tpu.memory_space<vmem>>, vector<16x32xf32>,
    return
  }
  func.func @transform_0(%arg0: i32) -> (i32, i32) {
    %c0_i32 = arith.constant 0 : i32
    %c0_i32_0 = arith.constant 0 : i32
    return %arg0, %c0_i32 : i32, i32
  }
  func.func @transform_1(%arg0: i32) -> (i32, i32) {
    %c0_i32 = arith.constant 0 : i32
    %c0_i32_0 = arith.constant 0 : i32
    %c0_i32_1 = arith.constant 0 : i32
    return %c0_i32, %c0_i32_0 : i32, i32
  }
  func.func @transform_2(%arg0: i32) -> (i32, i32) {
    %c0_i32 = arith.constant 0 : i32
    %c0_i32_0 = arith.constant 0 : i32
    %c0_i32_1 = arith.constant 0 : i32
    return %c0_i32, %c0_i32_0 : i32, i32
  }
  func.func @transform_3(%arg0: i32) -> (i32, i32) {
    %c0_i32 = arith.constant 0 : i32
    %c0_i32_0 = arith.constant 0 : i32
    return %arg0, %c0_i32 : i32, i32
  }
}

module attributes {stable_mosaic.version = 11 : i64} {
  func.func @_temporal_kernel(%arg0: i32, %arg1: memref<1x4x32xf32, #tpu.memory_space<vmem>>, %arg2: memref<1x32xf32, #tpu.memory_space<vmem>>, %arg3: memref<1x32xf32, #tpu.memory_space<vmem>>, %arg4: memref<8x4xf32, #tpu.memory_space<vmem>>, %arg5: memref<8x1xf32, #tpu.memory_space<vmem>>, %arg6: memref<4x8xf32, #tpu.memory_space<vmem>>, %arg7: memref<4x1xf32, #tpu.memory_space<vmem>>, %arg8: memref<4x4xf32, #tpu.memory_space<vmem>>, %arg9: memref<4x1xf32, #tpu.memory_space<vmem>>, %arg10: memref<1x4x32xf32, #tpu.memory_space<vmem>>) attributes {dimension_semantics = [#tpu.dimension_semantics<parallel>], iteration_bounds = array<i64: 8>, scalar_prefetch = 0 : i64, scratch_operands = 0 : i64, tpu.core_type = #tpu.core_type<tc>, window_params = [{transform_indices = @transform_0, window_bounds = array<i64: 1, 4, 32>}, {pipeline_mode = #tpu.pipeline_mode<synchronous>, transform_indices = @transform_1, window_bounds = array<i64: 1, 32>}, {pipeline_mode = #tpu.pipeline_mode<synchronous>, transform_indices = @transform_2, window_bounds = array<i64: 1, 32>}, {pipeline_mode = #tpu.pipeline_mode<synchronous>, transform_indices = @transform_3, window_bounds = array<i64: 8, 4>}, {pipeline_mode = #tpu.pipeline_mode<synchronous>, transform_indices = @transform_4, window_bounds = array<i64: 8, 1>}, {pipeline_mode = #tpu.pipeline_mode<synchronous>, transform_indices = @transform_5, window_bounds = array<i64: 4, 8>}, {pipeline_mode = #tpu.pipeline_mode<synchronous>, transform_indices = @transform_6, window_bounds = array<i64: 4, 1>}, {pipeline_mode = #tpu.pipeline_mode<synchronous>, transform_indices = @transform_7, window_bounds = array<i64: 4, 4>}, {pipeline_mode = #tpu.pipeline_mode<synchronous>, transform_indices = @transform_8, window_bounds = array<i64: 4, 1>}, {transform_indices = @transform_9, window_bounds = array<i64: 1, 4, 32>}]} {
    %c0 = arith.constant 0 : index
    %c0_0 = arith.constant 0 : index
    %c0_1 = arith.constant 0 : index
    %0 = vector.load %arg1[%c0, %c0_0, %c0_1] : memref<1x4x32xf32, #tpu.memory_space<vmem>>, vector<1x4x32xf32>
    %1 = vector.shape_cast %0 : vector<1x4x32xf32> to vector<4x32xf32>
    %c0_2 = arith.constant 0 : index
    %c0_3 = arith.constant 0 : index
    %2 = vector.load %arg2[%c0_2, %c0_3] : memref<1x32xf32, #tpu.memory_space<vmem>>, vector<1x32xf32>
    %c0_4 = arith.constant 0 : index
    %c0_5 = arith.constant 0 : index
    %3 = vector.load %arg3[%c0_4, %c0_5] : memref<1x32xf32, #tpu.memory_space<vmem>>, vector<1x32xf32>
    %cst = arith.constant dense<0.000000e+00> : vector<4xf32>
    %4 = vector.multi_reduction <add>, %1, %cst [1] : vector<4x32xf32> to vector<4xf32>
    %5 = vector.shape_cast %4 : vector<4xf32> to vector<4x1xf32>
    %cst_6 = arith.constant 3.200000e+01 : f32
    %6 = vector.broadcast %cst_6 : f32 to vector<4x1xf32>
    %7 = arith.divf %5, %6 : vector<4x1xf32>
    %8 = vector.broadcast %7 : vector<4x1xf32> to vector<4x32xf32>
    %9 = arith.subf %1, %8 : vector<4x32xf32>
    %10 = arith.mulf %9, %9 : vector<4x32xf32>
    %cst_7 = arith.constant dense<0.000000e+00> : vector<4xf32>
    %11 = vector.multi_reduction <add>, %10, %cst_7 [1] : vector<4x32xf32> to vector<4xf32>
    %12 = vector.shape_cast %11 : vector<4xf32> to vector<4x1xf32>
    %cst_8 = arith.constant 3.200000e+01 : f32
    %13 = vector.broadcast %cst_8 : f32 to vector<4x1xf32>
    %14 = arith.divf %12, %13 : vector<4x1xf32>
    %cst_9 = arith.constant 9.99999974E-6 : f32
    %15 = vector.broadcast %cst_9 : f32 to vector<4x1xf32>
    %16 = arith.addf %14, %15 : vector<4x1xf32>
    %17 = math.rsqrt %16 : vector<4x1xf32>
    %18 = vector.broadcast %17 : vector<4x1xf32> to vector<4x32xf32>
    %19 = arith.mulf %9, %18 : vector<4x32xf32>
    %20 = vector.broadcast %2 : vector<1x32xf32> to vector<4x32xf32>
    %21 = arith.mulf %19, %20 : vector<4x32xf32>
    %22 = vector.broadcast %3 : vector<1x32xf32> to vector<4x32xf32>
    %23 = arith.addf %21, %22 : vector<4x32xf32>
    %c0_10 = arith.constant 0 : index
    %c0_11 = arith.constant 0 : index
    %24 = vector.load %arg4[%c0_10, %c0_11] : memref<8x4xf32, #tpu.memory_space<vmem>>, vector<8x4xf32>
    %cst_12 = arith.constant dense<0.000000e+00> : vector<8x32xf32>
    %25 = tpu.matmul %24, %23, %cst_12 {dimension_numbers = #tpu.dot_dimension_numbers<[1], [0], [0], [1], [0, 0, 1, 1], [], []>} : vector<8x4xf32>, vector<4x32xf32>, vector<8x32xf32> -> vector<8x32xf32>
    %c0_13 = arith.constant 0 : index
    %c0_14 = arith.constant 0 : index
    %26 = vector.load %arg5[%c0_13, %c0_14] : memref<8x1xf32, #tpu.memory_space<vmem>>, vector<8x1xf32>
    %27 = vector.broadcast %26 : vector<8x1xf32> to vector<8x32xf32>
    %28 = arith.addf %25, %27 : vector<8x32xf32>
    %cst_15 = arith.constant 5.000000e-01 : f32
    %29 = vector.broadcast %cst_15 : f32 to vector<8x32xf32>
    %30 = arith.mulf %29, %28 : vector<8x32xf32>
    %cst_16 = arith.constant 4.471500e-02 : f32
    %31 = vector.broadcast %cst_16 : f32 to vector<8x32xf32>
    %32 = arith.mulf %31, %28 : vector<8x32xf32>
    %33 = arith.mulf %32, %28 : vector<8x32xf32>
    %34 = arith.mulf %33, %28 : vector<8x32xf32>
    %35 = arith.addf %28, %34 : vector<8x32xf32>
    %cst_17 = arith.constant 0.797884583 : f32
    %36 = vector.broadcast %cst_17 : f32 to vector<8x32xf32>
    %37 = arith.mulf %36, %35 : vector<8x32xf32>
    %38 = math.tanh %37 : vector<8x32xf32>
    %cst_18 = arith.constant 1.000000e+00 : f32
    %39 = vector.broadcast %cst_18 : f32 to vector<8x32xf32>
    %40 = arith.addf %39, %38 : vector<8x32xf32>
    %41 = arith.mulf %30, %40 : vector<8x32xf32>
    %c0_19 = arith.constant 0 : index
    %c0_20 = arith.constant 0 : index
    %42 = vector.load %arg6[%c0_19, %c0_20] : memref<4x8xf32, #tpu.memory_space<vmem>>, vector<4x8xf32>
    %cst_21 = arith.constant dense<0.000000e+00> : vector<4x32xf32>
    %43 = tpu.matmul %42, %41, %cst_21 {dimension_numbers = #tpu.dot_dimension_numbers<[1], [0], [0], [1], [0, 0, 1, 1], [], []>} : vector<4x8xf32>, vector<8x32xf32>, vector<4x32xf32> -> vector<4x32xf32>
    %c0_22 = arith.constant 0 : index
    %c0_23 = arith.constant 0 : index
    %44 = vector.load %arg7[%c0_22, %c0_23] : memref<4x1xf32, #tpu.memory_space<vmem>>, vector<4x1xf32>
    %45 = vector.broadcast %44 : vector<4x1xf32> to vector<4x32xf32>
    %46 = arith.addf %43, %45 : vector<4x32xf32>
    %c0_24 = arith.constant 0 : index
    %c0_25 = arith.constant 0 : index
    %47 = vector.load %arg8[%c0_24, %c0_25] : memref<4x4xf32, #tpu.memory_space<vmem>>, vector<4x4xf32>
    %cst_26 = arith.constant dense<0.000000e+00> : vector<4x32xf32>
    %48 = tpu.matmul %47, %46, %cst_26 {dimension_numbers = #tpu.dot_dimension_numbers<[1], [0], [0], [1], [0, 0, 1, 1], [], []>} : vector<4x4xf32>, vector<4x32xf32>, vector<4x32xf32> -> vector<4x32xf32>
    %c0_27 = arith.constant 0 : index
    %c0_28 = arith.constant 0 : index
    %49 = vector.load %arg9[%c0_27, %c0_28] : memref<4x1xf32, #tpu.memory_space<vmem>>, vector<4x1xf32>
    %50 = vector.broadcast %49 : vector<4x1xf32> to vector<4x32xf32>
    %51 = arith.addf %48, %50 : vector<4x32xf32>
    %52 = arith.negf %51 : vector<4x32xf32>
    %53 = math.exp %52 : vector<4x32xf32>
    %cst_29 = arith.constant 1.000000e+00 : f32
    %54 = vector.broadcast %cst_29 : f32 to vector<4x32xf32>
    %55 = arith.addf %54, %53 : vector<4x32xf32>
    %56 = arith.divf %54, %55 : vector<4x32xf32>
    %57 = arith.mulf %51, %56 : vector<4x32xf32>
    %58 = arith.mulf %46, %57 : vector<4x32xf32>
    %59 = arith.addf %58, %1 : vector<4x32xf32>
    %c0_30 = arith.constant 0 : index
    %c0_31 = arith.constant 0 : index
    %c0_32 = arith.constant 0 : index
    %60 = vector.load %arg10[%c0_30, %c0_31, %c0_32] : memref<1x4x32xf32, #tpu.memory_space<vmem>>, vector<1x4x32xf32>
    %61 = vector.shape_cast %60 : vector<1x4x32xf32> to vector<4x32xf32>
    %62 = vector.shape_cast %59 : vector<4x32xf32> to vector<1x4x32xf32>
    tpu.vector_store %arg10[%c0_30, %c0_31, %c0_32], %62 {strides = array<i32>} : memref<1x4x32xf32, #tpu.memory_space<vmem>>, vector<1x4x32xf32>,
    return
  }
  func.func @transform_0(%arg0: i32) -> (i32, i32, i32) {
    %c0_i32 = arith.constant 0 : i32
    %c0_i32_0 = arith.constant 0 : i32
    %c0_i32_1 = arith.constant 0 : i32
    return %arg0, %c0_i32, %c0_i32_0 : i32, i32, i32
  }
  func.func @transform_1(%arg0: i32) -> (i32, i32) {
    %c0_i32 = arith.constant 0 : i32
    %c0_i32_0 = arith.constant 0 : i32
    %c0_i32_1 = arith.constant 0 : i32
    return %c0_i32, %c0_i32_0 : i32, i32
  }
  func.func @transform_2(%arg0: i32) -> (i32, i32) {
    %c0_i32 = arith.constant 0 : i32
    %c0_i32_0 = arith.constant 0 : i32
    %c0_i32_1 = arith.constant 0 : i32
    return %c0_i32, %c0_i32_0 : i32, i32
  }
  func.func @transform_3(%arg0: i32) -> (i32, i32) {
    %c0_i32 = arith.constant 0 : i32
    %c0_i32_0 = arith.constant 0 : i32
    %c0_i32_1 = arith.constant 0 : i32
    return %c0_i32, %c0_i32_0 : i32, i32
  }
  func.func @transform_4(%arg0: i32) -> (i32, i32) {
    %c0_i32 = arith.constant 0 : i32
    %c0_i32_0 = arith.constant 0 : i32
    %c0_i32_1 = arith.constant 0 : i32
    return %c0_i32, %c0_i32_0 : i32, i32
  }
  func.func @transform_5(%arg0: i32) -> (i32, i32) {
    %c0_i32 = arith.constant 0 : i32
    %c0_i32_0 = arith.constant 0 : i32
    %c0_i32_1 = arith.constant 0 : i32
    return %c0_i32, %c0_i32_0 : i32, i32
  }
  func.func @transform_6(%arg0: i32) -> (i32, i32) {
    %c0_i32 = arith.constant 0 : i32
    %c0_i32_0 = arith.constant 0 : i32
    %c0_i32_1 = arith.constant 0 : i32
    return %c0_i32, %c0_i32_0 : i32, i32
  }
  func.func @transform_7(%arg0: i32) -> (i32, i32) {
    %c0_i32 = arith.constant 0 : i32
    %c0_i32_0 = arith.constant 0 : i32
    %c0_i32_1 = arith.constant 0 : i32
    return %c0_i32, %c0_i32_0 : i32, i32
  }
  func.func @transform_8(%arg0: i32) -> (i32, i32) {
    %c0_i32 = arith.constant 0 : i32
    %c0_i32_0 = arith.constant 0 : i32
    %c0_i32_1 = arith.constant 0 : i32
    return %c0_i32, %c0_i32_0 : i32, i32
  }
  func.func @transform_9(%arg0: i32) -> (i32, i32, i32) {
    %c0_i32 = arith.constant 0 : i32
    %c0_i32_0 = arith.constant 0 : i32
    %c0_i32_1 = arith.constant 0 : i32
    return %arg0, %c0_i32, %c0_i32_0 : i32, i32, i32
  }
}

module attributes {stable_mosaic.version = 11 : i64} {
  func.func @_dim_mixer_kernel(%arg0: i32, %arg1: memref<16x32xf32, #tpu.memory_space<vmem>>, %arg2: memref<1x32xf32, #tpu.memory_space<vmem>>, %arg3: memref<1x32xf32, #tpu.memory_space<vmem>>, %arg4: memref<32x64xf32, #tpu.memory_space<vmem>>, %arg5: memref<1x64xf32, #tpu.memory_space<vmem>>, %arg6: memref<64x32xf32, #tpu.memory_space<vmem>>, %arg7: memref<1x32xf32, #tpu.memory_space<vmem>>, %arg8: memref<32x32xf32, #tpu.memory_space<vmem>>, %arg9: memref<1x32xf32, #tpu.memory_space<vmem>>, %arg10: memref<1x32xf32, #tpu.memory_space<vmem>>, %arg11: memref<1x32xf32, #tpu.memory_space<vmem>>, %arg12: memref<16x32xf32, #tpu.memory_space<vmem>>, %arg13: memref<16x32xf32, #tpu.memory_space<vmem>>) attributes {dimension_semantics = [#tpu.dimension_semantics<parallel>], iteration_bounds = array<i64: 2>, scalar_prefetch = 0 : i64, scratch_operands = 0 : i64, tpu.core_type = #tpu.core_type<tc>, window_params = [{transform_indices = @transform_0, window_bounds = array<i64: 16, 32>}, {pipeline_mode = #tpu.pipeline_mode<synchronous>, transform_indices = @transform_1, window_bounds = array<i64: 1, 32>}, {pipeline_mode = #tpu.pipeline_mode<synchronous>, transform_indices = @transform_2, window_bounds = array<i64: 1, 32>}, {pipeline_mode = #tpu.pipeline_mode<synchronous>, transform_indices = @transform_3, window_bounds = array<i64: 32, 64>}, {pipeline_mode = #tpu.pipeline_mode<synchronous>, transform_indices = @transform_4, window_bounds = array<i64: 1, 64>}, {pipeline_mode = #tpu.pipeline_mode<synchronous>, transform_indices = @transform_5, window_bounds = array<i64: 64, 32>}, {pipeline_mode = #tpu.pipeline_mode<synchronous>, transform_indices = @transform_6, window_bounds = array<i64: 1, 32>}, {pipeline_mode = #tpu.pipeline_mode<synchronous>, transform_indices = @transform_7, window_bounds = array<i64: 32, 32>}, {pipeline_mode = #tpu.pipeline_mode<synchronous>, transform_indices = @transform_8, window_bounds = array<i64: 1, 32>}, {pipeline_mode = #tpu.pipeline_mode<synchronous>, transform_indices = @transform_9, window_bounds = array<i64: 1, 32>}, {pipeline_mode = #tpu.pipeline_mode<synchronous>, transform_indices = @transform_10, window_bounds = array<i64: 1, 32>}, {transform_indices = @transform_11, window_bounds = array<i64: 16, 32>}, {transform_indices = @transform_12, window_bounds = array<i64: 16, 32>}]} {
    %c0 = arith.constant 0 : index
    %c0_0 = arith.constant 0 : index
    %0 = vector.load %arg1[%c0, %c0_0] : memref<16x32xf32, #tpu.memory_space<vmem>>, vector<16x32xf32>
    %c0_1 = arith.constant 0 : index
    %c0_2 = arith.constant 0 : index
    %1 = vector.load %arg2[%c0_1, %c0_2] : memref<1x32xf32, #tpu.memory_space<vmem>>, vector<1x32xf32>
    %c0_3 = arith.constant 0 : index
    %c0_4 = arith.constant 0 : index
    %2 = vector.load %arg3[%c0_3, %c0_4] : memref<1x32xf32, #tpu.memory_space<vmem>>, vector<1x32xf32>
    %cst = arith.constant dense<0.000000e+00> : vector<16xf32>
    %3 = vector.multi_reduction <add>, %0, %cst [1] : vector<16x32xf32> to vector<16xf32>
    %4 = vector.shape_cast %3 : vector<16xf32> to vector<16x1xf32>
    %cst_5 = arith.constant 3.200000e+01 : f32
    %5 = vector.broadcast %cst_5 : f32 to vector<16x1xf32>
    %6 = arith.divf %4, %5 : vector<16x1xf32>
    %7 = vector.broadcast %6 : vector<16x1xf32> to vector<16x32xf32>
    %8 = arith.subf %0, %7 : vector<16x32xf32>
    %9 = arith.mulf %8, %8 : vector<16x32xf32>
    %cst_6 = arith.constant dense<0.000000e+00> : vector<16xf32>
    %10 = vector.multi_reduction <add>, %9, %cst_6 [1] : vector<16x32xf32> to vector<16xf32>
    %11 = vector.shape_cast %10 : vector<16xf32> to vector<16x1xf32>
    %cst_7 = arith.constant 3.200000e+01 : f32
    %12 = vector.broadcast %cst_7 : f32 to vector<16x1xf32>
    %13 = arith.divf %11, %12 : vector<16x1xf32>
    %cst_8 = arith.constant 9.99999974E-6 : f32
    %14 = vector.broadcast %cst_8 : f32 to vector<16x1xf32>
    %15 = arith.addf %13, %14 : vector<16x1xf32>
    %16 = math.rsqrt %15 : vector<16x1xf32>
    %17 = vector.broadcast %16 : vector<16x1xf32> to vector<16x32xf32>
    %18 = arith.mulf %8, %17 : vector<16x32xf32>
    %19 = vector.broadcast %1 : vector<1x32xf32> to vector<16x32xf32>
    %20 = arith.mulf %18, %19 : vector<16x32xf32>
    %21 = vector.broadcast %2 : vector<1x32xf32> to vector<16x32xf32>
    %22 = arith.addf %20, %21 : vector<16x32xf32>
    %c0_9 = arith.constant 0 : index
    %c0_10 = arith.constant 0 : index
    %23 = vector.load %arg4[%c0_9, %c0_10] : memref<32x64xf32, #tpu.memory_space<vmem>>, vector<32x64xf32>
    %cst_11 = arith.constant dense<0.000000e+00> : vector<16x64xf32>
    %24 = tpu.matmul %22, %23, %cst_11 {dimension_numbers = #tpu.dot_dimension_numbers<[1], [0], [0], [1], [0, 0, 1, 1], [], []>} : vector<16x32xf32>, vector<32x64xf32>, vector<16x64xf32> -> vector<16x64xf32>
    %c0_12 = arith.constant 0 : index
    %c0_13 = arith.constant 0 : index
    %25 = vector.load %arg5[%c0_12, %c0_13] : memref<1x64xf32, #tpu.memory_space<vmem>>, vector<1x64xf32>
    %26 = vector.broadcast %25 : vector<1x64xf32> to vector<16x64xf32>
    %27 = arith.addf %24, %26 : vector<16x64xf32>
    %cst_14 = arith.constant 5.000000e-01 : f32
    %28 = vector.broadcast %cst_14 : f32 to vector<16x64xf32>
    %29 = arith.mulf %28, %27 : vector<16x64xf32>
    %cst_15 = arith.constant 4.471500e-02 : f32
    %30 = vector.broadcast %cst_15 : f32 to vector<16x64xf32>
    %31 = arith.mulf %30, %27 : vector<16x64xf32>
    %32 = arith.mulf %31, %27 : vector<16x64xf32>
    %33 = arith.mulf %32, %27 : vector<16x64xf32>
    %34 = arith.addf %27, %33 : vector<16x64xf32>
    %cst_16 = arith.constant 0.797884583 : f32
    %35 = vector.broadcast %cst_16 : f32 to vector<16x64xf32>
    %36 = arith.mulf %35, %34 : vector<16x64xf32>
    %37 = math.tanh %36 : vector<16x64xf32>
    %cst_17 = arith.constant 1.000000e+00 : f32
    %38 = vector.broadcast %cst_17 : f32 to vector<16x64xf32>
    %39 = arith.addf %38, %37 : vector<16x64xf32>
    %40 = arith.mulf %29, %39 : vector<16x64xf32>
    %c0_18 = arith.constant 0 : index
    %c0_19 = arith.constant 0 : index
    %41 = vector.load %arg6[%c0_18, %c0_19] : memref<64x32xf32, #tpu.memory_space<vmem>>, vector<64x32xf32>
    %cst_20 = arith.constant dense<0.000000e+00> : vector<16x32xf32>
    %42 = tpu.matmul %40, %41, %cst_20 {dimension_numbers = #tpu.dot_dimension_numbers<[1], [0], [0], [1], [0, 0, 1, 1], [], []>} : vector<16x64xf32>, vector<64x32xf32>, vector<16x32xf32> -> vector<16x32xf32>
    %c0_21 = arith.constant 0 : index
    %c0_22 = arith.constant 0 : index
    %43 = vector.load %arg7[%c0_21, %c0_22] : memref<1x32xf32, #tpu.memory_space<vmem>>, vector<1x32xf32>
    %44 = vector.broadcast %43 : vector<1x32xf32> to vector<16x32xf32>
    %45 = arith.addf %42, %44 : vector<16x32xf32>
    %c0_23 = arith.constant 0 : index
    %c0_24 = arith.constant 0 : index
    %46 = vector.load %arg8[%c0_23, %c0_24] : memref<32x32xf32, #tpu.memory_space<vmem>>, vector<32x32xf32>
    %cst_25 = arith.constant dense<0.000000e+00> : vector<16x32xf32>
    %47 = tpu.matmul %45, %46, %cst_25 {dimension_numbers = #tpu.dot_dimension_numbers<[1], [0], [0], [1], [0, 0, 1, 1], [], []>} : vector<16x32xf32>, vector<32x32xf32>, vector<16x32xf32> -> vector<16x32xf32>
    %c0_26 = arith.constant 0 : index
    %c0_27 = arith.constant 0 : index
    %48 = vector.load %arg9[%c0_26, %c0_27] : memref<1x32xf32, #tpu.memory_space<vmem>>, vector<1x32xf32>
    %49 = vector.broadcast %48 : vector<1x32xf32> to vector<16x32xf32>
    %50 = arith.addf %47, %49 : vector<16x32xf32>
    %51 = arith.negf %50 : vector<16x32xf32>
    %52 = math.exp %51 : vector<16x32xf32>
    %cst_28 = arith.constant 1.000000e+00 : f32
    %53 = vector.broadcast %cst_28 : f32 to vector<16x32xf32>
    %54 = arith.addf %53, %52 : vector<16x32xf32>
    %55 = arith.divf %53, %54 : vector<16x32xf32>
    %56 = arith.mulf %50, %55 : vector<16x32xf32>
    %57 = arith.mulf %45, %56 : vector<16x32xf32>
    %58 = arith.addf %57, %0 : vector<16x32xf32>
    %c0_29 = arith.constant 0 : index
    %c0_30 = arith.constant 0 : index
    %59 = vector.load %arg12[%c0_29, %c0_30] : memref<16x32xf32, #tpu.memory_space<vmem>>, vector<16x32xf32>
    tpu.vector_store %arg12[%c0_29, %c0_30], %58 {strides = array<i32>} : memref<16x32xf32, #tpu.memory_space<vmem>>, vector<16x32xf32>,
    %c0_31 = arith.constant 0 : index
    %c0_32 = arith.constant 0 : index
    %60 = vector.load %arg10[%c0_31, %c0_32] : memref<1x32xf32, #tpu.memory_space<vmem>>, vector<1x32xf32>
    %c0_33 = arith.constant 0 : index
    %c0_34 = arith.constant 0 : index
    %61 = vector.load %arg11[%c0_33, %c0_34] : memref<1x32xf32, #tpu.memory_space<vmem>>, vector<1x32xf32>
    %cst_35 = arith.constant dense<0.000000e+00> : vector<16xf32>
    %62 = vector.multi_reduction <add>, %58, %cst_35 [1] : vector<16x32xf32> to vector<16xf32>
    %63 = vector.shape_cast %62 : vector<16xf32> to vector<16x1xf32>
    %cst_36 = arith.constant 3.200000e+01 : f32
    %64 = vector.broadcast %cst_36 : f32 to vector<16x1xf32>
    %65 = arith.divf %63, %64 : vector<16x1xf32>
    %66 = vector.broadcast %65 : vector<16x1xf32> to vector<16x32xf32>
    %67 = arith.subf %58, %66 : vector<16x32xf32>
    %68 = arith.mulf %67, %67 : vector<16x32xf32>
    %cst_37 = arith.constant dense<0.000000e+00> : vector<16xf32>
    %69 = vector.multi_reduction <add>, %68, %cst_37 [1] : vector<16x32xf32> to vector<16xf32>
    %70 = vector.shape_cast %69 : vector<16xf32> to vector<16x1xf32>
    %cst_38 = arith.constant 3.200000e+01 : f32
    %71 = vector.broadcast %cst_38 : f32 to vector<16x1xf32>
    %72 = arith.divf %70, %71 : vector<16x1xf32>
    %cst_39 = arith.constant 9.99999974E-6 : f32
    %73 = vector.broadcast %cst_39 : f32 to vector<16x1xf32>
    %74 = arith.addf %72, %73 : vector<16x1xf32>
    %75 = math.rsqrt %74 : vector<16x1xf32>
    %76 = vector.broadcast %75 : vector<16x1xf32> to vector<16x32xf32>
    %77 = arith.mulf %67, %76 : vector<16x32xf32>
    %78 = vector.broadcast %60 : vector<1x32xf32> to vector<16x32xf32>
    %79 = arith.mulf %77, %78 : vector<16x32xf32>
    %80 = vector.broadcast %61 : vector<1x32xf32> to vector<16x32xf32>
    %81 = arith.addf %79, %80 : vector<16x32xf32>
    %c0_40 = arith.constant 0 : index
    %c0_41 = arith.constant 0 : index
    %82 = vector.load %arg13[%c0_40, %c0_41] : memref<16x32xf32, #tpu.memory_space<vmem>>, vector<16x32xf32>
    tpu.vector_store %arg13[%c0_40, %c0_41], %81 {strides = array<i32>} : memref<16x32xf32, #tpu.memory_space<vmem>>, vector<16x32xf32>,
    return
  }
  func.func @transform_0(%arg0: i32) -> (i32, i32) {
    %c0_i32 = arith.constant 0 : i32
    %c0_i32_0 = arith.constant 0 : i32
    return %arg0, %c0_i32 : i32, i32
  }
  func.func @transform_1(%arg0: i32) -> (i32, i32) {
    %c0_i32 = arith.constant 0 : i32
    %c0_i32_0 = arith.constant 0 : i32
    %c0_i32_1 = arith.constant 0 : i32
    return %c0_i32, %c0_i32_0 : i32, i32
  }
  func.func @transform_2(%arg0: i32) -> (i32, i32) {
    %c0_i32 = arith.constant 0 : i32
    %c0_i32_0 = arith.constant 0 : i32
    %c0_i32_1 = arith.constant 0 : i32
    return %c0_i32, %c0_i32_0 : i32, i32
  }
  func.func @transform_3(%arg0: i32) -> (i32, i32) {
    %c0_i32 = arith.constant 0 : i32
    %c0_i32_0 = arith.constant 0 : i32
    %c0_i32_1 = arith.constant 0 : i32
    return %c0_i32, %c0_i32_0 : i32, i32
  }
  func.func @transform_4(%arg0: i32) -> (i32, i32) {
    %c0_i32 = arith.constant 0 : i32
    %c0_i32_0 = arith.constant 0 : i32
    %c0_i32_1 = arith.constant 0 : i32
    return %c0_i32, %c0_i32_0 : i32, i32
  }
  func.func @transform_5(%arg0: i32) -> (i32, i32) {
    %c0_i32 = arith.constant 0 : i32
    %c0_i32_0 = arith.constant 0 : i32
    %c0_i32_1 = arith.constant 0 : i32
    return %c0_i32, %c0_i32_0 : i32, i32
  }
  func.func @transform_6(%arg0: i32) -> (i32, i32) {
    %c0_i32 = arith.constant 0 : i32
    %c0_i32_0 = arith.constant 0 : i32
    %c0_i32_1 = arith.constant 0 : i32
    return %c0_i32, %c0_i32_0 : i32, i32
  }
  func.func @transform_7(%arg0: i32) -> (i32, i32) {
    %c0_i32 = arith.constant 0 : i32
    %c0_i32_0 = arith.constant 0 : i32
    %c0_i32_1 = arith.constant 0 : i32
    return %c0_i32, %c0_i32_0 : i32, i32
  }
  func.func @transform_8(%arg0: i32) -> (i32, i32) {
    %c0_i32 = arith.constant 0 : i32
    %c0_i32_0 = arith.constant 0 : i32
    %c0_i32_1 = arith.constant 0 : i32
    return %c0_i32, %c0_i32_0 : i32, i32
  }
  func.func @transform_9(%arg0: i32) -> (i32, i32) {
    %c0_i32 = arith.constant 0 : i32
    %c0_i32_0 = arith.constant 0 : i32
    %c0_i32_1 = arith.constant 0 : i32
    return %c0_i32, %c0_i32_0 : i32, i32
  }
  func.func @transform_10(%arg0: i32) -> (i32, i32) {
    %c0_i32 = arith.constant 0 : i32
    %c0_i32_0 = arith.constant 0 : i32
    %c0_i32_1 = arith.constant 0 : i32
    return %c0_i32, %c0_i32_0 : i32, i32
  }
  func.func @transform_11(%arg0: i32) -> (i32, i32) {
    %c0_i32 = arith.constant 0 : i32
    %c0_i32_0 = arith.constant 0 : i32
    return %arg0, %c0_i32 : i32, i32
  }
  func.func @transform_12(%arg0: i32) -> (i32, i32) {
    %c0_i32 = arith.constant 0 : i32
    %c0_i32_0 = arith.constant 0 : i32
    return %arg0, %c0_i32 : i32, i32
  }
}

module attributes {stable_mosaic.version = 11 : i64} {
  func.func @_graphmix_kernel(%arg0: i32, %arg1: i32, %arg2: memref<4x4xf32, #tpu.memory_space<vmem>>, %arg3: memref<1x4x128xf32, #tpu.memory_space<vmem>>, %arg4: memref<1x4x128xf32, #tpu.memory_space<vmem>>) attributes {dimension_semantics = [#tpu.dimension_semantics<parallel>, #tpu.dimension_semantics<parallel>], iteration_bounds = array<i64: 2, 1>, scalar_prefetch = 0 : i64, scratch_operands = 0 : i64, tpu.core_type = #tpu.core_type<tc>, window_params = [{pipeline_mode = #tpu.pipeline_mode<synchronous>, transform_indices = @transform_0, window_bounds = array<i64: 4, 4>}, {transform_indices = @transform_1, window_bounds = array<i64: 1, 4, 128>}, {transform_indices = @transform_2, window_bounds = array<i64: 1, 4, 128>}]} {
    %c0 = arith.constant 0 : index
    %c0_0 = arith.constant 0 : index
    %0 = vector.load %arg2[%c0, %c0_0] : memref<4x4xf32, #tpu.memory_space<vmem>>, vector<4x4xf32>
    %c0_1 = arith.constant 0 : index
    %c0_2 = arith.constant 0 : index
    %c0_3 = arith.constant 0 : index
    %1 = vector.load %arg3[%c0_1, %c0_2, %c0_3] : memref<1x4x128xf32, #tpu.memory_space<vmem>>, vector<1x4x128xf32>
    %2 = vector.shape_cast %1 : vector<1x4x128xf32> to vector<4x128xf32>
    %cst = arith.constant dense<0.000000e+00> : vector<4x128xf32>
    %3 = tpu.matmul %0, %2, %cst {dimension_numbers = #tpu.dot_dimension_numbers<[1], [0], [0], [1], [0, 0, 1, 1], [], []>} : vector<4x4xf32>, vector<4x128xf32>, vector<4x128xf32> -> vector<4x128xf32>
    %c0_4 = arith.constant 0 : index
    %c0_5 = arith.constant 0 : index
    %c0_6 = arith.constant 0 : index
    %4 = vector.load %arg4[%c0_4, %c0_5, %c0_6] : memref<1x4x128xf32, #tpu.memory_space<vmem>>, vector<1x4x128xf32>
    %5 = vector.shape_cast %4 : vector<1x4x128xf32> to vector<4x128xf32>
    %6 = vector.shape_cast %3 : vector<4x128xf32> to vector<1x4x128xf32>
    tpu.vector_store %arg4[%c0_4, %c0_5, %c0_6], %6 {strides = array<i32>} : memref<1x4x128xf32, #tpu.memory_space<vmem>>, vector<1x4x128xf32>,
    return
  }
  func.func @transform_0(%arg0: i32, %arg1: i32) -> (i32, i32) {
    %c0_i32 = arith.constant 0 : i32
    %c0_i32_0 = arith.constant 0 : i32
    %c0_i32_1 = arith.constant 0 : i32
    return %c0_i32, %c0_i32_0 : i32, i32
  }
  func.func @transform_1(%arg0: i32, %arg1: i32) -> (i32, i32, i32) {
    %c0_i32 = arith.constant 0 : i32
    %c0_i32_0 = arith.constant 0 : i32
    return %arg0, %c0_i32, %arg1 : i32, i32, i32
  }
  func.func @transform_2(%arg0: i32, %arg1: i32) -> (i32, i32, i32) {
    %c0_i32 = arith.constant 0 : i32
    %c0_i32_0 = arith.constant 0 : i32
    return %arg0, %c0_i32, %arg1 : i32, i32, i32
  }
}

module attributes {stable_mosaic.version = 11 : i64} {
  func.func @_linear_kernel(%arg0: i32, %arg1: memref<8x64xf32, #tpu.memory_space<vmem>>, %arg2: memref<64x32xf32, #tpu.memory_space<vmem>>, %arg3: memref<1x32xf32, #tpu.memory_space<vmem>>, %arg4: memref<8x32xf32, #tpu.memory_space<vmem>>) attributes {dimension_semantics = [#tpu.dimension_semantics<parallel>], iteration_bounds = array<i64: 2>, scalar_prefetch = 0 : i64, scratch_operands = 0 : i64, tpu.core_type = #tpu.core_type<tc>, window_params = [{transform_indices = @transform_0, window_bounds = array<i64: 8, 64>}, {pipeline_mode = #tpu.pipeline_mode<synchronous>, transform_indices = @transform_1, window_bounds = array<i64: 64, 32>}, {pipeline_mode = #tpu.pipeline_mode<synchronous>, transform_indices = @transform_2, window_bounds = array<i64: 1, 32>}, {transform_indices = @transform_3, window_bounds = array<i64: 8, 32>}]} {
    %c0 = arith.constant 0 : index
    %c0_0 = arith.constant 0 : index
    %0 = vector.load %arg1[%c0, %c0_0] : memref<8x64xf32, #tpu.memory_space<vmem>>, vector<8x64xf32>
    %c0_1 = arith.constant 0 : index
    %c0_2 = arith.constant 0 : index
    %1 = vector.load %arg2[%c0_1, %c0_2] : memref<64x32xf32, #tpu.memory_space<vmem>>, vector<64x32xf32>
    %cst = arith.constant dense<0.000000e+00> : vector<8x32xf32>
    %2 = tpu.matmul %0, %1, %cst {dimension_numbers = #tpu.dot_dimension_numbers<[1], [0], [0], [1], [0, 0, 1, 1], [], []>} : vector<8x64xf32>, vector<64x32xf32>, vector<8x32xf32> -> vector<8x32xf32>
    %c0_3 = arith.constant 0 : index
    %c0_4 = arith.constant 0 : index
    %3 = vector.load %arg3[%c0_3, %c0_4] : memref<1x32xf32, #tpu.memory_space<vmem>>, vector<1x32xf32>
    %4 = vector.broadcast %3 : vector<1x32xf32> to vector<8x32xf32>
    %5 = arith.addf %2, %4 : vector<8x32xf32>
    %c0_5 = arith.constant 0 : index
    %c0_6 = arith.constant 0 : index
    %6 = vector.load %arg4[%c0_5, %c0_6] : memref<8x32xf32, #tpu.memory_space<vmem>>, vector<8x32xf32>
    tpu.vector_store %arg4[%c0_5, %c0_6], %5 {strides = array<i32>} : memref<8x32xf32, #tpu.memory_space<vmem>>, vector<8x32xf32>,
    return
  }
  func.func @transform_0(%arg0: i32) -> (i32, i32) {
    %c0_i32 = arith.constant 0 : i32
    %c0_i32_0 = arith.constant 0 : i32
    return %arg0, %c0_i32 : i32, i32
  }
  func.func @transform_1(%arg0: i32) -> (i32, i32) {
    %c0_i32 = arith.constant 0 : i32
    %c0_i32_0 = arith.constant 0 : i32
    %c0_i32_1 = arith.constant 0 : i32
    return %c0_i32, %c0_i32_0 : i32, i32
  }
  func.func @transform_2(%arg0: i32) -> (i32, i32) {
    %c0_i32 = arith.constant 0 : i32
    %c0_i32_0 = arith.constant 0 : i32
    %c0_i32_1 = arith.constant 0 : i32
    return %c0_i32, %c0_i32_0 : i32, i32
  }
  func.func @transform_3(%arg0: i32) -> (i32, i32) {
    %c0_i32 = arith.constant 0 : i32
    %c0_i32_0 = arith.constant 0 : i32
    return %arg0, %c0_i32 : i32, i32
  }
}

module attributes {stable_mosaic.version = 11 : i64} {
  func.func @_graph_ffn_kernel(%arg0: i32, %arg1: memref<16x32xf32, #tpu.memory_space<vmem>>, %arg2: memref<16x32xf32, #tpu.memory_space<vmem>>, %arg3: memref<32x64xf32, #tpu.memory_space<vmem>>, %arg4: memref<1x64xf32, #tpu.memory_space<vmem>>, %arg5: memref<64x32xf32, #tpu.memory_space<vmem>>, %arg6: memref<1x32xf32, #tpu.memory_space<vmem>>, %arg7: memref<32x32xf32, #tpu.memory_space<vmem>>, %arg8: memref<1x32xf32, #tpu.memory_space<vmem>>, %arg9: memref<16x32xf32, #tpu.memory_space<vmem>>) attributes {dimension_semantics = [#tpu.dimension_semantics<parallel>], iteration_bounds = array<i64: 2>, scalar_prefetch = 0 : i64, scratch_operands = 0 : i64, tpu.core_type = #tpu.core_type<tc>, window_params = [{transform_indices = @transform_0, window_bounds = array<i64: 16, 32>}, {transform_indices = @transform_1, window_bounds = array<i64: 16, 32>}, {pipeline_mode = #tpu.pipeline_mode<synchronous>, transform_indices = @transform_2, window_bounds = array<i64: 32, 64>}, {pipeline_mode = #tpu.pipeline_mode<synchronous>, transform_indices = @transform_3, window_bounds = array<i64: 1, 64>}, {pipeline_mode = #tpu.pipeline_mode<synchronous>, transform_indices = @transform_4, window_bounds = array<i64: 64, 32>}, {pipeline_mode = #tpu.pipeline_mode<synchronous>, transform_indices = @transform_5, window_bounds = array<i64: 1, 32>}, {pipeline_mode = #tpu.pipeline_mode<synchronous>, transform_indices = @transform_6, window_bounds = array<i64: 32, 32>}, {pipeline_mode = #tpu.pipeline_mode<synchronous>, transform_indices = @transform_7, window_bounds = array<i64: 1, 32>}, {transform_indices = @transform_8, window_bounds = array<i64: 16, 32>}]} {
    %c0 = arith.constant 0 : index
    %c0_0 = arith.constant 0 : index
    %0 = vector.load %arg1[%c0, %c0_0] : memref<16x32xf32, #tpu.memory_space<vmem>>, vector<16x32xf32>
    %c0_1 = arith.constant 0 : index
    %c0_2 = arith.constant 0 : index
    %1 = vector.load %arg3[%c0_1, %c0_2] : memref<32x64xf32, #tpu.memory_space<vmem>>, vector<32x64xf32>
    %cst = arith.constant dense<0.000000e+00> : vector<16x64xf32>
    %2 = tpu.matmul %0, %1, %cst {dimension_numbers = #tpu.dot_dimension_numbers<[1], [0], [0], [1], [0, 0, 1, 1], [], []>} : vector<16x32xf32>, vector<32x64xf32>, vector<16x64xf32> -> vector<16x64xf32>
    %c0_3 = arith.constant 0 : index
    %c0_4 = arith.constant 0 : index
    %3 = vector.load %arg4[%c0_3, %c0_4] : memref<1x64xf32, #tpu.memory_space<vmem>>, vector<1x64xf32>
    %4 = vector.broadcast %3 : vector<1x64xf32> to vector<16x64xf32>
    %5 = arith.addf %2, %4 : vector<16x64xf32>
    %cst_5 = arith.constant 5.000000e-01 : f32
    %6 = vector.broadcast %cst_5 : f32 to vector<16x64xf32>
    %7 = arith.mulf %6, %5 : vector<16x64xf32>
    %cst_6 = arith.constant 4.471500e-02 : f32
    %8 = vector.broadcast %cst_6 : f32 to vector<16x64xf32>
    %9 = arith.mulf %8, %5 : vector<16x64xf32>
    %10 = arith.mulf %9, %5 : vector<16x64xf32>
    %11 = arith.mulf %10, %5 : vector<16x64xf32>
    %12 = arith.addf %5, %11 : vector<16x64xf32>
    %cst_7 = arith.constant 0.797884583 : f32
    %13 = vector.broadcast %cst_7 : f32 to vector<16x64xf32>
    %14 = arith.mulf %13, %12 : vector<16x64xf32>
    %15 = math.tanh %14 : vector<16x64xf32>
    %cst_8 = arith.constant 1.000000e+00 : f32
    %16 = vector.broadcast %cst_8 : f32 to vector<16x64xf32>
    %17 = arith.addf %16, %15 : vector<16x64xf32>
    %18 = arith.mulf %7, %17 : vector<16x64xf32>
    %c0_9 = arith.constant 0 : index
    %c0_10 = arith.constant 0 : index
    %19 = vector.load %arg5[%c0_9, %c0_10] : memref<64x32xf32, #tpu.memory_space<vmem>>, vector<64x32xf32>
    %cst_11 = arith.constant dense<0.000000e+00> : vector<16x32xf32>
    %20 = tpu.matmul %18, %19, %cst_11 {dimension_numbers = #tpu.dot_dimension_numbers<[1], [0], [0], [1], [0, 0, 1, 1], [], []>} : vector<16x64xf32>, vector<64x32xf32>, vector<16x32xf32> -> vector<16x32xf32>
    %c0_12 = arith.constant 0 : index
    %c0_13 = arith.constant 0 : index
    %21 = vector.load %arg6[%c0_12, %c0_13] : memref<1x32xf32, #tpu.memory_space<vmem>>, vector<1x32xf32>
    %22 = vector.broadcast %21 : vector<1x32xf32> to vector<16x32xf32>
    %23 = arith.addf %20, %22 : vector<16x32xf32>
    %c0_14 = arith.constant 0 : index
    %c0_15 = arith.constant 0 : index
    %24 = vector.load %arg7[%c0_14, %c0_15] : memref<32x32xf32, #tpu.memory_space<vmem>>, vector<32x32xf32>
    %cst_16 = arith.constant dense<0.000000e+00> : vector<16x32xf32>
    %25 = tpu.matmul %23, %24, %cst_16 {dimension_numbers = #tpu.dot_dimension_numbers<[1], [0], [0], [1], [0, 0, 1, 1], [], []>} : vector<16x32xf32>, vector<32x32xf32>, vector<16x32xf32> -> vector<16x32xf32>
    %c0_17 = arith.constant 0 : index
    %c0_18 = arith.constant 0 : index
    %26 = vector.load %arg8[%c0_17, %c0_18] : memref<1x32xf32, #tpu.memory_space<vmem>>, vector<1x32xf32>
    %27 = vector.broadcast %26 : vector<1x32xf32> to vector<16x32xf32>
    %28 = arith.addf %25, %27 : vector<16x32xf32>
    %29 = arith.negf %28 : vector<16x32xf32>
    %30 = math.exp %29 : vector<16x32xf32>
    %cst_19 = arith.constant 1.000000e+00 : f32
    %31 = vector.broadcast %cst_19 : f32 to vector<16x32xf32>
    %32 = arith.addf %31, %30 : vector<16x32xf32>
    %33 = arith.divf %31, %32 : vector<16x32xf32>
    %34 = arith.mulf %28, %33 : vector<16x32xf32>
    %35 = arith.mulf %23, %34 : vector<16x32xf32>
    %c0_20 = arith.constant 0 : index
    %c0_21 = arith.constant 0 : index
    %36 = vector.load %arg2[%c0_20, %c0_21] : memref<16x32xf32, #tpu.memory_space<vmem>>, vector<16x32xf32>
    %37 = arith.addf %35, %36 : vector<16x32xf32>
    %c0_22 = arith.constant 0 : index
    %c0_23 = arith.constant 0 : index
    %38 = vector.load %arg9[%c0_22, %c0_23] : memref<16x32xf32, #tpu.memory_space<vmem>>, vector<16x32xf32>
    tpu.vector_store %arg9[%c0_22, %c0_23], %37 {strides = array<i32>} : memref<16x32xf32, #tpu.memory_space<vmem>>, vector<16x32xf32>,
    return
  }
  func.func @transform_0(%arg0: i32) -> (i32, i32) {
    %c0_i32 = arith.constant 0 : i32
    %c0_i32_0 = arith.constant 0 : i32
    return %arg0, %c0_i32 : i32, i32
  }
  func.func @transform_1(%arg0: i32) -> (i32, i32) {
    %c0_i32 = arith.constant 0 : i32
    %c0_i32_0 = arith.constant 0 : i32
    return %arg0, %c0_i32 : i32, i32
  }
  func.func @transform_2(%arg0: i32) -> (i32, i32) {
    %c0_i32 = arith.constant 0 : i32
    %c0_i32_0 = arith.constant 0 : i32
    %c0_i32_1 = arith.constant 0 : i32
    return %c0_i32, %c0_i32_0 : i32, i32
  }
  func.func @transform_3(%arg0: i32) -> (i32, i32) {
    %c0_i32 = arith.constant 0 : i32
    %c0_i32_0 = arith.constant 0 : i32
    %c0_i32_1 = arith.constant 0 : i32
    return %c0_i32, %c0_i32_0 : i32, i32
  }
  func.func @transform_4(%arg0: i32) -> (i32, i32) {
    %c0_i32 = arith.constant 0 : i32
    %c0_i32_0 = arith.constant 0 : i32
    %c0_i32_1 = arith.constant 0 : i32
    return %c0_i32, %c0_i32_0 : i32, i32
  }
  func.func @transform_5(%arg0: i32) -> (i32, i32) {
    %c0_i32 = arith.constant 0 : i32
    %c0_i32_0 = arith.constant 0 : i32
    %c0_i32_1 = arith.constant 0 : i32
    return %c0_i32, %c0_i32_0 : i32, i32
  }
  func.func @transform_6(%arg0: i32) -> (i32, i32) {
    %c0_i32 = arith.constant 0 : i32
    %c0_i32_0 = arith.constant 0 : i32
    %c0_i32_1 = arith.constant 0 : i32
    return %c0_i32, %c0_i32_0 : i32, i32
  }
  func.func @transform_7(%arg0: i32) -> (i32, i32) {
    %c0_i32 = arith.constant 0 : i32
    %c0_i32_0 = arith.constant 0 : i32
    %c0_i32_1 = arith.constant 0 : i32
    return %c0_i32, %c0_i32_0 : i32, i32
  }
  func.func @transform_8(%arg0: i32) -> (i32, i32) {
    %c0_i32 = arith.constant 0 : i32
    %c0_i32_0 = arith.constant 0 : i32
    return %arg0, %c0_i32 : i32, i32
  }
}

module attributes {stable_mosaic.version = 11 : i64} {
  func.func @_temporal_kernel(%arg0: i32, %arg1: memref<1x2x32xf32, #tpu.memory_space<vmem>>, %arg2: memref<1x32xf32, #tpu.memory_space<vmem>>, %arg3: memref<1x32xf32, #tpu.memory_space<vmem>>, %arg4: memref<4x2xf32, #tpu.memory_space<vmem>>, %arg5: memref<4x1xf32, #tpu.memory_space<vmem>>, %arg6: memref<2x4xf32, #tpu.memory_space<vmem>>, %arg7: memref<2x1xf32, #tpu.memory_space<vmem>>, %arg8: memref<2x2xf32, #tpu.memory_space<vmem>>, %arg9: memref<2x1xf32, #tpu.memory_space<vmem>>, %arg10: memref<1x2x32xf32, #tpu.memory_space<vmem>>) attributes {dimension_semantics = [#tpu.dimension_semantics<parallel>], iteration_bounds = array<i64: 8>, scalar_prefetch = 0 : i64, scratch_operands = 0 : i64, tpu.core_type = #tpu.core_type<tc>, window_params = [{transform_indices = @transform_0, window_bounds = array<i64: 1, 2, 32>}, {pipeline_mode = #tpu.pipeline_mode<synchronous>, transform_indices = @transform_1, window_bounds = array<i64: 1, 32>}, {pipeline_mode = #tpu.pipeline_mode<synchronous>, transform_indices = @transform_2, window_bounds = array<i64: 1, 32>}, {pipeline_mode = #tpu.pipeline_mode<synchronous>, transform_indices = @transform_3, window_bounds = array<i64: 4, 2>}, {pipeline_mode = #tpu.pipeline_mode<synchronous>, transform_indices = @transform_4, window_bounds = array<i64: 4, 1>}, {pipeline_mode = #tpu.pipeline_mode<synchronous>, transform_indices = @transform_5, window_bounds = array<i64: 2, 4>}, {pipeline_mode = #tpu.pipeline_mode<synchronous>, transform_indices = @transform_6, window_bounds = array<i64: 2, 1>}, {pipeline_mode = #tpu.pipeline_mode<synchronous>, transform_indices = @transform_7, window_bounds = array<i64: 2, 2>}, {pipeline_mode = #tpu.pipeline_mode<synchronous>, transform_indices = @transform_8, window_bounds = array<i64: 2, 1>}, {transform_indices = @transform_9, window_bounds = array<i64: 1, 2, 32>}]} {
    %c0 = arith.constant 0 : index
    %c0_0 = arith.constant 0 : index
    %c0_1 = arith.constant 0 : index
    %0 = vector.load %arg1[%c0, %c0_0, %c0_1] : memref<1x2x32xf32, #tpu.memory_space<vmem>>, vector<1x2x32xf32>
    %1 = vector.shape_cast %0 : vector<1x2x32xf32> to vector<2x32xf32>
    %c0_2 = arith.constant 0 : index
    %c0_3 = arith.constant 0 : index
    %2 = vector.load %arg2[%c0_2, %c0_3] : memref<1x32xf32, #tpu.memory_space<vmem>>, vector<1x32xf32>
    %c0_4 = arith.constant 0 : index
    %c0_5 = arith.constant 0 : index
    %3 = vector.load %arg3[%c0_4, %c0_5] : memref<1x32xf32, #tpu.memory_space<vmem>>, vector<1x32xf32>
    %cst = arith.constant dense<0.000000e+00> : vector<2xf32>
    %4 = vector.multi_reduction <add>, %1, %cst [1] : vector<2x32xf32> to vector<2xf32>
    %5 = vector.shape_cast %4 : vector<2xf32> to vector<2x1xf32>
    %cst_6 = arith.constant 3.200000e+01 : f32
    %6 = vector.broadcast %cst_6 : f32 to vector<2x1xf32>
    %7 = arith.divf %5, %6 : vector<2x1xf32>
    %8 = vector.broadcast %7 : vector<2x1xf32> to vector<2x32xf32>
    %9 = arith.subf %1, %8 : vector<2x32xf32>
    %10 = arith.mulf %9, %9 : vector<2x32xf32>
    %cst_7 = arith.constant dense<0.000000e+00> : vector<2xf32>
    %11 = vector.multi_reduction <add>, %10, %cst_7 [1] : vector<2x32xf32> to vector<2xf32>
    %12 = vector.shape_cast %11 : vector<2xf32> to vector<2x1xf32>
    %cst_8 = arith.constant 3.200000e+01 : f32
    %13 = vector.broadcast %cst_8 : f32 to vector<2x1xf32>
    %14 = arith.divf %12, %13 : vector<2x1xf32>
    %cst_9 = arith.constant 9.99999974E-6 : f32
    %15 = vector.broadcast %cst_9 : f32 to vector<2x1xf32>
    %16 = arith.addf %14, %15 : vector<2x1xf32>
    %17 = math.rsqrt %16 : vector<2x1xf32>
    %18 = vector.broadcast %17 : vector<2x1xf32> to vector<2x32xf32>
    %19 = arith.mulf %9, %18 : vector<2x32xf32>
    %20 = vector.broadcast %2 : vector<1x32xf32> to vector<2x32xf32>
    %21 = arith.mulf %19, %20 : vector<2x32xf32>
    %22 = vector.broadcast %3 : vector<1x32xf32> to vector<2x32xf32>
    %23 = arith.addf %21, %22 : vector<2x32xf32>
    %c0_10 = arith.constant 0 : index
    %c0_11 = arith.constant 0 : index
    %24 = vector.load %arg4[%c0_10, %c0_11] : memref<4x2xf32, #tpu.memory_space<vmem>>, vector<4x2xf32>
    %cst_12 = arith.constant dense<0.000000e+00> : vector<4x32xf32>
    %25 = tpu.matmul %24, %23, %cst_12 {dimension_numbers = #tpu.dot_dimension_numbers<[1], [0], [0], [1], [0, 0, 1, 1], [], []>} : vector<4x2xf32>, vector<2x32xf32>, vector<4x32xf32> -> vector<4x32xf32>
    %c0_13 = arith.constant 0 : index
    %c0_14 = arith.constant 0 : index
    %26 = vector.load %arg5[%c0_13, %c0_14] : memref<4x1xf32, #tpu.memory_space<vmem>>, vector<4x1xf32>
    %27 = vector.broadcast %26 : vector<4x1xf32> to vector<4x32xf32>
    %28 = arith.addf %25, %27 : vector<4x32xf32>
    %cst_15 = arith.constant 5.000000e-01 : f32
    %29 = vector.broadcast %cst_15 : f32 to vector<4x32xf32>
    %30 = arith.mulf %29, %28 : vector<4x32xf32>
    %cst_16 = arith.constant 4.471500e-02 : f32
    %31 = vector.broadcast %cst_16 : f32 to vector<4x32xf32>
    %32 = arith.mulf %31, %28 : vector<4x32xf32>
    %33 = arith.mulf %32, %28 : vector<4x32xf32>
    %34 = arith.mulf %33, %28 : vector<4x32xf32>
    %35 = arith.addf %28, %34 : vector<4x32xf32>
    %cst_17 = arith.constant 0.797884583 : f32
    %36 = vector.broadcast %cst_17 : f32 to vector<4x32xf32>
    %37 = arith.mulf %36, %35 : vector<4x32xf32>
    %38 = math.tanh %37 : vector<4x32xf32>
    %cst_18 = arith.constant 1.000000e+00 : f32
    %39 = vector.broadcast %cst_18 : f32 to vector<4x32xf32>
    %40 = arith.addf %39, %38 : vector<4x32xf32>
    %41 = arith.mulf %30, %40 : vector<4x32xf32>
    %c0_19 = arith.constant 0 : index
    %c0_20 = arith.constant 0 : index
    %42 = vector.load %arg6[%c0_19, %c0_20] : memref<2x4xf32, #tpu.memory_space<vmem>>, vector<2x4xf32>
    %cst_21 = arith.constant dense<0.000000e+00> : vector<2x32xf32>
    %43 = tpu.matmul %42, %41, %cst_21 {dimension_numbers = #tpu.dot_dimension_numbers<[1], [0], [0], [1], [0, 0, 1, 1], [], []>} : vector<2x4xf32>, vector<4x32xf32>, vector<2x32xf32> -> vector<2x32xf32>
    %c0_22 = arith.constant 0 : index
    %c0_23 = arith.constant 0 : index
    %44 = vector.load %arg7[%c0_22, %c0_23] : memref<2x1xf32, #tpu.memory_space<vmem>>, vector<2x1xf32>
    %45 = vector.broadcast %44 : vector<2x1xf32> to vector<2x32xf32>
    %46 = arith.addf %43, %45 : vector<2x32xf32>
    %c0_24 = arith.constant 0 : index
    %c0_25 = arith.constant 0 : index
    %47 = vector.load %arg8[%c0_24, %c0_25] : memref<2x2xf32, #tpu.memory_space<vmem>>, vector<2x2xf32>
    %cst_26 = arith.constant dense<0.000000e+00> : vector<2x32xf32>
    %48 = tpu.matmul %47, %46, %cst_26 {dimension_numbers = #tpu.dot_dimension_numbers<[1], [0], [0], [1], [0, 0, 1, 1], [], []>} : vector<2x2xf32>, vector<2x32xf32>, vector<2x32xf32> -> vector<2x32xf32>
    %c0_27 = arith.constant 0 : index
    %c0_28 = arith.constant 0 : index
    %49 = vector.load %arg9[%c0_27, %c0_28] : memref<2x1xf32, #tpu.memory_space<vmem>>, vector<2x1xf32>
    %50 = vector.broadcast %49 : vector<2x1xf32> to vector<2x32xf32>
    %51 = arith.addf %48, %50 : vector<2x32xf32>
    %52 = arith.negf %51 : vector<2x32xf32>
    %53 = math.exp %52 : vector<2x32xf32>
    %cst_29 = arith.constant 1.000000e+00 : f32
    %54 = vector.broadcast %cst_29 : f32 to vector<2x32xf32>
    %55 = arith.addf %54, %53 : vector<2x32xf32>
    %56 = arith.divf %54, %55 : vector<2x32xf32>
    %57 = arith.mulf %51, %56 : vector<2x32xf32>
    %58 = arith.mulf %46, %57 : vector<2x32xf32>
    %59 = arith.addf %58, %1 : vector<2x32xf32>
    %c0_30 = arith.constant 0 : index
    %c0_31 = arith.constant 0 : index
    %c0_32 = arith.constant 0 : index
    %60 = vector.load %arg10[%c0_30, %c0_31, %c0_32] : memref<1x2x32xf32, #tpu.memory_space<vmem>>, vector<1x2x32xf32>
    %61 = vector.shape_cast %60 : vector<1x2x32xf32> to vector<2x32xf32>
    %62 = vector.shape_cast %59 : vector<2x32xf32> to vector<1x2x32xf32>
    tpu.vector_store %arg10[%c0_30, %c0_31, %c0_32], %62 {strides = array<i32>} : memref<1x2x32xf32, #tpu.memory_space<vmem>>, vector<1x2x32xf32>,
    return
  }
  func.func @transform_0(%arg0: i32) -> (i32, i32, i32) {
    %c0_i32 = arith.constant 0 : i32
    %c0_i32_0 = arith.constant 0 : i32
    %c0_i32_1 = arith.constant 0 : i32
    return %arg0, %c0_i32, %c0_i32_0 : i32, i32, i32
  }
  func.func @transform_1(%arg0: i32) -> (i32, i32) {
    %c0_i32 = arith.constant 0 : i32
    %c0_i32_0 = arith.constant 0 : i32
    %c0_i32_1 = arith.constant 0 : i32
    return %c0_i32, %c0_i32_0 : i32, i32
  }
  func.func @transform_2(%arg0: i32) -> (i32, i32) {
    %c0_i32 = arith.constant 0 : i32
    %c0_i32_0 = arith.constant 0 : i32
    %c0_i32_1 = arith.constant 0 : i32
    return %c0_i32, %c0_i32_0 : i32, i32
  }
  func.func @transform_3(%arg0: i32) -> (i32, i32) {
    %c0_i32 = arith.constant 0 : i32
    %c0_i32_0 = arith.constant 0 : i32
    %c0_i32_1 = arith.constant 0 : i32
    return %c0_i32, %c0_i32_0 : i32, i32
  }
  func.func @transform_4(%arg0: i32) -> (i32, i32) {
    %c0_i32 = arith.constant 0 : i32
    %c0_i32_0 = arith.constant 0 : i32
    %c0_i32_1 = arith.constant 0 : i32
    return %c0_i32, %c0_i32_0 : i32, i32
  }
  func.func @transform_5(%arg0: i32) -> (i32, i32) {
    %c0_i32 = arith.constant 0 : i32
    %c0_i32_0 = arith.constant 0 : i32
    %c0_i32_1 = arith.constant 0 : i32
    return %c0_i32, %c0_i32_0 : i32, i32
  }
  func.func @transform_6(%arg0: i32) -> (i32, i32) {
    %c0_i32 = arith.constant 0 : i32
    %c0_i32_0 = arith.constant 0 : i32
    %c0_i32_1 = arith.constant 0 : i32
    return %c0_i32, %c0_i32_0 : i32, i32
  }
  func.func @transform_7(%arg0: i32) -> (i32, i32) {
    %c0_i32 = arith.constant 0 : i32
    %c0_i32_0 = arith.constant 0 : i32
    %c0_i32_1 = arith.constant 0 : i32
    return %c0_i32, %c0_i32_0 : i32, i32
  }
  func.func @transform_8(%arg0: i32) -> (i32, i32) {
    %c0_i32 = arith.constant 0 : i32
    %c0_i32_0 = arith.constant 0 : i32
    %c0_i32_1 = arith.constant 0 : i32
    return %c0_i32, %c0_i32_0 : i32, i32
  }
  func.func @transform_9(%arg0: i32) -> (i32, i32, i32) {
    %c0_i32 = arith.constant 0 : i32
    %c0_i32_0 = arith.constant 0 : i32
    %c0_i32_1 = arith.constant 0 : i32
    return %arg0, %c0_i32, %c0_i32_0 : i32, i32, i32
  }
}

module attributes {stable_mosaic.version = 11 : i64} {
  func.func @_dim_mixer_kernel(%arg0: i32, %arg1: memref<8x32xf32, #tpu.memory_space<vmem>>, %arg2: memref<1x32xf32, #tpu.memory_space<vmem>>, %arg3: memref<1x32xf32, #tpu.memory_space<vmem>>, %arg4: memref<32x64xf32, #tpu.memory_space<vmem>>, %arg5: memref<1x64xf32, #tpu.memory_space<vmem>>, %arg6: memref<64x32xf32, #tpu.memory_space<vmem>>, %arg7: memref<1x32xf32, #tpu.memory_space<vmem>>, %arg8: memref<32x32xf32, #tpu.memory_space<vmem>>, %arg9: memref<1x32xf32, #tpu.memory_space<vmem>>, %arg10: memref<1x32xf32, #tpu.memory_space<vmem>>, %arg11: memref<1x32xf32, #tpu.memory_space<vmem>>, %arg12: memref<8x32xf32, #tpu.memory_space<vmem>>, %arg13: memref<8x32xf32, #tpu.memory_space<vmem>>) attributes {dimension_semantics = [#tpu.dimension_semantics<parallel>], iteration_bounds = array<i64: 2>, scalar_prefetch = 0 : i64, scratch_operands = 0 : i64, tpu.core_type = #tpu.core_type<tc>, window_params = [{transform_indices = @transform_0, window_bounds = array<i64: 8, 32>}, {pipeline_mode = #tpu.pipeline_mode<synchronous>, transform_indices = @transform_1, window_bounds = array<i64: 1, 32>}, {pipeline_mode = #tpu.pipeline_mode<synchronous>, transform_indices = @transform_2, window_bounds = array<i64: 1, 32>}, {pipeline_mode = #tpu.pipeline_mode<synchronous>, transform_indices = @transform_3, window_bounds = array<i64: 32, 64>}, {pipeline_mode = #tpu.pipeline_mode<synchronous>, transform_indices = @transform_4, window_bounds = array<i64: 1, 64>}, {pipeline_mode = #tpu.pipeline_mode<synchronous>, transform_indices = @transform_5, window_bounds = array<i64: 64, 32>}, {pipeline_mode = #tpu.pipeline_mode<synchronous>, transform_indices = @transform_6, window_bounds = array<i64: 1, 32>}, {pipeline_mode = #tpu.pipeline_mode<synchronous>, transform_indices = @transform_7, window_bounds = array<i64: 32, 32>}, {pipeline_mode = #tpu.pipeline_mode<synchronous>, transform_indices = @transform_8, window_bounds = array<i64: 1, 32>}, {pipeline_mode = #tpu.pipeline_mode<synchronous>, transform_indices = @transform_9, window_bounds = array<i64: 1, 32>}, {pipeline_mode = #tpu.pipeline_mode<synchronous>, transform_indices = @transform_10, window_bounds = array<i64: 1, 32>}, {transform_indices = @transform_11, window_bounds = array<i64: 8, 32>}, {transform_indices = @transform_12, window_bounds = array<i64: 8, 32>}]} {
    %c0 = arith.constant 0 : index
    %c0_0 = arith.constant 0 : index
    %0 = vector.load %arg1[%c0, %c0_0] : memref<8x32xf32, #tpu.memory_space<vmem>>, vector<8x32xf32>
    %c0_1 = arith.constant 0 : index
    %c0_2 = arith.constant 0 : index
    %1 = vector.load %arg2[%c0_1, %c0_2] : memref<1x32xf32, #tpu.memory_space<vmem>>, vector<1x32xf32>
    %c0_3 = arith.constant 0 : index
    %c0_4 = arith.constant 0 : index
    %2 = vector.load %arg3[%c0_3, %c0_4] : memref<1x32xf32, #tpu.memory_space<vmem>>, vector<1x32xf32>
    %cst = arith.constant dense<0.000000e+00> : vector<8xf32>
    %3 = vector.multi_reduction <add>, %0, %cst [1] : vector<8x32xf32> to vector<8xf32>
    %4 = vector.shape_cast %3 : vector<8xf32> to vector<8x1xf32>
    %cst_5 = arith.constant 3.200000e+01 : f32
    %5 = vector.broadcast %cst_5 : f32 to vector<8x1xf32>
    %6 = arith.divf %4, %5 : vector<8x1xf32>
    %7 = vector.broadcast %6 : vector<8x1xf32> to vector<8x32xf32>
    %8 = arith.subf %0, %7 : vector<8x32xf32>
    %9 = arith.mulf %8, %8 : vector<8x32xf32>
    %cst_6 = arith.constant dense<0.000000e+00> : vector<8xf32>
    %10 = vector.multi_reduction <add>, %9, %cst_6 [1] : vector<8x32xf32> to vector<8xf32>
    %11 = vector.shape_cast %10 : vector<8xf32> to vector<8x1xf32>
    %cst_7 = arith.constant 3.200000e+01 : f32
    %12 = vector.broadcast %cst_7 : f32 to vector<8x1xf32>
    %13 = arith.divf %11, %12 : vector<8x1xf32>
    %cst_8 = arith.constant 9.99999974E-6 : f32
    %14 = vector.broadcast %cst_8 : f32 to vector<8x1xf32>
    %15 = arith.addf %13, %14 : vector<8x1xf32>
    %16 = math.rsqrt %15 : vector<8x1xf32>
    %17 = vector.broadcast %16 : vector<8x1xf32> to vector<8x32xf32>
    %18 = arith.mulf %8, %17 : vector<8x32xf32>
    %19 = vector.broadcast %1 : vector<1x32xf32> to vector<8x32xf32>
    %20 = arith.mulf %18, %19 : vector<8x32xf32>
    %21 = vector.broadcast %2 : vector<1x32xf32> to vector<8x32xf32>
    %22 = arith.addf %20, %21 : vector<8x32xf32>
    %c0_9 = arith.constant 0 : index
    %c0_10 = arith.constant 0 : index
    %23 = vector.load %arg4[%c0_9, %c0_10] : memref<32x64xf32, #tpu.memory_space<vmem>>, vector<32x64xf32>
    %cst_11 = arith.constant dense<0.000000e+00> : vector<8x64xf32>
    %24 = tpu.matmul %22, %23, %cst_11 {dimension_numbers = #tpu.dot_dimension_numbers<[1], [0], [0], [1], [0, 0, 1, 1], [], []>} : vector<8x32xf32>, vector<32x64xf32>, vector<8x64xf32> -> vector<8x64xf32>
    %c0_12 = arith.constant 0 : index
    %c0_13 = arith.constant 0 : index
    %25 = vector.load %arg5[%c0_12, %c0_13] : memref<1x64xf32, #tpu.memory_space<vmem>>, vector<1x64xf32>
    %26 = vector.broadcast %25 : vector<1x64xf32> to vector<8x64xf32>
    %27 = arith.addf %24, %26 : vector<8x64xf32>
    %cst_14 = arith.constant 5.000000e-01 : f32
    %28 = vector.broadcast %cst_14 : f32 to vector<8x64xf32>
    %29 = arith.mulf %28, %27 : vector<8x64xf32>
    %cst_15 = arith.constant 4.471500e-02 : f32
    %30 = vector.broadcast %cst_15 : f32 to vector<8x64xf32>
    %31 = arith.mulf %30, %27 : vector<8x64xf32>
    %32 = arith.mulf %31, %27 : vector<8x64xf32>
    %33 = arith.mulf %32, %27 : vector<8x64xf32>
    %34 = arith.addf %27, %33 : vector<8x64xf32>
    %cst_16 = arith.constant 0.797884583 : f32
    %35 = vector.broadcast %cst_16 : f32 to vector<8x64xf32>
    %36 = arith.mulf %35, %34 : vector<8x64xf32>
    %37 = math.tanh %36 : vector<8x64xf32>
    %cst_17 = arith.constant 1.000000e+00 : f32
    %38 = vector.broadcast %cst_17 : f32 to vector<8x64xf32>
    %39 = arith.addf %38, %37 : vector<8x64xf32>
    %40 = arith.mulf %29, %39 : vector<8x64xf32>
    %c0_18 = arith.constant 0 : index
    %c0_19 = arith.constant 0 : index
    %41 = vector.load %arg6[%c0_18, %c0_19] : memref<64x32xf32, #tpu.memory_space<vmem>>, vector<64x32xf32>
    %cst_20 = arith.constant dense<0.000000e+00> : vector<8x32xf32>
    %42 = tpu.matmul %40, %41, %cst_20 {dimension_numbers = #tpu.dot_dimension_numbers<[1], [0], [0], [1], [0, 0, 1, 1], [], []>} : vector<8x64xf32>, vector<64x32xf32>, vector<8x32xf32> -> vector<8x32xf32>
    %c0_21 = arith.constant 0 : index
    %c0_22 = arith.constant 0 : index
    %43 = vector.load %arg7[%c0_21, %c0_22] : memref<1x32xf32, #tpu.memory_space<vmem>>, vector<1x32xf32>
    %44 = vector.broadcast %43 : vector<1x32xf32> to vector<8x32xf32>
    %45 = arith.addf %42, %44 : vector<8x32xf32>
    %c0_23 = arith.constant 0 : index
    %c0_24 = arith.constant 0 : index
    %46 = vector.load %arg8[%c0_23, %c0_24] : memref<32x32xf32, #tpu.memory_space<vmem>>, vector<32x32xf32>
    %cst_25 = arith.constant dense<0.000000e+00> : vector<8x32xf32>
    %47 = tpu.matmul %45, %46, %cst_25 {dimension_numbers = #tpu.dot_dimension_numbers<[1], [0], [0], [1], [0, 0, 1, 1], [], []>} : vector<8x32xf32>, vector<32x32xf32>, vector<8x32xf32> -> vector<8x32xf32>
    %c0_26 = arith.constant 0 : index
    %c0_27 = arith.constant 0 : index
    %48 = vector.load %arg9[%c0_26, %c0_27] : memref<1x32xf32, #tpu.memory_space<vmem>>, vector<1x32xf32>
    %49 = vector.broadcast %48 : vector<1x32xf32> to vector<8x32xf32>
    %50 = arith.addf %47, %49 : vector<8x32xf32>
    %51 = arith.negf %50 : vector<8x32xf32>
    %52 = math.exp %51 : vector<8x32xf32>
    %cst_28 = arith.constant 1.000000e+00 : f32
    %53 = vector.broadcast %cst_28 : f32 to vector<8x32xf32>
    %54 = arith.addf %53, %52 : vector<8x32xf32>
    %55 = arith.divf %53, %54 : vector<8x32xf32>
    %56 = arith.mulf %50, %55 : vector<8x32xf32>
    %57 = arith.mulf %45, %56 : vector<8x32xf32>
    %58 = arith.addf %57, %0 : vector<8x32xf32>
    %c0_29 = arith.constant 0 : index
    %c0_30 = arith.constant 0 : index
    %59 = vector.load %arg12[%c0_29, %c0_30] : memref<8x32xf32, #tpu.memory_space<vmem>>, vector<8x32xf32>
    tpu.vector_store %arg12[%c0_29, %c0_30], %58 {strides = array<i32>} : memref<8x32xf32, #tpu.memory_space<vmem>>, vector<8x32xf32>,
    %c0_31 = arith.constant 0 : index
    %c0_32 = arith.constant 0 : index
    %60 = vector.load %arg10[%c0_31, %c0_32] : memref<1x32xf32, #tpu.memory_space<vmem>>, vector<1x32xf32>
    %c0_33 = arith.constant 0 : index
    %c0_34 = arith.constant 0 : index
    %61 = vector.load %arg11[%c0_33, %c0_34] : memref<1x32xf32, #tpu.memory_space<vmem>>, vector<1x32xf32>
    %cst_35 = arith.constant dense<0.000000e+00> : vector<8xf32>
    %62 = vector.multi_reduction <add>, %58, %cst_35 [1] : vector<8x32xf32> to vector<8xf32>
    %63 = vector.shape_cast %62 : vector<8xf32> to vector<8x1xf32>
    %cst_36 = arith.constant 3.200000e+01 : f32
    %64 = vector.broadcast %cst_36 : f32 to vector<8x1xf32>
    %65 = arith.divf %63, %64 : vector<8x1xf32>
    %66 = vector.broadcast %65 : vector<8x1xf32> to vector<8x32xf32>
    %67 = arith.subf %58, %66 : vector<8x32xf32>
    %68 = arith.mulf %67, %67 : vector<8x32xf32>
    %cst_37 = arith.constant dense<0.000000e+00> : vector<8xf32>
    %69 = vector.multi_reduction <add>, %68, %cst_37 [1] : vector<8x32xf32> to vector<8xf32>
    %70 = vector.shape_cast %69 : vector<8xf32> to vector<8x1xf32>
    %cst_38 = arith.constant 3.200000e+01 : f32
    %71 = vector.broadcast %cst_38 : f32 to vector<8x1xf32>
    %72 = arith.divf %70, %71 : vector<8x1xf32>
    %cst_39 = arith.constant 9.99999974E-6 : f32
    %73 = vector.broadcast %cst_39 : f32 to vector<8x1xf32>
    %74 = arith.addf %72, %73 : vector<8x1xf32>
    %75 = math.rsqrt %74 : vector<8x1xf32>
    %76 = vector.broadcast %75 : vector<8x1xf32> to vector<8x32xf32>
    %77 = arith.mulf %67, %76 : vector<8x32xf32>
    %78 = vector.broadcast %60 : vector<1x32xf32> to vector<8x32xf32>
    %79 = arith.mulf %77, %78 : vector<8x32xf32>
    %80 = vector.broadcast %61 : vector<1x32xf32> to vector<8x32xf32>
    %81 = arith.addf %79, %80 : vector<8x32xf32>
    %c0_40 = arith.constant 0 : index
    %c0_41 = arith.constant 0 : index
    %82 = vector.load %arg13[%c0_40, %c0_41] : memref<8x32xf32, #tpu.memory_space<vmem>>, vector<8x32xf32>
    tpu.vector_store %arg13[%c0_40, %c0_41], %81 {strides = array<i32>} : memref<8x32xf32, #tpu.memory_space<vmem>>, vector<8x32xf32>,
    return
  }
  func.func @transform_0(%arg0: i32) -> (i32, i32) {
    %c0_i32 = arith.constant 0 : i32
    %c0_i32_0 = arith.constant 0 : i32
    return %arg0, %c0_i32 : i32, i32
  }
  func.func @transform_1(%arg0: i32) -> (i32, i32) {
    %c0_i32 = arith.constant 0 : i32
    %c0_i32_0 = arith.constant 0 : i32
    %c0_i32_1 = arith.constant 0 : i32
    return %c0_i32, %c0_i32_0 : i32, i32
  }
  func.func @transform_2(%arg0: i32) -> (i32, i32) {
    %c0_i32 = arith.constant 0 : i32
    %c0_i32_0 = arith.constant 0 : i32
    %c0_i32_1 = arith.constant 0 : i32
    return %c0_i32, %c0_i32_0 : i32, i32
  }
  func.func @transform_3(%arg0: i32) -> (i32, i32) {
    %c0_i32 = arith.constant 0 : i32
    %c0_i32_0 = arith.constant 0 : i32
    %c0_i32_1 = arith.constant 0 : i32
    return %c0_i32, %c0_i32_0 : i32, i32
  }
  func.func @transform_4(%arg0: i32) -> (i32, i32) {
    %c0_i32 = arith.constant 0 : i32
    %c0_i32_0 = arith.constant 0 : i32
    %c0_i32_1 = arith.constant 0 : i32
    return %c0_i32, %c0_i32_0 : i32, i32
  }
  func.func @transform_5(%arg0: i32) -> (i32, i32) {
    %c0_i32 = arith.constant 0 : i32
    %c0_i32_0 = arith.constant 0 : i32
    %c0_i32_1 = arith.constant 0 : i32
    return %c0_i32, %c0_i32_0 : i32, i32
  }
  func.func @transform_6(%arg0: i32) -> (i32, i32) {
    %c0_i32 = arith.constant 0 : i32
    %c0_i32_0 = arith.constant 0 : i32
    %c0_i32_1 = arith.constant 0 : i32
    return %c0_i32, %c0_i32_0 : i32, i32
  }
  func.func @transform_7(%arg0: i32) -> (i32, i32) {
    %c0_i32 = arith.constant 0 : i32
    %c0_i32_0 = arith.constant 0 : i32
    %c0_i32_1 = arith.constant 0 : i32
    return %c0_i32, %c0_i32_0 : i32, i32
  }
  func.func @transform_8(%arg0: i32) -> (i32, i32) {
    %c0_i32 = arith.constant 0 : i32
    %c0_i32_0 = arith.constant 0 : i32
    %c0_i32_1 = arith.constant 0 : i32
    return %c0_i32, %c0_i32_0 : i32, i32
  }
  func.func @transform_9(%arg0: i32) -> (i32, i32) {
    %c0_i32 = arith.constant 0 : i32
    %c0_i32_0 = arith.constant 0 : i32
    %c0_i32_1 = arith.constant 0 : i32
    return %c0_i32, %c0_i32_0 : i32, i32
  }
  func.func @transform_10(%arg0: i32) -> (i32, i32) {
    %c0_i32 = arith.constant 0 : i32
    %c0_i32_0 = arith.constant 0 : i32
    %c0_i32_1 = arith.constant 0 : i32
    return %c0_i32, %c0_i32_0 : i32, i32
  }
  func.func @transform_11(%arg0: i32) -> (i32, i32) {
    %c0_i32 = arith.constant 0 : i32
    %c0_i32_0 = arith.constant 0 : i32
    return %arg0, %c0_i32 : i32, i32
  }
  func.func @transform_12(%arg0: i32) -> (i32, i32) {
    %c0_i32 = arith.constant 0 : i32
    %c0_i32_0 = arith.constant 0 : i32
    return %arg0, %c0_i32 : i32, i32
  }
}

module attributes {stable_mosaic.version = 11 : i64} {
  func.func @_graphmix_kernel(%arg0: i32, %arg1: i32, %arg2: memref<4x4xf32, #tpu.memory_space<vmem>>, %arg3: memref<1x4x64xf32, #tpu.memory_space<vmem>>, %arg4: memref<1x4x64xf32, #tpu.memory_space<vmem>>) attributes {dimension_semantics = [#tpu.dimension_semantics<parallel>, #tpu.dimension_semantics<parallel>], iteration_bounds = array<i64: 2, 1>, scalar_prefetch = 0 : i64, scratch_operands = 0 : i64, tpu.core_type = #tpu.core_type<tc>, window_params = [{pipeline_mode = #tpu.pipeline_mode<synchronous>, transform_indices = @transform_0, window_bounds = array<i64: 4, 4>}, {transform_indices = @transform_1, window_bounds = array<i64: 1, 4, 64>}, {transform_indices = @transform_2, window_bounds = array<i64: 1, 4, 64>}]} {
    %c0 = arith.constant 0 : index
    %c0_0 = arith.constant 0 : index
    %0 = vector.load %arg2[%c0, %c0_0] : memref<4x4xf32, #tpu.memory_space<vmem>>, vector<4x4xf32>
    %c0_1 = arith.constant 0 : index
    %c0_2 = arith.constant 0 : index
    %c0_3 = arith.constant 0 : index
    %1 = vector.load %arg3[%c0_1, %c0_2, %c0_3] : memref<1x4x64xf32, #tpu.memory_space<vmem>>, vector<1x4x64xf32>
    %2 = vector.shape_cast %1 : vector<1x4x64xf32> to vector<4x64xf32>
    %cst = arith.constant dense<0.000000e+00> : vector<4x64xf32>
    %3 = tpu.matmul %0, %2, %cst {dimension_numbers = #tpu.dot_dimension_numbers<[1], [0], [0], [1], [0, 0, 1, 1], [], []>} : vector<4x4xf32>, vector<4x64xf32>, vector<4x64xf32> -> vector<4x64xf32>
    %c0_4 = arith.constant 0 : index
    %c0_5 = arith.constant 0 : index
    %c0_6 = arith.constant 0 : index
    %4 = vector.load %arg4[%c0_4, %c0_5, %c0_6] : memref<1x4x64xf32, #tpu.memory_space<vmem>>, vector<1x4x64xf32>
    %5 = vector.shape_cast %4 : vector<1x4x64xf32> to vector<4x64xf32>
    %6 = vector.shape_cast %3 : vector<4x64xf32> to vector<1x4x64xf32>
    tpu.vector_store %arg4[%c0_4, %c0_5, %c0_6], %6 {strides = array<i32>} : memref<1x4x64xf32, #tpu.memory_space<vmem>>, vector<1x4x64xf32>,
    return
  }
  func.func @transform_0(%arg0: i32, %arg1: i32) -> (i32, i32) {
    %c0_i32 = arith.constant 0 : i32
    %c0_i32_0 = arith.constant 0 : i32
    %c0_i32_1 = arith.constant 0 : i32
    return %c0_i32, %c0_i32_0 : i32, i32
  }
  func.func @transform_1(%arg0: i32, %arg1: i32) -> (i32, i32, i32) {
    %c0_i32 = arith.constant 0 : i32
    %c0_i32_0 = arith.constant 0 : i32
    return %arg0, %c0_i32, %arg1 : i32, i32, i32
  }
  func.func @transform_2(%arg0: i32, %arg1: i32) -> (i32, i32, i32) {
    %c0_i32 = arith.constant 0 : i32
    %c0_i32_0 = arith.constant 0 : i32
    return %arg0, %c0_i32, %arg1 : i32, i32, i32
  }
}

module attributes {stable_mosaic.version = 11 : i64} {
  func.func @_graph_ffn_kernel(%arg0: i32, %arg1: memref<8x32xf32, #tpu.memory_space<vmem>>, %arg2: memref<8x32xf32, #tpu.memory_space<vmem>>, %arg3: memref<32x64xf32, #tpu.memory_space<vmem>>, %arg4: memref<1x64xf32, #tpu.memory_space<vmem>>, %arg5: memref<64x32xf32, #tpu.memory_space<vmem>>, %arg6: memref<1x32xf32, #tpu.memory_space<vmem>>, %arg7: memref<32x32xf32, #tpu.memory_space<vmem>>, %arg8: memref<1x32xf32, #tpu.memory_space<vmem>>, %arg9: memref<8x32xf32, #tpu.memory_space<vmem>>) attributes {dimension_semantics = [#tpu.dimension_semantics<parallel>], iteration_bounds = array<i64: 2>, scalar_prefetch = 0 : i64, scratch_operands = 0 : i64, tpu.core_type = #tpu.core_type<tc>, window_params = [{transform_indices = @transform_0, window_bounds = array<i64: 8, 32>}, {transform_indices = @transform_1, window_bounds = array<i64: 8, 32>}, {pipeline_mode = #tpu.pipeline_mode<synchronous>, transform_indices = @transform_2, window_bounds = array<i64: 32, 64>}, {pipeline_mode = #tpu.pipeline_mode<synchronous>, transform_indices = @transform_3, window_bounds = array<i64: 1, 64>}, {pipeline_mode = #tpu.pipeline_mode<synchronous>, transform_indices = @transform_4, window_bounds = array<i64: 64, 32>}, {pipeline_mode = #tpu.pipeline_mode<synchronous>, transform_indices = @transform_5, window_bounds = array<i64: 1, 32>}, {pipeline_mode = #tpu.pipeline_mode<synchronous>, transform_indices = @transform_6, window_bounds = array<i64: 32, 32>}, {pipeline_mode = #tpu.pipeline_mode<synchronous>, transform_indices = @transform_7, window_bounds = array<i64: 1, 32>}, {transform_indices = @transform_8, window_bounds = array<i64: 8, 32>}]} {
    %c0 = arith.constant 0 : index
    %c0_0 = arith.constant 0 : index
    %0 = vector.load %arg1[%c0, %c0_0] : memref<8x32xf32, #tpu.memory_space<vmem>>, vector<8x32xf32>
    %c0_1 = arith.constant 0 : index
    %c0_2 = arith.constant 0 : index
    %1 = vector.load %arg3[%c0_1, %c0_2] : memref<32x64xf32, #tpu.memory_space<vmem>>, vector<32x64xf32>
    %cst = arith.constant dense<0.000000e+00> : vector<8x64xf32>
    %2 = tpu.matmul %0, %1, %cst {dimension_numbers = #tpu.dot_dimension_numbers<[1], [0], [0], [1], [0, 0, 1, 1], [], []>} : vector<8x32xf32>, vector<32x64xf32>, vector<8x64xf32> -> vector<8x64xf32>
    %c0_3 = arith.constant 0 : index
    %c0_4 = arith.constant 0 : index
    %3 = vector.load %arg4[%c0_3, %c0_4] : memref<1x64xf32, #tpu.memory_space<vmem>>, vector<1x64xf32>
    %4 = vector.broadcast %3 : vector<1x64xf32> to vector<8x64xf32>
    %5 = arith.addf %2, %4 : vector<8x64xf32>
    %cst_5 = arith.constant 5.000000e-01 : f32
    %6 = vector.broadcast %cst_5 : f32 to vector<8x64xf32>
    %7 = arith.mulf %6, %5 : vector<8x64xf32>
    %cst_6 = arith.constant 4.471500e-02 : f32
    %8 = vector.broadcast %cst_6 : f32 to vector<8x64xf32>
    %9 = arith.mulf %8, %5 : vector<8x64xf32>
    %10 = arith.mulf %9, %5 : vector<8x64xf32>
    %11 = arith.mulf %10, %5 : vector<8x64xf32>
    %12 = arith.addf %5, %11 : vector<8x64xf32>
    %cst_7 = arith.constant 0.797884583 : f32
    %13 = vector.broadcast %cst_7 : f32 to vector<8x64xf32>
    %14 = arith.mulf %13, %12 : vector<8x64xf32>
    %15 = math.tanh %14 : vector<8x64xf32>
    %cst_8 = arith.constant 1.000000e+00 : f32
    %16 = vector.broadcast %cst_8 : f32 to vector<8x64xf32>
    %17 = arith.addf %16, %15 : vector<8x64xf32>
    %18 = arith.mulf %7, %17 : vector<8x64xf32>
    %c0_9 = arith.constant 0 : index
    %c0_10 = arith.constant 0 : index
    %19 = vector.load %arg5[%c0_9, %c0_10] : memref<64x32xf32, #tpu.memory_space<vmem>>, vector<64x32xf32>
    %cst_11 = arith.constant dense<0.000000e+00> : vector<8x32xf32>
    %20 = tpu.matmul %18, %19, %cst_11 {dimension_numbers = #tpu.dot_dimension_numbers<[1], [0], [0], [1], [0, 0, 1, 1], [], []>} : vector<8x64xf32>, vector<64x32xf32>, vector<8x32xf32> -> vector<8x32xf32>
    %c0_12 = arith.constant 0 : index
    %c0_13 = arith.constant 0 : index
    %21 = vector.load %arg6[%c0_12, %c0_13] : memref<1x32xf32, #tpu.memory_space<vmem>>, vector<1x32xf32>
    %22 = vector.broadcast %21 : vector<1x32xf32> to vector<8x32xf32>
    %23 = arith.addf %20, %22 : vector<8x32xf32>
    %c0_14 = arith.constant 0 : index
    %c0_15 = arith.constant 0 : index
    %24 = vector.load %arg7[%c0_14, %c0_15] : memref<32x32xf32, #tpu.memory_space<vmem>>, vector<32x32xf32>
    %cst_16 = arith.constant dense<0.000000e+00> : vector<8x32xf32>
    %25 = tpu.matmul %23, %24, %cst_16 {dimension_numbers = #tpu.dot_dimension_numbers<[1], [0], [0], [1], [0, 0, 1, 1], [], []>} : vector<8x32xf32>, vector<32x32xf32>, vector<8x32xf32> -> vector<8x32xf32>
    %c0_17 = arith.constant 0 : index
    %c0_18 = arith.constant 0 : index
    %26 = vector.load %arg8[%c0_17, %c0_18] : memref<1x32xf32, #tpu.memory_space<vmem>>, vector<1x32xf32>
    %27 = vector.broadcast %26 : vector<1x32xf32> to vector<8x32xf32>
    %28 = arith.addf %25, %27 : vector<8x32xf32>
    %29 = arith.negf %28 : vector<8x32xf32>
    %30 = math.exp %29 : vector<8x32xf32>
    %cst_19 = arith.constant 1.000000e+00 : f32
    %31 = vector.broadcast %cst_19 : f32 to vector<8x32xf32>
    %32 = arith.addf %31, %30 : vector<8x32xf32>
    %33 = arith.divf %31, %32 : vector<8x32xf32>
    %34 = arith.mulf %28, %33 : vector<8x32xf32>
    %35 = arith.mulf %23, %34 : vector<8x32xf32>
    %c0_20 = arith.constant 0 : index
    %c0_21 = arith.constant 0 : index
    %36 = vector.load %arg2[%c0_20, %c0_21] : memref<8x32xf32, #tpu.memory_space<vmem>>, vector<8x32xf32>
    %37 = arith.addf %35, %36 : vector<8x32xf32>
    %c0_22 = arith.constant 0 : index
    %c0_23 = arith.constant 0 : index
    %38 = vector.load %arg9[%c0_22, %c0_23] : memref<8x32xf32, #tpu.memory_space<vmem>>, vector<8x32xf32>
    tpu.vector_store %arg9[%c0_22, %c0_23], %37 {strides = array<i32>} : memref<8x32xf32, #tpu.memory_space<vmem>>, vector<8x32xf32>,
    return
  }
  func.func @transform_0(%arg0: i32) -> (i32, i32) {
    %c0_i32 = arith.constant 0 : i32
    %c0_i32_0 = arith.constant 0 : i32
    return %arg0, %c0_i32 : i32, i32
  }
  func.func @transform_1(%arg0: i32) -> (i32, i32) {
    %c0_i32 = arith.constant 0 : i32
    %c0_i32_0 = arith.constant 0 : i32
    return %arg0, %c0_i32 : i32, i32
  }
  func.func @transform_2(%arg0: i32) -> (i32, i32) {
    %c0_i32 = arith.constant 0 : i32
    %c0_i32_0 = arith.constant 0 : i32
    %c0_i32_1 = arith.constant 0 : i32
    return %c0_i32, %c0_i32_0 : i32, i32
  }
  func.func @transform_3(%arg0: i32) -> (i32, i32) {
    %c0_i32 = arith.constant 0 : i32
    %c0_i32_0 = arith.constant 0 : i32
    %c0_i32_1 = arith.constant 0 : i32
    return %c0_i32, %c0_i32_0 : i32, i32
  }
  func.func @transform_4(%arg0: i32) -> (i32, i32) {
    %c0_i32 = arith.constant 0 : i32
    %c0_i32_0 = arith.constant 0 : i32
    %c0_i32_1 = arith.constant 0 : i32
    return %c0_i32, %c0_i32_0 : i32, i32
  }
  func.func @transform_5(%arg0: i32) -> (i32, i32) {
    %c0_i32 = arith.constant 0 : i32
    %c0_i32_0 = arith.constant 0 : i32
    %c0_i32_1 = arith.constant 0 : i32
    return %c0_i32, %c0_i32_0 : i32, i32
  }
  func.func @transform_6(%arg0: i32) -> (i32, i32) {
    %c0_i32 = arith.constant 0 : i32
    %c0_i32_0 = arith.constant 0 : i32
    %c0_i32_1 = arith.constant 0 : i32
    return %c0_i32, %c0_i32_0 : i32, i32
  }
  func.func @transform_7(%arg0: i32) -> (i32, i32) {
    %c0_i32 = arith.constant 0 : i32
    %c0_i32_0 = arith.constant 0 : i32
    %c0_i32_1 = arith.constant 0 : i32
    return %c0_i32, %c0_i32_0 : i32, i32
  }
  func.func @transform_8(%arg0: i32) -> (i32, i32) {
    %c0_i32 = arith.constant 0 : i32
    %c0_i32_0 = arith.constant 0 : i32
    return %arg0, %c0_i32 : i32, i32
  }
}

module attributes {stable_mosaic.version = 11 : i64} {
  func.func @_linear_kernel(%arg0: i32, %arg1: memref<8x64xf32, #tpu.memory_space<vmem>>, %arg2: memref<64x32xf32, #tpu.memory_space<vmem>>, %arg3: memref<1x32xf32, #tpu.memory_space<vmem>>, %arg4: memref<8x32xf32, #tpu.memory_space<vmem>>) attributes {dimension_semantics = [#tpu.dimension_semantics<parallel>], iteration_bounds = array<i64: 1>, scalar_prefetch = 0 : i64, scratch_operands = 0 : i64, tpu.core_type = #tpu.core_type<tc>, window_params = [{transform_indices = @transform_0, window_bounds = array<i64: 8, 64>}, {pipeline_mode = #tpu.pipeline_mode<synchronous>, transform_indices = @transform_1, window_bounds = array<i64: 64, 32>}, {pipeline_mode = #tpu.pipeline_mode<synchronous>, transform_indices = @transform_2, window_bounds = array<i64: 1, 32>}, {transform_indices = @transform_3, window_bounds = array<i64: 8, 32>}]} {
    %c0 = arith.constant 0 : index
    %c0_0 = arith.constant 0 : index
    %0 = vector.load %arg1[%c0, %c0_0] : memref<8x64xf32, #tpu.memory_space<vmem>>, vector<8x64xf32>
    %c0_1 = arith.constant 0 : index
    %c0_2 = arith.constant 0 : index
    %1 = vector.load %arg2[%c0_1, %c0_2] : memref<64x32xf32, #tpu.memory_space<vmem>>, vector<64x32xf32>
    %cst = arith.constant dense<0.000000e+00> : vector<8x32xf32>
    %2 = tpu.matmul %0, %1, %cst {dimension_numbers = #tpu.dot_dimension_numbers<[1], [0], [0], [1], [0, 0, 1, 1], [], []>} : vector<8x64xf32>, vector<64x32xf32>, vector<8x32xf32> -> vector<8x32xf32>
    %c0_3 = arith.constant 0 : index
    %c0_4 = arith.constant 0 : index
    %3 = vector.load %arg3[%c0_3, %c0_4] : memref<1x32xf32, #tpu.memory_space<vmem>>, vector<1x32xf32>
    %4 = vector.broadcast %3 : vector<1x32xf32> to vector<8x32xf32>
    %5 = arith.addf %2, %4 : vector<8x32xf32>
    %c0_5 = arith.constant 0 : index
    %c0_6 = arith.constant 0 : index
    %6 = vector.load %arg4[%c0_5, %c0_6] : memref<8x32xf32, #tpu.memory_space<vmem>>, vector<8x32xf32>
    tpu.vector_store %arg4[%c0_5, %c0_6], %5 {strides = array<i32>} : memref<8x32xf32, #tpu.memory_space<vmem>>, vector<8x32xf32>,
    return
  }
  func.func @transform_0(%arg0: i32) -> (i32, i32) {
    %c0_i32 = arith.constant 0 : i32
    %c0_i32_0 = arith.constant 0 : i32
    return %arg0, %c0_i32 : i32, i32
  }
  func.func @transform_1(%arg0: i32) -> (i32, i32) {
    %c0_i32 = arith.constant 0 : i32
    %c0_i32_0 = arith.constant 0 : i32
    %c0_i32_1 = arith.constant 0 : i32
    return %c0_i32, %c0_i32_0 : i32, i32
  }
  func.func @transform_2(%arg0: i32) -> (i32, i32) {
    %c0_i32 = arith.constant 0 : i32
    %c0_i32_0 = arith.constant 0 : i32
    %c0_i32_1 = arith.constant 0 : i32
    return %c0_i32, %c0_i32_0 : i32, i32
  }
  func.func @transform_3(%arg0: i32) -> (i32, i32) {
    %c0_i32 = arith.constant 0 : i32
    %c0_i32_0 = arith.constant 0 : i32
    return %arg0, %c0_i32 : i32, i32
  }
}

module attributes {stable_mosaic.version = 11 : i64} {
  func.func @_graphmix_kernel(%arg0: i32, %arg1: i32, %arg2: memref<4x4xf32, #tpu.memory_space<vmem>>, %arg3: memref<1x4x32xf32, #tpu.memory_space<vmem>>, %arg4: memref<1x4x32xf32, #tpu.memory_space<vmem>>) attributes {dimension_semantics = [#tpu.dimension_semantics<parallel>, #tpu.dimension_semantics<parallel>], iteration_bounds = array<i64: 2, 1>, scalar_prefetch = 0 : i64, scratch_operands = 0 : i64, tpu.core_type = #tpu.core_type<tc>, window_params = [{pipeline_mode = #tpu.pipeline_mode<synchronous>, transform_indices = @transform_0, window_bounds = array<i64: 4, 4>}, {transform_indices = @transform_1, window_bounds = array<i64: 1, 4, 32>}, {transform_indices = @transform_2, window_bounds = array<i64: 1, 4, 32>}]} {
    %c0 = arith.constant 0 : index
    %c0_0 = arith.constant 0 : index
    %0 = vector.load %arg2[%c0, %c0_0] : memref<4x4xf32, #tpu.memory_space<vmem>>, vector<4x4xf32>
    %c0_1 = arith.constant 0 : index
    %c0_2 = arith.constant 0 : index
    %c0_3 = arith.constant 0 : index
    %1 = vector.load %arg3[%c0_1, %c0_2, %c0_3] : memref<1x4x32xf32, #tpu.memory_space<vmem>>, vector<1x4x32xf32>
    %2 = vector.shape_cast %1 : vector<1x4x32xf32> to vector<4x32xf32>
    %cst = arith.constant dense<0.000000e+00> : vector<4x32xf32>
    %3 = tpu.matmul %0, %2, %cst {dimension_numbers = #tpu.dot_dimension_numbers<[1], [0], [0], [1], [0, 0, 1, 1], [], []>} : vector<4x4xf32>, vector<4x32xf32>, vector<4x32xf32> -> vector<4x32xf32>
    %c0_4 = arith.constant 0 : index
    %c0_5 = arith.constant 0 : index
    %c0_6 = arith.constant 0 : index
    %4 = vector.load %arg4[%c0_4, %c0_5, %c0_6] : memref<1x4x32xf32, #tpu.memory_space<vmem>>, vector<1x4x32xf32>
    %5 = vector.shape_cast %4 : vector<1x4x32xf32> to vector<4x32xf32>
    %6 = vector.shape_cast %3 : vector<4x32xf32> to vector<1x4x32xf32>
    tpu.vector_store %arg4[%c0_4, %c0_5, %c0_6], %6 {strides = array<i32>} : memref<1x4x32xf32, #tpu.memory_space<vmem>>, vector<1x4x32xf32>,
    return
  }
  func.func @transform_0(%arg0: i32, %arg1: i32) -> (i32, i32) {
    %c0_i32 = arith.constant 0 : i32
    %c0_i32_0 = arith.constant 0 : i32
    %c0_i32_1 = arith.constant 0 : i32
    return %c0_i32, %c0_i32_0 : i32, i32
  }
  func.func @transform_1(%arg0: i32, %arg1: i32) -> (i32, i32, i32) {
    %c0_i32 = arith.constant 0 : i32
    %c0_i32_0 = arith.constant 0 : i32
    return %arg0, %c0_i32, %arg1 : i32, i32, i32
  }
  func.func @transform_2(%arg0: i32, %arg1: i32) -> (i32, i32, i32) {
    %c0_i32 = arith.constant 0 : i32
    %c0_i32_0 = arith.constant 0 : i32
    return %arg0, %c0_i32, %arg1 : i32, i32, i32
  }
}

module attributes {stable_mosaic.version = 11 : i64} {
  func.func @_dim_mixer_kernel(%arg0: i32, %arg1: memref<8x32xf32, #tpu.memory_space<vmem>>, %arg2: memref<1x32xf32, #tpu.memory_space<vmem>>, %arg3: memref<1x32xf32, #tpu.memory_space<vmem>>, %arg4: memref<32x64xf32, #tpu.memory_space<vmem>>, %arg5: memref<1x64xf32, #tpu.memory_space<vmem>>, %arg6: memref<64x32xf32, #tpu.memory_space<vmem>>, %arg7: memref<1x32xf32, #tpu.memory_space<vmem>>, %arg8: memref<32x32xf32, #tpu.memory_space<vmem>>, %arg9: memref<1x32xf32, #tpu.memory_space<vmem>>, %arg10: memref<1x32xf32, #tpu.memory_space<vmem>>, %arg11: memref<1x32xf32, #tpu.memory_space<vmem>>, %arg12: memref<8x32xf32, #tpu.memory_space<vmem>>, %arg13: memref<8x32xf32, #tpu.memory_space<vmem>>) attributes {dimension_semantics = [#tpu.dimension_semantics<parallel>], iteration_bounds = array<i64: 1>, scalar_prefetch = 0 : i64, scratch_operands = 0 : i64, tpu.core_type = #tpu.core_type<tc>, window_params = [{transform_indices = @transform_0, window_bounds = array<i64: 8, 32>}, {pipeline_mode = #tpu.pipeline_mode<synchronous>, transform_indices = @transform_1, window_bounds = array<i64: 1, 32>}, {pipeline_mode = #tpu.pipeline_mode<synchronous>, transform_indices = @transform_2, window_bounds = array<i64: 1, 32>}, {pipeline_mode = #tpu.pipeline_mode<synchronous>, transform_indices = @transform_3, window_bounds = array<i64: 32, 64>}, {pipeline_mode = #tpu.pipeline_mode<synchronous>, transform_indices = @transform_4, window_bounds = array<i64: 1, 64>}, {pipeline_mode = #tpu.pipeline_mode<synchronous>, transform_indices = @transform_5, window_bounds = array<i64: 64, 32>}, {pipeline_mode = #tpu.pipeline_mode<synchronous>, transform_indices = @transform_6, window_bounds = array<i64: 1, 32>}, {pipeline_mode = #tpu.pipeline_mode<synchronous>, transform_indices = @transform_7, window_bounds = array<i64: 32, 32>}, {pipeline_mode = #tpu.pipeline_mode<synchronous>, transform_indices = @transform_8, window_bounds = array<i64: 1, 32>}, {pipeline_mode = #tpu.pipeline_mode<synchronous>, transform_indices = @transform_9, window_bounds = array<i64: 1, 32>}, {pipeline_mode = #tpu.pipeline_mode<synchronous>, transform_indices = @transform_10, window_bounds = array<i64: 1, 32>}, {transform_indices = @transform_11, window_bounds = array<i64: 8, 32>}, {transform_indices = @transform_12, window_bounds = array<i64: 8, 32>}]} {
    %c0 = arith.constant 0 : index
    %c0_0 = arith.constant 0 : index
    %0 = vector.load %arg1[%c0, %c0_0] : memref<8x32xf32, #tpu.memory_space<vmem>>, vector<8x32xf32>
    %c0_1 = arith.constant 0 : index
    %c0_2 = arith.constant 0 : index
    %1 = vector.load %arg2[%c0_1, %c0_2] : memref<1x32xf32, #tpu.memory_space<vmem>>, vector<1x32xf32>
    %c0_3 = arith.constant 0 : index
    %c0_4 = arith.constant 0 : index
    %2 = vector.load %arg3[%c0_3, %c0_4] : memref<1x32xf32, #tpu.memory_space<vmem>>, vector<1x32xf32>
    %cst = arith.constant dense<0.000000e+00> : vector<8xf32>
    %3 = vector.multi_reduction <add>, %0, %cst [1] : vector<8x32xf32> to vector<8xf32>
    %4 = vector.shape_cast %3 : vector<8xf32> to vector<8x1xf32>
    %cst_5 = arith.constant 3.200000e+01 : f32
    %5 = vector.broadcast %cst_5 : f32 to vector<8x1xf32>
    %6 = arith.divf %4, %5 : vector<8x1xf32>
    %7 = vector.broadcast %6 : vector<8x1xf32> to vector<8x32xf32>
    %8 = arith.subf %0, %7 : vector<8x32xf32>
    %9 = arith.mulf %8, %8 : vector<8x32xf32>
    %cst_6 = arith.constant dense<0.000000e+00> : vector<8xf32>
    %10 = vector.multi_reduction <add>, %9, %cst_6 [1] : vector<8x32xf32> to vector<8xf32>
    %11 = vector.shape_cast %10 : vector<8xf32> to vector<8x1xf32>
    %cst_7 = arith.constant 3.200000e+01 : f32
    %12 = vector.broadcast %cst_7 : f32 to vector<8x1xf32>
    %13 = arith.divf %11, %12 : vector<8x1xf32>
    %cst_8 = arith.constant 9.99999974E-6 : f32
    %14 = vector.broadcast %cst_8 : f32 to vector<8x1xf32>
    %15 = arith.addf %13, %14 : vector<8x1xf32>
    %16 = math.rsqrt %15 : vector<8x1xf32>
    %17 = vector.broadcast %16 : vector<8x1xf32> to vector<8x32xf32>
    %18 = arith.mulf %8, %17 : vector<8x32xf32>
    %19 = vector.broadcast %1 : vector<1x32xf32> to vector<8x32xf32>
    %20 = arith.mulf %18, %19 : vector<8x32xf32>
    %21 = vector.broadcast %2 : vector<1x32xf32> to vector<8x32xf32>
    %22 = arith.addf %20, %21 : vector<8x32xf32>
    %c0_9 = arith.constant 0 : index
    %c0_10 = arith.constant 0 : index
    %23 = vector.load %arg4[%c0_9, %c0_10] : memref<32x64xf32, #tpu.memory_space<vmem>>, vector<32x64xf32>
    %cst_11 = arith.constant dense<0.000000e+00> : vector<8x64xf32>
    %24 = tpu.matmul %22, %23, %cst_11 {dimension_numbers = #tpu.dot_dimension_numbers<[1], [0], [0], [1], [0, 0, 1, 1], [], []>} : vector<8x32xf32>, vector<32x64xf32>, vector<8x64xf32> -> vector<8x64xf32>
    %c0_12 = arith.constant 0 : index
    %c0_13 = arith.constant 0 : index
    %25 = vector.load %arg5[%c0_12, %c0_13] : memref<1x64xf32, #tpu.memory_space<vmem>>, vector<1x64xf32>
    %26 = vector.broadcast %25 : vector<1x64xf32> to vector<8x64xf32>
    %27 = arith.addf %24, %26 : vector<8x64xf32>
    %cst_14 = arith.constant 5.000000e-01 : f32
    %28 = vector.broadcast %cst_14 : f32 to vector<8x64xf32>
    %29 = arith.mulf %28, %27 : vector<8x64xf32>
    %cst_15 = arith.constant 4.471500e-02 : f32
    %30 = vector.broadcast %cst_15 : f32 to vector<8x64xf32>
    %31 = arith.mulf %30, %27 : vector<8x64xf32>
    %32 = arith.mulf %31, %27 : vector<8x64xf32>
    %33 = arith.mulf %32, %27 : vector<8x64xf32>
    %34 = arith.addf %27, %33 : vector<8x64xf32>
    %cst_16 = arith.constant 0.797884583 : f32
    %35 = vector.broadcast %cst_16 : f32 to vector<8x64xf32>
    %36 = arith.mulf %35, %34 : vector<8x64xf32>
    %37 = math.tanh %36 : vector<8x64xf32>
    %cst_17 = arith.constant 1.000000e+00 : f32
    %38 = vector.broadcast %cst_17 : f32 to vector<8x64xf32>
    %39 = arith.addf %38, %37 : vector<8x64xf32>
    %40 = arith.mulf %29, %39 : vector<8x64xf32>
    %c0_18 = arith.constant 0 : index
    %c0_19 = arith.constant 0 : index
    %41 = vector.load %arg6[%c0_18, %c0_19] : memref<64x32xf32, #tpu.memory_space<vmem>>, vector<64x32xf32>
    %cst_20 = arith.constant dense<0.000000e+00> : vector<8x32xf32>
    %42 = tpu.matmul %40, %41, %cst_20 {dimension_numbers = #tpu.dot_dimension_numbers<[1], [0], [0], [1], [0, 0, 1, 1], [], []>} : vector<8x64xf32>, vector<64x32xf32>, vector<8x32xf32> -> vector<8x32xf32>
    %c0_21 = arith.constant 0 : index
    %c0_22 = arith.constant 0 : index
    %43 = vector.load %arg7[%c0_21, %c0_22] : memref<1x32xf32, #tpu.memory_space<vmem>>, vector<1x32xf32>
    %44 = vector.broadcast %43 : vector<1x32xf32> to vector<8x32xf32>
    %45 = arith.addf %42, %44 : vector<8x32xf32>
    %c0_23 = arith.constant 0 : index
    %c0_24 = arith.constant 0 : index
    %46 = vector.load %arg8[%c0_23, %c0_24] : memref<32x32xf32, #tpu.memory_space<vmem>>, vector<32x32xf32>
    %cst_25 = arith.constant dense<0.000000e+00> : vector<8x32xf32>
    %47 = tpu.matmul %45, %46, %cst_25 {dimension_numbers = #tpu.dot_dimension_numbers<[1], [0], [0], [1], [0, 0, 1, 1], [], []>} : vector<8x32xf32>, vector<32x32xf32>, vector<8x32xf32> -> vector<8x32xf32>
    %c0_26 = arith.constant 0 : index
    %c0_27 = arith.constant 0 : index
    %48 = vector.load %arg9[%c0_26, %c0_27] : memref<1x32xf32, #tpu.memory_space<vmem>>, vector<1x32xf32>
    %49 = vector.broadcast %48 : vector<1x32xf32> to vector<8x32xf32>
    %50 = arith.addf %47, %49 : vector<8x32xf32>
    %51 = arith.negf %50 : vector<8x32xf32>
    %52 = math.exp %51 : vector<8x32xf32>
    %cst_28 = arith.constant 1.000000e+00 : f32
    %53 = vector.broadcast %cst_28 : f32 to vector<8x32xf32>
    %54 = arith.addf %53, %52 : vector<8x32xf32>
    %55 = arith.divf %53, %54 : vector<8x32xf32>
    %56 = arith.mulf %50, %55 : vector<8x32xf32>
    %57 = arith.mulf %45, %56 : vector<8x32xf32>
    %58 = arith.addf %57, %0 : vector<8x32xf32>
    %c0_29 = arith.constant 0 : index
    %c0_30 = arith.constant 0 : index
    %59 = vector.load %arg12[%c0_29, %c0_30] : memref<8x32xf32, #tpu.memory_space<vmem>>, vector<8x32xf32>
    tpu.vector_store %arg12[%c0_29, %c0_30], %58 {strides = array<i32>} : memref<8x32xf32, #tpu.memory_space<vmem>>, vector<8x32xf32>,
    %c0_31 = arith.constant 0 : index
    %c0_32 = arith.constant 0 : index
    %60 = vector.load %arg10[%c0_31, %c0_32] : memref<1x32xf32, #tpu.memory_space<vmem>>, vector<1x32xf32>
    %c0_33 = arith.constant 0 : index
    %c0_34 = arith.constant 0 : index
    %61 = vector.load %arg11[%c0_33, %c0_34] : memref<1x32xf32, #tpu.memory_space<vmem>>, vector<1x32xf32>
    %cst_35 = arith.constant dense<0.000000e+00> : vector<8xf32>
    %62 = vector.multi_reduction <add>, %58, %cst_35 [1] : vector<8x32xf32> to vector<8xf32>
    %63 = vector.shape_cast %62 : vector<8xf32> to vector<8x1xf32>
    %cst_36 = arith.constant 3.200000e+01 : f32
    %64 = vector.broadcast %cst_36 : f32 to vector<8x1xf32>
    %65 = arith.divf %63, %64 : vector<8x1xf32>
    %66 = vector.broadcast %65 : vector<8x1xf32> to vector<8x32xf32>
    %67 = arith.subf %58, %66 : vector<8x32xf32>
    %68 = arith.mulf %67, %67 : vector<8x32xf32>
    %cst_37 = arith.constant dense<0.000000e+00> : vector<8xf32>
    %69 = vector.multi_reduction <add>, %68, %cst_37 [1] : vector<8x32xf32> to vector<8xf32>
    %70 = vector.shape_cast %69 : vector<8xf32> to vector<8x1xf32>
    %cst_38 = arith.constant 3.200000e+01 : f32
    %71 = vector.broadcast %cst_38 : f32 to vector<8x1xf32>
    %72 = arith.divf %70, %71 : vector<8x1xf32>
    %cst_39 = arith.constant 9.99999974E-6 : f32
    %73 = vector.broadcast %cst_39 : f32 to vector<8x1xf32>
    %74 = arith.addf %72, %73 : vector<8x1xf32>
    %75 = math.rsqrt %74 : vector<8x1xf32>
    %76 = vector.broadcast %75 : vector<8x1xf32> to vector<8x32xf32>
    %77 = arith.mulf %67, %76 : vector<8x32xf32>
    %78 = vector.broadcast %60 : vector<1x32xf32> to vector<8x32xf32>
    %79 = arith.mulf %77, %78 : vector<8x32xf32>
    %80 = vector.broadcast %61 : vector<1x32xf32> to vector<8x32xf32>
    %81 = arith.addf %79, %80 : vector<8x32xf32>
    %c0_40 = arith.constant 0 : index
    %c0_41 = arith.constant 0 : index
    %82 = vector.load %arg13[%c0_40, %c0_41] : memref<8x32xf32, #tpu.memory_space<vmem>>, vector<8x32xf32>
    tpu.vector_store %arg13[%c0_40, %c0_41], %81 {strides = array<i32>} : memref<8x32xf32, #tpu.memory_space<vmem>>, vector<8x32xf32>,
    return
  }
  func.func @transform_0(%arg0: i32) -> (i32, i32) {
    %c0_i32 = arith.constant 0 : i32
    %c0_i32_0 = arith.constant 0 : i32
    return %arg0, %c0_i32 : i32, i32
  }
  func.func @transform_1(%arg0: i32) -> (i32, i32) {
    %c0_i32 = arith.constant 0 : i32
    %c0_i32_0 = arith.constant 0 : i32
    %c0_i32_1 = arith.constant 0 : i32
    return %c0_i32, %c0_i32_0 : i32, i32
  }
  func.func @transform_2(%arg0: i32) -> (i32, i32) {
    %c0_i32 = arith.constant 0 : i32
    %c0_i32_0 = arith.constant 0 : i32
    %c0_i32_1 = arith.constant 0 : i32
    return %c0_i32, %c0_i32_0 : i32, i32
  }
  func.func @transform_3(%arg0: i32) -> (i32, i32) {
    %c0_i32 = arith.constant 0 : i32
    %c0_i32_0 = arith.constant 0 : i32
    %c0_i32_1 = arith.constant 0 : i32
    return %c0_i32, %c0_i32_0 : i32, i32
  }
  func.func @transform_4(%arg0: i32) -> (i32, i32) {
    %c0_i32 = arith.constant 0 : i32
    %c0_i32_0 = arith.constant 0 : i32
    %c0_i32_1 = arith.constant 0 : i32
    return %c0_i32, %c0_i32_0 : i32, i32
  }
  func.func @transform_5(%arg0: i32) -> (i32, i32) {
    %c0_i32 = arith.constant 0 : i32
    %c0_i32_0 = arith.constant 0 : i32
    %c0_i32_1 = arith.constant 0 : i32
    return %c0_i32, %c0_i32_0 : i32, i32
  }
  func.func @transform_6(%arg0: i32) -> (i32, i32) {
    %c0_i32 = arith.constant 0 : i32
    %c0_i32_0 = arith.constant 0 : i32
    %c0_i32_1 = arith.constant 0 : i32
    return %c0_i32, %c0_i32_0 : i32, i32
  }
  func.func @transform_7(%arg0: i32) -> (i32, i32) {
    %c0_i32 = arith.constant 0 : i32
    %c0_i32_0 = arith.constant 0 : i32
    %c0_i32_1 = arith.constant 0 : i32
    return %c0_i32, %c0_i32_0 : i32, i32
  }
  func.func @transform_8(%arg0: i32) -> (i32, i32) {
    %c0_i32 = arith.constant 0 : i32
    %c0_i32_0 = arith.constant 0 : i32
    %c0_i32_1 = arith.constant 0 : i32
    return %c0_i32, %c0_i32_0 : i32, i32
  }
  func.func @transform_9(%arg0: i32) -> (i32, i32) {
    %c0_i32 = arith.constant 0 : i32
    %c0_i32_0 = arith.constant 0 : i32
    %c0_i32_1 = arith.constant 0 : i32
    return %c0_i32, %c0_i32_0 : i32, i32
  }
  func.func @transform_10(%arg0: i32) -> (i32, i32) {
    %c0_i32 = arith.constant 0 : i32
    %c0_i32_0 = arith.constant 0 : i32
    %c0_i32_1 = arith.constant 0 : i32
    return %c0_i32, %c0_i32_0 : i32, i32
  }
  func.func @transform_11(%arg0: i32) -> (i32, i32) {
    %c0_i32 = arith.constant 0 : i32
    %c0_i32_0 = arith.constant 0 : i32
    return %arg0, %c0_i32 : i32, i32
  }
  func.func @transform_12(%arg0: i32) -> (i32, i32) {
    %c0_i32 = arith.constant 0 : i32
    %c0_i32_0 = arith.constant 0 : i32
    return %arg0, %c0_i32 : i32, i32
  }
}

module attributes {stable_mosaic.version = 11 : i64} {
  func.func @_graph_ffn_kernel(%arg0: i32, %arg1: memref<8x32xf32, #tpu.memory_space<vmem>>, %arg2: memref<8x32xf32, #tpu.memory_space<vmem>>, %arg3: memref<32x64xf32, #tpu.memory_space<vmem>>, %arg4: memref<1x64xf32, #tpu.memory_space<vmem>>, %arg5: memref<64x32xf32, #tpu.memory_space<vmem>>, %arg6: memref<1x32xf32, #tpu.memory_space<vmem>>, %arg7: memref<32x32xf32, #tpu.memory_space<vmem>>, %arg8: memref<1x32xf32, #tpu.memory_space<vmem>>, %arg9: memref<8x32xf32, #tpu.memory_space<vmem>>) attributes {dimension_semantics = [#tpu.dimension_semantics<parallel>], iteration_bounds = array<i64: 1>, scalar_prefetch = 0 : i64, scratch_operands = 0 : i64, tpu.core_type = #tpu.core_type<tc>, window_params = [{transform_indices = @transform_0, window_bounds = array<i64: 8, 32>}, {transform_indices = @transform_1, window_bounds = array<i64: 8, 32>}, {pipeline_mode = #tpu.pipeline_mode<synchronous>, transform_indices = @transform_2, window_bounds = array<i64: 32, 64>}, {pipeline_mode = #tpu.pipeline_mode<synchronous>, transform_indices = @transform_3, window_bounds = array<i64: 1, 64>}, {pipeline_mode = #tpu.pipeline_mode<synchronous>, transform_indices = @transform_4, window_bounds = array<i64: 64, 32>}, {pipeline_mode = #tpu.pipeline_mode<synchronous>, transform_indices = @transform_5, window_bounds = array<i64: 1, 32>}, {pipeline_mode = #tpu.pipeline_mode<synchronous>, transform_indices = @transform_6, window_bounds = array<i64: 32, 32>}, {pipeline_mode = #tpu.pipeline_mode<synchronous>, transform_indices = @transform_7, window_bounds = array<i64: 1, 32>}, {transform_indices = @transform_8, window_bounds = array<i64: 8, 32>}]} {
    %c0 = arith.constant 0 : index
    %c0_0 = arith.constant 0 : index
    %0 = vector.load %arg1[%c0, %c0_0] : memref<8x32xf32, #tpu.memory_space<vmem>>, vector<8x32xf32>
    %c0_1 = arith.constant 0 : index
    %c0_2 = arith.constant 0 : index
    %1 = vector.load %arg3[%c0_1, %c0_2] : memref<32x64xf32, #tpu.memory_space<vmem>>, vector<32x64xf32>
    %cst = arith.constant dense<0.000000e+00> : vector<8x64xf32>
    %2 = tpu.matmul %0, %1, %cst {dimension_numbers = #tpu.dot_dimension_numbers<[1], [0], [0], [1], [0, 0, 1, 1], [], []>} : vector<8x32xf32>, vector<32x64xf32>, vector<8x64xf32> -> vector<8x64xf32>
    %c0_3 = arith.constant 0 : index
    %c0_4 = arith.constant 0 : index
    %3 = vector.load %arg4[%c0_3, %c0_4] : memref<1x64xf32, #tpu.memory_space<vmem>>, vector<1x64xf32>
    %4 = vector.broadcast %3 : vector<1x64xf32> to vector<8x64xf32>
    %5 = arith.addf %2, %4 : vector<8x64xf32>
    %cst_5 = arith.constant 5.000000e-01 : f32
    %6 = vector.broadcast %cst_5 : f32 to vector<8x64xf32>
    %7 = arith.mulf %6, %5 : vector<8x64xf32>
    %cst_6 = arith.constant 4.471500e-02 : f32
    %8 = vector.broadcast %cst_6 : f32 to vector<8x64xf32>
    %9 = arith.mulf %8, %5 : vector<8x64xf32>
    %10 = arith.mulf %9, %5 : vector<8x64xf32>
    %11 = arith.mulf %10, %5 : vector<8x64xf32>
    %12 = arith.addf %5, %11 : vector<8x64xf32>
    %cst_7 = arith.constant 0.797884583 : f32
    %13 = vector.broadcast %cst_7 : f32 to vector<8x64xf32>
    %14 = arith.mulf %13, %12 : vector<8x64xf32>
    %15 = math.tanh %14 : vector<8x64xf32>
    %cst_8 = arith.constant 1.000000e+00 : f32
    %16 = vector.broadcast %cst_8 : f32 to vector<8x64xf32>
    %17 = arith.addf %16, %15 : vector<8x64xf32>
    %18 = arith.mulf %7, %17 : vector<8x64xf32>
    %c0_9 = arith.constant 0 : index
    %c0_10 = arith.constant 0 : index
    %19 = vector.load %arg5[%c0_9, %c0_10] : memref<64x32xf32, #tpu.memory_space<vmem>>, vector<64x32xf32>
    %cst_11 = arith.constant dense<0.000000e+00> : vector<8x32xf32>
    %20 = tpu.matmul %18, %19, %cst_11 {dimension_numbers = #tpu.dot_dimension_numbers<[1], [0], [0], [1], [0, 0, 1, 1], [], []>} : vector<8x64xf32>, vector<64x32xf32>, vector<8x32xf32> -> vector<8x32xf32>
    %c0_12 = arith.constant 0 : index
    %c0_13 = arith.constant 0 : index
    %21 = vector.load %arg6[%c0_12, %c0_13] : memref<1x32xf32, #tpu.memory_space<vmem>>, vector<1x32xf32>
    %22 = vector.broadcast %21 : vector<1x32xf32> to vector<8x32xf32>
    %23 = arith.addf %20, %22 : vector<8x32xf32>
    %c0_14 = arith.constant 0 : index
    %c0_15 = arith.constant 0 : index
    %24 = vector.load %arg7[%c0_14, %c0_15] : memref<32x32xf32, #tpu.memory_space<vmem>>, vector<32x32xf32>
    %cst_16 = arith.constant dense<0.000000e+00> : vector<8x32xf32>
    %25 = tpu.matmul %23, %24, %cst_16 {dimension_numbers = #tpu.dot_dimension_numbers<[1], [0], [0], [1], [0, 0, 1, 1], [], []>} : vector<8x32xf32>, vector<32x32xf32>, vector<8x32xf32> -> vector<8x32xf32>
    %c0_17 = arith.constant 0 : index
    %c0_18 = arith.constant 0 : index
    %26 = vector.load %arg8[%c0_17, %c0_18] : memref<1x32xf32, #tpu.memory_space<vmem>>, vector<1x32xf32>
    %27 = vector.broadcast %26 : vector<1x32xf32> to vector<8x32xf32>
    %28 = arith.addf %25, %27 : vector<8x32xf32>
    %29 = arith.negf %28 : vector<8x32xf32>
    %30 = math.exp %29 : vector<8x32xf32>
    %cst_19 = arith.constant 1.000000e+00 : f32
    %31 = vector.broadcast %cst_19 : f32 to vector<8x32xf32>
    %32 = arith.addf %31, %30 : vector<8x32xf32>
    %33 = arith.divf %31, %32 : vector<8x32xf32>
    %34 = arith.mulf %28, %33 : vector<8x32xf32>
    %35 = arith.mulf %23, %34 : vector<8x32xf32>
    %c0_20 = arith.constant 0 : index
    %c0_21 = arith.constant 0 : index
    %36 = vector.load %arg2[%c0_20, %c0_21] : memref<8x32xf32, #tpu.memory_space<vmem>>, vector<8x32xf32>
    %37 = arith.addf %35, %36 : vector<8x32xf32>
    %c0_22 = arith.constant 0 : index
    %c0_23 = arith.constant 0 : index
    %38 = vector.load %arg9[%c0_22, %c0_23] : memref<8x32xf32, #tpu.memory_space<vmem>>, vector<8x32xf32>
    tpu.vector_store %arg9[%c0_22, %c0_23], %37 {strides = array<i32>} : memref<8x32xf32, #tpu.memory_space<vmem>>, vector<8x32xf32>,
    return
  }
  func.func @transform_0(%arg0: i32) -> (i32, i32) {
    %c0_i32 = arith.constant 0 : i32
    %c0_i32_0 = arith.constant 0 : i32
    return %arg0, %c0_i32 : i32, i32
  }
  func.func @transform_1(%arg0: i32) -> (i32, i32) {
    %c0_i32 = arith.constant 0 : i32
    %c0_i32_0 = arith.constant 0 : i32
    return %arg0, %c0_i32 : i32, i32
  }
  func.func @transform_2(%arg0: i32) -> (i32, i32) {
    %c0_i32 = arith.constant 0 : i32
    %c0_i32_0 = arith.constant 0 : i32
    %c0_i32_1 = arith.constant 0 : i32
    return %c0_i32, %c0_i32_0 : i32, i32
  }
  func.func @transform_3(%arg0: i32) -> (i32, i32) {
    %c0_i32 = arith.constant 0 : i32
    %c0_i32_0 = arith.constant 0 : i32
    %c0_i32_1 = arith.constant 0 : i32
    return %c0_i32, %c0_i32_0 : i32, i32
  }
  func.func @transform_4(%arg0: i32) -> (i32, i32) {
    %c0_i32 = arith.constant 0 : i32
    %c0_i32_0 = arith.constant 0 : i32
    %c0_i32_1 = arith.constant 0 : i32
    return %c0_i32, %c0_i32_0 : i32, i32
  }
  func.func @transform_5(%arg0: i32) -> (i32, i32) {
    %c0_i32 = arith.constant 0 : i32
    %c0_i32_0 = arith.constant 0 : i32
    %c0_i32_1 = arith.constant 0 : i32
    return %c0_i32, %c0_i32_0 : i32, i32
  }
  func.func @transform_6(%arg0: i32) -> (i32, i32) {
    %c0_i32 = arith.constant 0 : i32
    %c0_i32_0 = arith.constant 0 : i32
    %c0_i32_1 = arith.constant 0 : i32
    return %c0_i32, %c0_i32_0 : i32, i32
  }
  func.func @transform_7(%arg0: i32) -> (i32, i32) {
    %c0_i32 = arith.constant 0 : i32
    %c0_i32_0 = arith.constant 0 : i32
    %c0_i32_1 = arith.constant 0 : i32
    return %c0_i32, %c0_i32_0 : i32, i32
  }
  func.func @transform_8(%arg0: i32) -> (i32, i32) {
    %c0_i32 = arith.constant 0 : i32
    %c0_i32_0 = arith.constant 0 : i32
    return %arg0, %c0_i32 : i32, i32
  }
}

</mosaic_0001>

<bundles_post_ra>
// kernel: _lambda_.14
= control target key start
LH: loop header
LB: loop body
LE: loop exit
PB: predicated region body
PF: predicated region fallthrough
CT: control target
= control target key end

     0   :  { %s391_s12 = smov 0   ;;  %s417_s0 = inlined_call_operand.vmem [shape: f32[32,16], index: 0, kind: input, shape index: {}]   ;;  %s418_s1 = inlined_call_operand.vmem [shape: f32[16,32], index: 1, kind: input, shape index: {}]   ;;  %s419_s2 = inlined_call_operand.vmem [shape: f32[1,32], index: 2, kind: input, shape index: {}]   ;;  %s420_s3 = inlined_call_operand.vmem [shape: f32[32,32], index: 3, kind: output, shape index: {}]  }
   0x1 LB: > { %s326_s13 = sadd.s32 4294967295, %s369_s12   ;;  %p330_p0 = scmp.ge.s32.totalorder %s369_s12, 1  ;;  %s369_s12 = sphi %s391_s12, %s13_s12  }
   0x2   : > { %p138_p1 = scmp.lt.s32.totalorder %s369_s12, 3 }
   0x4   : > { %p139_p2 = pnand %p330_p0, %p138_p1 }
   0x5   : > { %v176_v0 = vld [vmem:[%s418_s1] sm:$0xff] (!%p139_p2)  ;;  %v177_v1 = vld [vmem:[%s418_s1 + $0x8] sm:$0xff] (!%p139_p2)  ;;  %s331_s18 = sshll.u32 (!%p139_p2), %s326_s13, 1  ;;  %vm185_vm0 = vcmask (!%p139_p2), 130048   ;;  %vm267_vm1 = vcmask (!%p139_p2), 261120  }
   0x6   : > { %142 = sbr.rel (%p139_p2) target bundleno = 234 (0xea), region = 32  ;;  %v351_v2 = vpack.c.bf16 (!%p139_p2), %v177_v1, %v176_v0  ;;  %p163_p3 = scmp.lt.s32.totalorder (!%p139_p2), %s331_s18, 3  ;;  %v335_v5 = vld [vmem:[%s419_s2] ss:$0 sm:$0xff] (!%p139_p2) }
   0x8   : > { %352 = vmatprep.subr.bf16.mxu0 (!%p139_p2), %v351_v2 }
   0x9   : > { %354 = vmatpush3.bf16.msra.mxu0 (!%p139_p2), %v351_v2 }
   0xd   : > { %s422_s18 = smov (!%p163_p3, %s331_s18), 3 }
   0xe   : > { %s332_s19 = sshll.u32 %s422_s18, 3 }
   0xf   : > { %s166_s22 = scalar_lea.vmem %s417_s0, %s332_s19  ;;  %s172_s27 = scalar_lea.vmem %s420_s3, %s332_s19 }
  0x10   : > { %v174_v3 = vld [vmem:[%s166_s22] sm:$0xff]  ;;  %v175_v4 = vld [vmem:[%s166_s22 + $0x8] sm:$0xff] }
  0x11   : > { %348 = vmatprep.mubr.msk.f32.mxu0 %vm185_vm0, %v174_v3 }
  0x12   : > { %349 = vmatmul.mubr.msk.f32.vlgmr.msra.gmra.mrb[0].mxu0 %vm185_vm0, %v175_v4 }
  0xe5   : > { %v350_v6 = vpop.f32.mrb[0].mxu0 }
  0xe6   : > { %v258_v7 = vpop.f32.mrb[1].mxu0  ;;  %v264_v9 = vadd.f32 %v350_v6, %v335_v5 }
  0xe7   : > { %v259_v8 = vadd.f32 %v335_v5, %v258_v7 }
  0xe8   : > { %269 = vst.msk [vmem:[%s172_s27 + $0x8] sm:$0xff] %vm267_vm1, %v264_v9 }
  0xe9   : > { %268 = vst.msk [vmem:[%s172_s27] sm:$0xff] %vm267_vm1, %v259_v8 }
  0xea PF: > { %s13_s12 = sadd.s32 1, %s369_s12  }
  0xeb   : > { %p10_p4 = scmp.ge.s32.totalorder %s13_s12, 4  }
  0xed   :  { %12 = sbr.rel (!%p10_p4) target bundleno = 1 (0x1), region = 62 }

// kernel: _lambda_.17
= control target key start
LH: loop header
LB: loop body
LE: loop exit
PB: predicated region body
PF: predicated region fallthrough
CT: control target
= control target key end

     0   :  { %s410_s9 = smov 0   ;;  %s412_s10 = smov 0   ;;  %s443_s0 = inlined_call_operand.vmem [shape: f32[4,4], index: 0, kind: input, shape index: {}]   ;;  %s444_s1 = inlined_call_operand.vmem [shape: f32[2,4,128], index: 1, kind: input, shape index: {}]   ;;  %s445_s2 = inlined_call_operand.vmem [shape: f32[2,4,128], index: 2, kind: output, shape index: {}]  }
   0x1   :  { %s414_s11 = smov 0  }
   0x2 LB: > { %s24_s12 = sadd.s32 1, %s387_s10  ;;  %p329_p0 = scmp.ge.s32.totalorder %s391_s11, 1  ;;  %s391_s11 = sphi %s414_s11, %s12_s11   ;;  %s387_s10 = sphi %s412_s10, %s447_s10   ;;  %s383_s9 = sphi %s410_s9, %s446_s9  }
   0x3   : > { %p26_p1 = scmp.ge.s32.totalorder %s24_s12, 2  ;;  %p130_p2 = scmp.lt.s32.totalorder %s391_s11, 3 }
   0x5   : > { %s449_s12 = smov (%p26_p1, %s24_s12), 0  ;;  %p131_p3 = pnand %p329_p0, %p130_p2 }
   0x6   : > { %p156_p4 = scmp.lt.s32.totalorder (!%p131_p3), %s383_s9, 1  ;;  %v393_v0 = vmov (!%p131_p3), 0.0   ;;  %vm394_vm0 = vmmov (!%p131_p3), 0   ;;  %vm176_vm1 = vcmask (!%p131_p3), 1043456   ;;  %v170_v1 = vld [vmem:[%s443_s0] sm:$0xf] (!%p131_p3) }
   0x7   : > { %134 = sbr.rel (%p131_p3) target bundleno = 232 (0xe8), region = 28  ;;  %338 = vmatprep.subr.mxu0 (!%p131_p3), %v393_v0  ;;  %340 = vmatprep.mubr.msk.f32.mxu0 (!%p131_p3), %vm394_vm0, %v393_v0  ;;  %vm172_vm2 = vcmask (!%p131_p3), 31744  }
   0xe   : > { %s451_s9 = smov (!%p156_p4, %s383_s9), 1 }
   0xf   : > { %s330_s13 = sshll.u32 %s451_s9, 2 }
  0x10   : > { %s162_s16 = scalar_lea.vmem %s444_s1, %s330_s13  ;;  %s169_s21 = scalar_lea.vmem %s445_s2, %s330_s13 }
  0x11   : > { %v171_v2 = vld [vmem:[%s162_s16] sm:$0xf] }
  0x12   : > { %339 = vmatpush3.msk.msra.mxu0 %vm176_vm1, %v171_v2 }
  0x13   : > { %341 = vmatmul.mubr.msk.f32.vlgmr.msra.gmra.mrb[0].mxu0 %vm172_vm2, %v170_v1 }
  0xe6   : > { %v246_v3 = vpop.f32.mrb[0].mxu0 }
  0xe7   : > { %250 = vst [vmem:[%s169_s21] sm:$0xf] %v246_v3  ;;  %v342_v4 = vpop.f32.mrb[1].mxu0 }
  0xe8 PF: > { %s12_s11 = sadd.s32 1, %s391_s11   ;;  %s446_s9 = smov %s387_s10 }
  0xe9   : > { %p9_p5 = scmp.ge.s32.totalorder %s12_s11, 4   ;;  %s447_s10 = smov %s449_s12 }
  0xeb   :  { %11 = sbr.rel (!%p9_p5) target bundleno = 2 (0x2), region = 58 }

// kernel: _lambda_.15
= control target key start
LH: loop header
LB: loop body
LE: loop exit
PB: predicated region body
PF: predicated region fallthrough
CT: control target
= control target key end

     0   :  { %s801_s30 = smov 0   ;;  %s864_s0 = inlined_call_operand.vmem [shape: f32[8,4,32], index: 0, kind: input, shape index: {}]   ;;  %s865_s1 = inlined_call_operand.vmem [shape: f32[1,32], index: 1, kind: input, shape index: {}]   ;;  %s866_s2 = inlined_call_operand.vmem [shape: f32[1,32], index: 2, kind: input, shape index: {}]   ;;  %s867_s3 = inlined_call_operand.vmem [shape: f32[8,4], index: 3, kind: input, shape index: {}]   ;;  %s868_s4 = inlined_call_operand.vmem [shape: f32[8,1], index: 4, kind: input, shape index: {}]   ;;  %s869_s5 = inlined_call_operand.vmem [shape: f32[4,8], index: 5, kind: input, shape index: {}]   ;;  %s870_s6 = inlined_call_operand.vmem [shape: f32[4,1], index: 6, kind: input, shape index: {}]   ;;  %s871_s7 = inlined_call_operand.vmem [shape: f32[4,4], index: 7, kind: input, shape index: {}]   ;;  %s872_s8 = inlined_call_operand.vmem [shape: f32[4,1], index: 8, kind: input, shape index: {}]   ;;  %s873_s9 = inlined_call_operand.vmem [shape: f32[8,4,32], index: 9, kind: output, shape index: {}]  }
   0x1 LB: > { %s681_s10 = sadd.s32 4294967295, %s746_s30   ;;  %p685_p0 = scmp.ge.s32.totalorder %s746_s30, 1  ;;  %s746_s30 = sphi %s801_s30, %s19_s30  }
   0x2   : > { %p286_p1 = scmp.lt.s32.totalorder %s746_s30, 9 }
   0x4   : > { %p287_p2 = pnand %p685_p0, %p286_p1 }
   0x5   : > { %p320_p3 = scmp.lt.s32.totalorder (!%p287_p2), %s681_s10, 7  ;;  %vm331_vm0 = vcmask (!%p287_p2), 257024   ;;  %v748_v7 = vmov (!%p287_p2), 0.0   ;;  %vm749_vm1 = vmmov (!%p287_p2), 0   ;;  %v361_v8 = vld [vmem:[%s868_s4] sm:$0xff] (!%p287_p2)  ;;  %v750_v9 = vmov (!%p287_p2), 0  }
   0x6   : > { %290 = sbr.rel (%p287_p2) target bundleno = 1033 (0x409), region = 56  ;;  %704 = vmatprep.subr.mxu0 (!%p287_p2), %v748_v7  ;;  %709 = vmatprep.subr.mxu1 (!%p287_p2), %v748_v7  ;;  %v455_v10 = vld [vmem:[%s870_s6] sm:$0xf] (!%p287_p2)  ;;  %vm371_vm2 = vcmask (!%p287_p2), 1043456   ;;  %vm367_vm3 = vcmask (!%p287_p2), 31744   ;;  %vm461_vm4 = vcmask (!%p287_p2), 64512  }
   0x7   : > { %706 = vmatprep.mubr.msk.f32.mxu0 (!%p287_p2), %vm749_vm1, %v748_v7  ;;  %711 = vmatprep.mubr.msk.f32.mxu1 (!%p287_p2), %vm749_vm1, %v748_v7  ;;  %v688_v15 = vld [vmem:[%s865_s1] ss:$0 sm:$0xff] (!%p287_p2) }
   0x8   : > { %730 = vset.pattern.permute.xlu1 (!%p287_p2), %v750_v9  ;;  %731 = vset.pattern.permute.xlu0 (!%p287_p2), %v750_v9  ;;  %v689_v17 = vld [vmem:[%s866_s2] ss:$0 sm:$0xff] (!%p287_p2) }
   0x9   : > { %364 = vperm.xlu1 (!%p287_p2), %730, %v361_v8   ;;  %v360_v20 = vld [vmem:[%s867_s3] sm:$0xff] (!%p287_p2) }
   0xa   : > { %v454_v34 = vld [vmem:[%s869_s5] sm:$0xf] (!%p287_p2) }
   0xb   : > { %v536_v35 = vld [vmem:[%s872_s8] sm:$0xf] (!%p287_p2) }
   0xc   : > { %v535_v40 = vld [vmem:[%s871_s7] sm:$0xf] (!%p287_p2) }
   0xd   : > { %s875_s10 = smov (!%p320_p3, %s681_s10), 7  ;;  %458 = vperm.xlu1 %730, %v455_v10  }
   0xe   : > { %s686_s11 = sshll.u32 %s875_s10, 2 }
   0xf   : > { %s323_s14 = scalar_lea.vmem %s864_s0, %s686_s11  ;;  %s327_s15 = scalar_lea.vmem %s873_s9, %s686_s11 }
  0x10   : > { %v817_v0 = vld [vmem:[%s323_s14] sm:$0xf] }
  0x11   : > { %v332_v1 = vsel %vm331_vm0, %v817_v0, 0.0 }
  0x12   : > { %333 = vadd.xlane.f32.xlu0 %v332_v1 }
  0x88   : > { %v365_v21 = vpop.permute.xlu1 %364 }
  0x8c   : > { %v459_v36 = vpop.permute.xlu1 %458 }
  0x9f   : > { %v334_v2 = vpop.xlane.xlu0 %333 }
  0xa0   : > { %v336_v3 = vmul.f32 0.03125, %v334_v2 }
  0xa2   : > { %v337_v4 = vsub.f32 %v817_v0, %v336_v3 }
  0xa4   : > { %v338_v5 = vmul.f32 %v337_v4, %v337_v4 }
  0xa6   : > { %v339_v6 = vsel %vm331_vm0, %v338_v5, 0.0 }
  0xa7   : > { %340 = vadd.xlane.f32.xlu0 %v339_v6 }
  0xbd   : > { %539 = vperm.xlu0 %731, %v536_v35  }
 0x134   : > { %v341_v11 = vpop.xlane.xlu0 %340 }
 0x135   : > { %v342_v12 = vmul.f32 0.03125, %v341_v11 }
 0x137   : > { %v343_v13 = vadd.f32 1e-05, %v342_v12 }
 0x139   : > { %732 = vrsqrt.f32 %v343_v13 }
 0x13c   : > { %v540_v41 = vpop.permute.xlu0 %539 }
 0x143   : > { %v733_v14 = vpop.eup %732 }
 0x144   : > { %v345_v16 = vmul.f32 %v733_v14, %v337_v4 }
 0x146   : > { %v352_v18 = vmul.f32 %v688_v15, %v345_v16 }
 0x148   : > { %v359_v19 = vadd.f32 %v689_v17, %v352_v18 }
 0x14a   : > { %705 = vmatpush3.msk.msra.mxu0 %vm371_vm2, %v359_v19 }
 0x14b   : > { %707 = vmatmul.mubr.msk.f32.vlgmr.msra.gmra.mrb[0].mxu0 %vm367_vm3, %v360_v20  ;;  %714 = vmatprep.subr.mxu0 %v748_v7 }
 0x14c   : > { %716 = vmatprep.mubr.msk.f32.mxu0 %vm749_vm1, %v748_v7 }
 0x21e   : > { %v441_v22 = vpop.f32.mrb[0].mxu0 }
 0x21f   : > { %v442_v23 = vadd.f32 %v441_v22, %v365_v21  ;;  %v708_v24 = vpop.f32.mrb[1].mxu0 }
 0x221   : > { %v446_v25 = vmul.f32 0.044715, %v442_v23  ;;  %v445_v31 = vmul.f32 0.5, %v442_v23 }
 0x223   : > { %v447_v26 = vmul.f32 %v446_v25, %v442_v23 }
 0x225   : > { %v448_v27 = vmul.f32 %v447_v26, %v442_v23 }
 0x227   : > { %v449_v28 = vadd.f32 %v448_v27, %v442_v23 }
 0x229   : > { %v450_v29 = vmul.f32 0.7978846, %v449_v28 }
 0x22b   : > { %734 = vtanh.f32 %v450_v29 }
 0x235   : > { %v735_v30 = vpop.eup %734 }
 0x236   : > { %v452_v32 = vadd.f32 1.0, %v735_v30 }
 0x238   : > { %v453_v33 = vmul.f32 %v452_v32, %v445_v31 }
 0x23a   : > { %710 = vmatpush3.msra.mxu1 %v453_v33 }
 0x23b   : > { %712 = vmatmul.mubr.msk.f32.vlgmr.msra.gmra.mrb[0].mxu1 %vm461_vm4, %v454_v34 }
 0x30e   : > { %v531_v37 = vpop.f32.mrb[0].mxu1 }
 0x30f   : > { %v532_v38 = vadd.f32 %v531_v37, %v459_v36  ;;  %v713_v39 = vpop.f32.mrb[1].mxu1 }
 0x311   : > { %715 = vmatpush3.msk.msra.mxu0 %vm371_vm2, %v532_v38 }
 0x312   : > { %717 = vmatmul.mubr.msk.f32.vlgmr.msra.gmra.mrb[2].mxu0 %vm367_vm3, %v535_v40 }
 0x3e5   : > { %v614_v42 = vpop.f32.mrb[2].mxu0 }
 0x3e6   : > { %v615_v43 = vadd.f32 %v614_v42, %v540_v41  ;;  %v718_v44 = vpop.f32.mrb[3].mxu0 }
 0x3e8   : > { %v695_v45 = vmul.f32 -1.442695, %v615_v43 }
 0x3ea   : > { %736 = vpow2.f32 %v695_v45 }
 0x3f4   : > { %v737_v46 = vpop.eup %736 }
 0x3f5   : > { %v621_v47 = vadd.f32 1.0, %v737_v46 }
 0x3f7   : > { %738 = vrcp.f32 %v621_v47 }
 0x401   : > { %v739_v48 = vpop.eup %738 }
 0x402   : > { %v624_v49 = vmul.f32 %v739_v48, %v615_v43 }
 0x404   : > { %v625_v50 = vmul.f32 %v624_v49, %v532_v38 }
 0x406   : > { %v626_v51 = vadd.f32 %v625_v50, %v817_v0 }
 0x408   : > { %627 = vst.msk [vmem:[%s327_s15] sm:$0xf] %vm331_vm0, %v626_v51 }
 0x409 PF: > { %s19_s30 = sadd.s32 1, %s746_s30  }
 0x40a   : > { %p16_p4 = scmp.ge.s32.totalorder %s19_s30, 10  }
 0x40c   :  { %18 = sbr.rel (!%p16_p4) target bundleno = 1 (0x1), region = 86 }

// kernel: _lambda_.16
= control target key start
LH: loop header
LB: loop body
LE: loop exit
PB: predicated region body
PF: predicated region fallthrough
CT: control target
= control target key end

     0   :  { %s1158_s21 = smov 0   ;;  %s1278_s0 = inlined_call_operand.vmem [shape: f32[32,32], index: 0, kind: input, shape index: {}]   ;;  %s1279_s1 = inlined_call_operand.vmem [shape: f32[1,32], index: 1, kind: input, shape index: {}]   ;;  %s1280_s2 = inlined_call_operand.vmem [shape: f32[1,32], index: 2, kind: input, shape index: {}]   ;;  %s1281_s3 = inlined_call_operand.vmem [shape: f32[32,64], index: 3, kind: input, shape index: {}]   ;;  %s1282_s4 = inlined_call_operand.vmem [shape: f32[1,64], index: 4, kind: input, shape index: {}]   ;;  %s1283_s5 = inlined_call_operand.vmem [shape: f32[64,32], index: 5, kind: input, shape index: {}]   ;;  %s1284_s6 = inlined_call_operand.vmem [shape: f32[1,32], index: 6, kind: input, shape index: {}]   ;;  %s1285_s7 = inlined_call_operand.vmem [shape: f32[32,32], index: 7, kind: input, shape index: {}]   ;;  %s1286_s8 = inlined_call_operand.vmem [shape: f32[1,32], index: 8, kind: input, shape index: {}]   ;;  %s1287_s9 = inlined_call_operand.vmem [shape: f32[1,32], index: 9, kind: input, shape index: {}]   ;;  %s1288_s10 = inlined_call_operand.vmem [shape: f32[1,32], index: 10, kind: input, shape index: {}]   ;;  %s1289_s11 = inlined_call_operand.vmem [shape: f32[32,32], index: 11, kind: output, shape index: {0}]   ;;  %s1290_s12 = inlined_call_operand.vmem [shape: f32[32,32], index: 12, kind: output, shape index: {1}]  }
   0x1 LB: > { %s934_s22 = sadd.s32 4294967295, %s1091_s21   ;;  %p938_p0 = scmp.ge.s32.totalorder %s1091_s21, 1  ;;  %s1091_s21 = sphi %s1158_s21, %s23_s21  }
   0x2   : > { %p366_p1 = scmp.lt.s32.totalorder %s1091_s21, 3 }
   0x4   : > { %p367_p2 = pnand %p938_p0, %p366_p1 }
   0x5   : > { %s939_s23 = sshll.u32 (!%p367_p2), %s934_s22, 1  ;;  %vm435_vm0 = vcmask (!%p367_p2), 261120   ;;  %v479_v14 = vld [vmem:[%s1281_s3] sm:$0xff] (!%p367_p2)  ;;  %v480_v15 = vld [vmem:[%s1281_s3 + $0x8] sm:$0xff] (!%p367_p2)  ;;  %v481_v16 = vld [vmem:[%s1281_s3 + $0x10] sm:$0xff] (!%p367_p2)  ;;  %vm604_vm1 = vcmask (!%p367_p2), 523264  }
   0x6   : > { %370 = sbr.rel (%p367_p2) target bundleno = 1352 (0x548), region = 64  ;;  %p414_p3 = scmp.lt.s32.totalorder (!%p367_p2), %s939_s23, 3  ;;  %v1025_v17 = vpack.c.bf16 (!%p367_p2), %v480_v15, %v479_v14  ;;  %v482_v18 = vld [vmem:[%s1281_s3 + $0x18] sm:$0xff] (!%p367_p2)  ;;  %v945_v27 = vld [vmem:[%s1279_s1] ss:$0 sm:$0xff] (!%p367_p2)  ;;  %v590_v37 = vld [vmem:[%s1283_s5 + $0x8] sm:$0xff] (!%p367_p2) }
   0x7   : > { %v1029_v19 = vpack.c.bf16 (!%p367_p2), %v482_v18, %v481_v16  ;;  %v946_v29 = vld [vmem:[%s1280_s2] ss:$0 sm:$0xff] (!%p367_p2)  ;;  %v591_v38 = vld [vmem:[%s1283_s5 + $0x10] sm:$0xff] (!%p367_p2)  ;;  %v592_v40 = vld [vmem:[%s1283_s5 + $0x18] sm:$0xff] (!%p367_p2) }
   0x8   : > { %1026 = vmatprep.subr.bf16.mxu0 (!%p367_p2), %v1025_v17  ;;  %v589_v36 = vld [vmem:[%s1283_s5] sm:$0xff] (!%p367_p2)  ;;  %v1037_v41 = vpack.c.bf16 (!%p367_p2), %v592_v40, %v591_v38  ;;  %v594_v43 = vld [vmem:[%s1283_s5 + $0x28] sm:$0xff] (!%p367_p2)  ;;  %v595_v45 = vld [vmem:[%s1283_s5 + $0x30] sm:$0xff] (!%p367_p2) }
   0x9   : > { %1028 = vmatpush3.bf16.msra.mxu0 (!%p367_p2), %v1025_v17  ;;  %v1033_v39 = vpack.c.bf16 (!%p367_p2), %v590_v37, %v589_v36  ;;  %v593_v42 = vld [vmem:[%s1283_s5 + $0x20] sm:$0xff] (!%p367_p2)  ;;  %v596_v46 = vld [vmem:[%s1283_s5 + $0x38] sm:$0xff] (!%p367_p2)  ;;  %v687_v49 = vld [vmem:[%s1285_s7 + $0x8] sm:$0xff] (!%p367_p2) }
   0xa   : > { %1030 = vmatprep.subr.bf16.mxu0 (!%p367_p2), %v1029_v19  ;;  %v1041_v44 = vpack.c.bf16 (!%p367_p2), %v594_v43, %v593_v42  ;;  %v1045_v47 = vpack.c.bf16 (!%p367_p2), %v596_v46, %v595_v45  ;;  %v686_v48 = vld [vmem:[%s1285_s7] sm:$0xff] (!%p367_p2) }
   0xb   : > { %1034 = vmatprep.subr.bf16.mxu1 (!%p367_p2), %v1033_v39  ;;  %v1049_v50 = vpack.c.bf16 (!%p367_p2), %v687_v49, %v686_v48  ;;  %v947_v51 = vld [vmem:[%s1282_s4] ss:$0 sm:$0xff] (!%p367_p2) }
   0xc   : > { %1036 = vmatpush3.bf16.msra.mxu1 (!%p367_p2), %v1033_v39  ;;  %v950_v15 = vld [vmem:[%s1284_s6] ss:$0 sm:$0xff] (!%p367_p2) }
   0xd   : > { %s1292_s23 = smov (!%p414_p3, %s939_s23), 3  ;;  %1032 = vmatpush3.bf16.msra.mxu0 %v1029_v19  ;;  %1038 = vmatprep.subr.bf16.mxu1 %v1037_v41 }
   0xe   : > { %s1166_s24 = sshll.u32 %s1292_s23, 3  ;;  %1050 = vmatprep.subr.bf16.mxu0 %v1049_v50 }
   0xf   : > { %s417_s27 = scalar_lea.vmem %s1278_s0, %s1166_s24  ;;  %s423_s23 = scalar_lea.vmem %s1289_s11, %s1166_s24 }
  0x10   : > { %v1172_v0 = vld [vmem:[%s417_s27] sm:$0xff]  ;;  %v1174_v1 = vld [vmem:[%s417_s27 + $0x8] sm:$0xff]  ;;  %1040 = vmatpush3.bf16.msra.mxu1 %v1037_v41  ;;  %s429_s13 = scalar_lea.vmem %s1290_s12, %s1166_s24 }
  0x11   : > { %v436_v2 = vsel %vm435_vm0, %v1172_v0, 0.0  ;;  %v439_v3 = vsel %vm435_vm0, %v1174_v1, 0.0  ;;  %1042 = vmatprep.subr.bf16.mxu1 %v1041_v44 }
  0x12   : > { %437 = vadd.xlane.f32.xlu0 %v436_v2 }
  0x14   : > { %1044 = vmatpush3.bf16.msra.mxu1 %v1041_v44 }
  0x15   : > { %1046 = vmatprep.subr.bf16.mxu1 %v1045_v47 }
  0x16   : > { %440 = vadd.xlane.f32.xlu0 %v439_v3 }
  0x18   : > { %1048 = vmatpush3.bf16.msra.mxu1 %v1045_v47 }
  0x9f   : > { %v438_v4 = vpop.xlane.xlu0 %437 }
  0xa0   : > { %v443_v5 = vmul.f32 0.03125, %v438_v4 }
  0xa2   : > { %v445_v6 = vsub.f32 %v1172_v0, %v443_v5 }
  0xa3   : > { %v441_v7 = vpop.xlane.xlu0 %440 }
  0xa4   : > { %v444_v8 = vmul.f32 0.03125, %v441_v7  ;;  %v447_v9 = vmul.f32 %v445_v6, %v445_v6 }
  0xa6   : > { %v446_v10 = vsub.f32 %v1174_v1, %v444_v8  ;;  %v449_v11 = vsel %vm435_vm0, %v447_v9, 0.0 }
  0xa7   : > { %450 = vadd.xlane.f32.xlu1 %v449_v11 }
  0xa8   : > { %v448_v12 = vmul.f32 %v446_v10, %v446_v10 }
  0xaa   : > { %v452_v13 = vsel %vm435_vm0, %v448_v12, 0.0  ;;  %v688_v12 = vld [vmem:[%s1285_s7 + $0x10] sm:$0xff] }
  0xab   : > { %453 = vadd.xlane.f32.xlu1 %v452_v13  ;;  %v689_v13 = vld [vmem:[%s1285_s7 + $0x18] sm:$0xff] }
  0xac   : > { %v1053_v14 = vpack.c.bf16 %v689_v13, %v688_v12 }
 0x134   : > { %v451_v20 = vpop.xlane.xlu1 %450 }
 0x135   : > { %v455_v21 = vmul.f32 0.03125, %v451_v20  ;;  %v953_v20 = vld [vmem:[%s1286_s8] ss:$0 sm:$0xff] }
 0x137   : > { %v457_v22 = vadd.f32 1e-05, %v455_v21 }
 0x138   : > { %v454_v23 = vpop.xlane.xlu1 %453 }
 0x139   : > { %1065 = vrsqrt.f32 %v457_v22  ;;  %v456_v24 = vmul.f32 0.03125, %v454_v23 }
 0x13b   : > { %v458_v25 = vadd.f32 1e-05, %v456_v24 }
 0x13d   : > { %1067 = vrsqrt.f32 %v458_v25 }
 0x143   : > { %v1066_v26 = vpop.eup %1065 }
 0x144   : > { %v461_v28 = vmul.f32 %v1066_v26, %v445_v6 }
 0x146   : > { %v469_v30 = vmul.f32 %v945_v27, %v461_v28 }
 0x147   : > { %v1068_v31 = vpop.eup %1067 }
 0x148   : > { %v462_v32 = vmul.f32 %v1068_v31, %v446_v10  ;;  %v477_v33 = vadd.f32 %v946_v29, %v469_v30 }
 0x14a   : > { %v470_v34 = vmul.f32 %v945_v27, %v462_v32  ;;  %992 = vmatprep.mubr.msk.f32.mxu0 %vm435_vm0, %v477_v33 }
 0x14c   : > { %v478_v35 = vadd.f32 %v946_v29, %v470_v34 }
 0x14e   : > { %993 = vmatmul.mubr.msk.f32.vlgmr.msra.gmra.mrb[0].mxu0 %vm435_vm0, %v478_v35 }
 0x14f   : > { %1052 = vmatpush3.bf16.msra.mxu0 %v1049_v50 }
 0x150   : > { %1054 = vmatprep.subr.bf16.mxu0 %v1053_v14 }
 0x153   : > { %1056 = vmatpush3.bf16.msra.mxu0 %v1053_v14 }
 0x221   : > { %v994_v52 = vpop.f32.mrb[0].mxu0 }
 0x222   : > { %v568_v53 = vadd.f32 %v994_v52, %v947_v51  ;;  %v562_v54 = vpop.f32.mrb[1].mxu0 }
 0x223   : > { %v563_v55 = vadd.f32 %v947_v51, %v562_v54 }
 0x224   : > { %v574_v56 = vmul.f32 0.044715, %v568_v53  ;;  %v572_v9 = vmul.f32 0.5, %v568_v53 }
 0x225   : > { %v573_v57 = vmul.f32 0.044715, %v563_v55  ;;  %v571_v7 = vmul.f32 0.5, %v563_v55 }
 0x226   : > { %v576_v58 = vmul.f32 %v574_v56, %v568_v53  ;;  %v958_v56 = vld [vmem:[%s1287_s9] ss:$0 sm:$0xff] }
 0x227   : > { %v575_v59 = vmul.f32 %v573_v57, %v563_v55 }
 0x228   : > { %v578_v60 = vmul.f32 %v576_v58, %v568_v53 }
 0x229   : > { %v577_v61 = vmul.f32 %v575_v59, %v563_v55 }
 0x22a   : > { %v580_v62 = vadd.f32 %v578_v60, %v568_v53  ;;  %v959_v60 = vld [vmem:[%s1288_s10] ss:$0 sm:$0xff] }
 0x22b   : > { %v579_v63 = vadd.f32 %v577_v61, %v563_v55 }
 0x22c   : > { %v582_v2 = vmul.f32 0.7978846, %v580_v62 }
 0x22d   : > { %v581_v3 = vmul.f32 0.7978846, %v579_v63 }
 0x22e   : > { %1069 = vtanh.f32 %v582_v2 }
 0x22f   : > { %1071 = vtanh.f32 %v581_v3 }
 0x238   : > { %v1070_v4 = vpop.eup %1069 }
 0x239   : > { %v1072_v5 = vpop.eup %1071  ;;  %v586_v6 = vadd.f32 1.0, %v1070_v4 }
 0x23a   : > { %v585_v8 = vadd.f32 1.0, %v1072_v5 }
 0x23b   : > { %v588_v11 = vmul.f32 %v586_v6, %v572_v9 }
 0x23c   : > { %v587_v10 = vmul.f32 %v585_v8, %v571_v7 }
 0x23e   : > { %1011 = vmatprep.mubr.msk.f32.mxu1 %vm604_vm1, %v587_v10 }
 0x23f   : > { %1012 = vmatmul.mubr.msk.f32.vlgmr.msra.gmra.mrb[0].mxu1 %vm604_vm1, %v588_v11 }
 0x312   : > { %v1013_v16 = vpop.f32.mrb[0].mxu1 }
 0x313   : > { %v677_v17 = vpop.f32.mrb[1].mxu1  ;;  %v683_v19 = vadd.f32 %v1013_v16, %v950_v15 }
 0x314   : > { %v678_v18 = vadd.f32 %v950_v15, %v677_v17 }
 0x316   : > { %1022 = vmatprep.mubr.msk.f32.mxu0 %vm435_vm0, %v678_v18 }
 0x317   : > { %1023 = vmatmul.mubr.msk.f32.vlgmr.msra.gmra.mrb[2].mxu0 %vm435_vm0, %v683_v19 }
 0x3ea   : > { %v1024_v21 = vpop.f32.mrb[2].mxu0 }
 0x3eb   : > { %v775_v22 = vadd.f32 %v1024_v21, %v953_v20  ;;  %v769_v23 = vpop.f32.mrb[3].mxu0 }
 0x3ec   : > { %v770_v24 = vadd.f32 %v953_v20, %v769_v23 }
 0x3ed   : > { %v957_v25 = vmul.f32 -1.442695, %v775_v22 }
 0x3ee   : > { %v956_v26 = vmul.f32 -1.442695, %v770_v24 }
 0x3ef   : > { %1073 = vpow2.f32 %v957_v25 }
 0x3f0   : > { %1075 = vpow2.f32 %v956_v26 }
 0x3f9   : > { %v1074_v27 = vpop.eup %1073 }
 0x3fa   : > { %v1076_v28 = vpop.eup %1075  ;;  %v785_v29 = vadd.f32 1.0, %v1074_v27 }
 0x3fb   : > { %v784_v30 = vadd.f32 1.0, %v1076_v28 }
 0x3fc   : > { %1077 = vrcp.f32 %v785_v29 }
 0x3fd   : > { %1079 = vrcp.f32 %v784_v30 }
 0x406   : > { %v1078_v31 = vpop.eup %1077 }
 0x407   : > { %v1080_v32 = vpop.eup %1079  ;;  %v791_v33 = vmul.f32 %v1078_v31, %v775_v22 }
 0x408   : > { %v790_v34 = vmul.f32 %v1080_v32, %v770_v24 }
 0x409   : > { %v793_v35 = vmul.f32 %v791_v33, %v683_v19 }
 0x40a   : > { %v792_v36 = vmul.f32 %v790_v34, %v678_v18 }
 0x40b   : > { %v795_v37 = vadd.f32 %v793_v35, %v1174_v1 }
 0x40c   : > { %v794_v38 = vadd.f32 %v792_v36, %v1172_v0 }
 0x40d   : > { %v803_v39 = vsel %vm435_vm0, %v795_v37, 0.0  ;;  %797 = vst.msk [vmem:[%s423_s23 + $0x8] sm:$0xff] %vm435_vm0, %v795_v37 }
 0x40e   : > { %804 = vadd.xlane.f32.xlu1 %v803_v39  ;;  %v800_v40 = vsel %vm435_vm0, %v794_v38, 0.0  ;;  %796 = vst.msk [vmem:[%s423_s23] sm:$0xff] %vm435_vm0, %v794_v38 }
 0x40f   : > { %801 = vadd.xlane.f32.xlu0 %v800_v40 }
 0x49b   : > { %v805_v41 = vpop.xlane.xlu1 %804 }
 0x49c   : > { %v807_v42 = vmul.f32 0.03125, %v805_v41  ;;  %v802_v43 = vpop.xlane.xlu0 %801 }
 0x49d   : > { %v806_v44 = vmul.f32 0.03125, %v802_v43 }
 0x49e   : > { %v809_v45 = vsub.f32 %v795_v37, %v807_v42 }
 0x49f   : > { %v808_v46 = vsub.f32 %v794_v38, %v806_v44 }
 0x4a0   : > { %v811_v47 = vmul.f32 %v809_v45, %v809_v45 }
 0x4a1   : > { %v810_v1 = vmul.f32 %v808_v46, %v808_v46 }
 0x4a2   : > { %v815_v0 = vsel %vm435_vm0, %v811_v47, 0.0 }
 0x4a3   : > { %816 = vadd.xlane.f32.xlu1 %v815_v0  ;;  %v812_v48 = vsel %vm435_vm0, %v810_v1, 0.0 }
 0x4a4   : > { %813 = vadd.xlane.f32.xlu0 %v812_v48 }
 0x530   : > { %v817_v49 = vpop.xlane.xlu1 %816 }
 0x531   : > { %v819_v50 = vmul.f32 0.03125, %v817_v49  ;;  %v814_v51 = vpop.xlane.xlu0 %813 }
 0x532   : > { %v818_v52 = vmul.f32 0.03125, %v814_v51 }
 0x533   : > { %v821_v53 = vadd.f32 1e-05, %v819_v50 }
 0x534   : > { %v820_v54 = vadd.f32 1e-05, %v818_v52 }
 0x535   : > { %1081 = vrsqrt.f32 %v821_v53 }
 0x536   : > { %1083 = vrsqrt.f32 %v820_v54 }
 0x53f   : > { %v1082_v55 = vpop.eup %1081 }
 0x540   : > { %v1084_v57 = vpop.eup %1083  ;;  %v825_v58 = vmul.f32 %v1082_v55, %v809_v45 }
 0x541   : > { %v824_v59 = vmul.f32 %v1084_v57, %v808_v46 }
 0x542   : > { %v833_v61 = vmul.f32 %v958_v56, %v825_v58 }
 0x543   : > { %v832_v62 = vmul.f32 %v958_v56, %v824_v59 }
 0x544   : > { %v841_v2 = vadd.f32 %v959_v60, %v833_v61 }
 0x545   : > { %v840_v63 = vadd.f32 %v959_v60, %v832_v62 }
 0x546   : > { %843 = vst.msk [vmem:[%s429_s13 + $0x8] sm:$0xff] %vm435_vm0, %v841_v2 }
 0x547   : > { %842 = vst.msk [vmem:[%s429_s13] sm:$0xff] %vm435_vm0, %v840_v63 }
 0x548 PF: > { %s23_s21 = sadd.s32 1, %s1091_s21  }
 0x549   : > { %p20_p4 = scmp.ge.s32.totalorder %s23_s21, 4  }
 0x54b   :  { %22 = sbr.rel (!%p20_p4) target bundleno = 1 (0x1), region = 106 }

// kernel: _lambda_.19
= control target key start
LH: loop header
LB: loop body
LE: loop exit
PB: predicated region body
PF: predicated region fallthrough
CT: control target
= control target key end

     0   :  { %s404_s12 = smov 0   ;;  %s448_s0 = inlined_call_operand.vmem [shape: f32[16,64], index: 0, kind: input, shape index: {}]   ;;  %s449_s1 = inlined_call_operand.vmem [shape: f32[64,32], index: 1, kind: input, shape index: {}]   ;;  %s450_s2 = inlined_call_operand.vmem [shape: f32[1,32], index: 2, kind: input, shape index: {}]   ;;  %s451_s3 = inlined_call_operand.vmem [shape: f32[16,32], index: 3, kind: output, shape index: {}]  }
   0x1 LB: > { %s311_s13 = sadd.s32 4294967295, %s379_s12   ;;  %p315_p0 = scmp.ge.s32.totalorder %s379_s12, 1  ;;  %s379_s12 = sphi %s404_s12, %s13_s12  }
   0x2   : > { %p136_p1 = scmp.lt.s32.totalorder %s379_s12, 3 }
   0x4   : > { %p137_p2 = pnand %p315_p0, %p136_p1 }
   0x5   : > { %v167_v0 = vld [vmem:[%s449_s1] sm:$0xff] (!%p137_p2)  ;;  %v168_v1 = vld [vmem:[%s449_s1 + $0x8] sm:$0xff] (!%p137_p2)  ;;  %v169_v2 = vld [vmem:[%s449_s1 + $0x10] sm:$0xff] (!%p137_p2)  ;;  %v381_v3 = vmov (!%p137_p2), 0.0|0.0   ;;  %vm382_vm0 = vmmov (!%p137_p2), 0   ;;  %v383_v6 = vmov (!%p137_p2), 0.0  }
   0x6   : > { %140 = sbr.rel (%p137_p2) target bundleno = 238 (0xee), region = 32  ;;  %350 = vmatprep.subr.bf16.mxu0 (!%p137_p2), %v381_v3  ;;  %v351_v4 = vpack.c.bf16 (!%p137_p2), %v168_v1, %v167_v0  ;;  %v170_v5 = vld [vmem:[%s449_s1 + $0x18] sm:$0xff] (!%p137_p2)  ;;  %347 = vmatprep.mubr.msk.f32.mxu0 (!%p137_p2), %vm382_vm0, %v383_v6  ;;  %p158_p3 = scmp.lt.s32.totalorder (!%p137_p2), %s311_s13, 1  ;;  %v171_v8 = vld [vmem:[%s449_s1 + $0x20] sm:$0xff] (!%p137_p2)  ;;  %v172_v9 = vld [vmem:[%s449_s1 + $0x28] sm:$0xff] (!%p137_p2)  ;;  %vm182_vm1 = vcmask (!%p137_p2), 523264  }
   0x7   : > { %v354_v7 = vpack.c.bf16 (!%p137_p2), %v170_v5, %v169_v2  ;;  %v357_v10 = vpack.c.bf16 (!%p137_p2), %v172_v9, %v171_v8  ;;  %v173_v11 = vld [vmem:[%s449_s1 + $0x30] sm:$0xff] (!%p137_p2)  ;;  %v174_v12 = vld [vmem:[%s449_s1 + $0x38] sm:$0xff] (!%p137_p2)  ;;  %v318_v15 = vld [vmem:[%s450_s2] ss:$0 sm:$0xff] (!%p137_p2)  ;;  %vm256_vm2 = vcmask (!%p137_p2), 261120  }
   0x8   : > { %352 = vmatpush3.bf16.msra.mxu0 (!%p137_p2), %v351_v4  ;;  %v360_v13 = vpack.c.bf16 (!%p137_p2), %v174_v12, %v173_v11 }
   0x9   : > { %353 = vmatprep.subr.bf16.mxu0 (!%p137_p2), %v381_v3 }
   0xc   : > { %355 = vmatpush3.bf16.msra.mxu0 (!%p137_p2), %v354_v7 }
   0xd   : > { %s453_s13 = smov (!%p158_p3, %s311_s13), 1  ;;  %356 = vmatprep.subr.bf16.mxu0 %v381_v3 }
   0xe   : > { %s316_s30 = sshll.u32 %s453_s13, 3 }
   0xf   : > { %s161_s6 = scalar_lea.vmem %s448_s0, %s316_s30  ;;  %s165_s11 = scalar_lea.vmem %s451_s3, %s316_s30 }
  0x10   : > { %358 = vmatpush3.bf16.msra.mxu0 %v357_v10  ;;  %v166_v14 = vld [vmem:[%s161_s6] sm:$0xff] }
  0x11   : > { %359 = vmatprep.subr.bf16.mxu0 %v381_v3 }
  0x14   : > { %361 = vmatpush3.bf16.msra.mxu0 %v360_v13 }
  0x17   : > { %348 = vmatmul.mubr.msk.f32.vlgmr.msra.gmra.mrb[0].mxu0 %vm182_vm1, %v166_v14 }
  0xea   : > { %v252_v16 = vpop.f32.mrb[0].mxu0 }
  0xeb   : > { %v253_v17 = vadd.f32 %v318_v15, %v252_v16  ;;  %v349_v18 = vpop.f32.mrb[1].mxu0 }
  0xed   : > { %257 = vst.msk [vmem:[%s165_s11] sm:$0xff] %vm256_vm2, %v253_v17 }
  0xee PF: > { %s13_s12 = sadd.s32 1, %s379_s12  }
  0xef   : > { %p10_p4 = scmp.ge.s32.totalorder %s13_s12, 4  }
  0xf1   :  { %12 = sbr.rel (!%p10_p4) target bundleno = 1 (0x1), region = 62 }

// kernel: _lambda_.18
= control target key start
LH: loop header
LB: loop body
LE: loop exit
PB: predicated region body
PF: predicated region fallthrough
CT: control target
= control target key end

     0   :  { %s915_s27 = smov 0   ;;  %s1003_s0 = inlined_call_operand.vmem [shape: f32[32,32], index: 0, kind: input, shape index: {}]   ;;  %s1004_s1 = inlined_call_operand.vmem [shape: f32[32,32], index: 1, kind: input, shape index: {}]   ;;  %s1005_s2 = inlined_call_operand.vmem [shape: f32[32,64], index: 2, kind: input, shape index: {}]   ;;  %s1006_s3 = inlined_call_operand.vmem [shape: f32[1,64], index: 3, kind: input, shape index: {}]   ;;  %s1007_s4 = inlined_call_operand.vmem [shape: f32[64,32], index: 4, kind: input, shape index: {}]   ;;  %s1008_s5 = inlined_call_operand.vmem [shape: f32[1,32], index: 5, kind: input, shape index: {}]   ;;  %s1009_s6 = inlined_call_operand.vmem [shape: f32[32,32], index: 6, kind: input, shape index: {}]   ;;  %s1010_s7 = inlined_call_operand.vmem [shape: f32[1,32], index: 7, kind: input, shape index: {}]   ;;  %s1011_s8 = inlined_call_operand.vmem [shape: f32[32,32], index: 8, kind: output, shape index: {}]  }
   0x1 LB: > { %s723_s28 = sadd.s32 4294967295, %s868_s27   ;;  %p727_p0 = scmp.ge.s32.totalorder %s868_s27, 1  ;;  %s868_s27 = sphi %s915_s27, %s18_s27  }
   0x2   : > { %p274_p1 = scmp.lt.s32.totalorder %s868_s27, 3 }
   0x4   : > { %p275_p2 = pnand %p727_p0, %p274_p1 }
   0x5   : > { %v333_v0 = vld [vmem:[%s1005_s2] sm:$0xff] (!%p275_p2)  ;;  %v334_v1 = vld [vmem:[%s1005_s2 + $0x8] sm:$0xff] (!%p275_p2)  ;;  %v335_v2 = vld [vmem:[%s1005_s2 + $0x10] sm:$0xff] (!%p275_p2)  ;;  %s728_s13 = sshll.u32 (!%p275_p2), %s723_s28, 1  ;;  %vm344_vm0 = vcmask (!%p275_p2), 261120   ;;  %vm459_vm1 = vcmask (!%p275_p2), 523264  }
   0x6   : > { %278 = sbr.rel (%p275_p2) target bundleno = 723 (0x2d3), region = 52  ;;  %v810_v3 = vpack.c.bf16 (!%p275_p2), %v334_v1, %v333_v0  ;;  %v336_v4 = vld [vmem:[%s1005_s2 + $0x18] sm:$0xff] (!%p275_p2)  ;;  %p314_p3 = scmp.lt.s32.totalorder (!%p275_p2), %s728_s13, 3  ;;  %v444_v8 = vld [vmem:[%s1007_s4] sm:$0xff] (!%p275_p2)  ;;  %v445_v9 = vld [vmem:[%s1007_s4 + $0x8] sm:$0xff] (!%p275_p2) }
   0x7   : > { %v814_v5 = vpack.c.bf16 (!%p275_p2), %v336_v4, %v335_v2  ;;  %v446_v10 = vld [vmem:[%s1007_s4 + $0x10] sm:$0xff] (!%p275_p2)  ;;  %v818_v11 = vpack.c.bf16 (!%p275_p2), %v445_v9, %v444_v8  ;;  %v447_v12 = vld [vmem:[%s1007_s4 + $0x18] sm:$0xff] (!%p275_p2)  ;;  %v448_v14 = vld [vmem:[%s1007_s4 + $0x20] sm:$0xff] (!%p275_p2) }
   0x8   : > { %811 = vmatprep.subr.bf16.mxu0 (!%p275_p2), %v810_v3  ;;  %v822_v13 = vpack.c.bf16 (!%p275_p2), %v447_v12, %v446_v10  ;;  %v449_v15 = vld [vmem:[%s1007_s4 + $0x28] sm:$0xff] (!%p275_p2)  ;;  %v450_v17 = vld [vmem:[%s1007_s4 + $0x30] sm:$0xff] (!%p275_p2)  ;;  %v451_v18 = vld [vmem:[%s1007_s4 + $0x38] sm:$0xff] (!%p275_p2) }
   0x9   : > { %813 = vmatpush3.bf16.msra.mxu0 (!%p275_p2), %v810_v3  ;;  %819 = vmatprep.subr.bf16.mxu1 (!%p275_p2), %v818_v11  ;;  %v826_v16 = vpack.c.bf16 (!%p275_p2), %v449_v15, %v448_v14  ;;  %v830_v19 = vpack.c.bf16 (!%p275_p2), %v451_v18, %v450_v17  ;;  %v541_v20 = vld [vmem:[%s1009_s6] sm:$0xff] (!%p275_p2)  ;;  %v542_v21 = vld [vmem:[%s1009_s6 + $0x8] sm:$0xff] (!%p275_p2)  ;;  %v543_v46 = vld [vmem:[%s1009_s6 + $0x10] sm:$0xff] (!%p275_p2) }
   0xa   : > { %815 = vmatprep.subr.bf16.mxu0 (!%p275_p2), %v814_v5  ;;  %821 = vmatpush3.bf16.msra.mxu1 (!%p275_p2), %v818_v11  ;;  %v834_v22 = vpack.c.bf16 (!%p275_p2), %v542_v21, %v541_v20  ;;  %v734_v23 = vld [vmem:[%s1006_s3] ss:$0 sm:$0xff] (!%p275_p2)  ;;  %v544_v47 = vld [vmem:[%s1009_s6 + $0x18] sm:$0xff] (!%p275_p2) }
   0xb   : > { %823 = vmatprep.subr.bf16.mxu1 (!%p275_p2), %v822_v13  ;;  %v838_v48 = vpack.c.bf16 (!%p275_p2), %v544_v47, %v543_v46  ;;  %v737_v49 = vld [vmem:[%s1008_s5] ss:$0 sm:$0xff] (!%p275_p2) }
   0xc   : > { %v740_v54 = vld [vmem:[%s1010_s7] ss:$0 sm:$0xff] (!%p275_p2) }
   0xd   : > { %s1013_s13 = smov (!%p314_p3, %s728_s13), 3  ;;  %817 = vmatpush3.bf16.msra.mxu0 %v814_v5 }
   0xe   : > { %s935_s16 = sshll.u32 %s1013_s13, 3  ;;  %825 = vmatpush3.bf16.msra.mxu1 %v822_v13  ;;  %835 = vmatprep.subr.bf16.mxu0 %v834_v22 }
   0xf   : > { %s317_s19 = scalar_lea.vmem %s1003_s0, %s935_s16  ;;  %827 = vmatprep.subr.bf16.mxu1 %v826_v16  ;;  %s323_s11 = scalar_lea.vmem %s1004_s1, %s935_s16 }
  0x10   : > { %v331_v6 = vld [vmem:[%s317_s19] sm:$0xff]  ;;  %v332_v7 = vld [vmem:[%s317_s19 + $0x8] sm:$0xff]  ;;  %s329_s14 = scalar_lea.vmem %s1011_s8, %s935_s16 }
  0x11   : > { %777 = vmatprep.mubr.msk.f32.mxu0 %vm344_vm0, %v331_v6  ;;  %v650_v4 = vld [vmem:[%s323_s11 + $0x8] sm:$0xff]  ;;  %v649_v6 = vld [vmem:[%s323_s11] sm:$0xff] }
  0x12   : > { %778 = vmatmul.mubr.msk.f32.vlgmr.msra.gmra.mrb[0].mxu0 %vm344_vm0, %v332_v7  ;;  %829 = vmatpush3.bf16.msra.mxu1 %v826_v16 }
  0x13   : > { %831 = vmatprep.subr.bf16.mxu1 %v830_v19  ;;  %837 = vmatpush3.bf16.msra.mxu0 %v834_v22 }
  0x14   : > { %839 = vmatprep.subr.bf16.mxu0 %v838_v48 }
  0x16   : > { %833 = vmatpush3.bf16.msra.mxu1 %v830_v19 }
  0x17   : > { %841 = vmatpush3.bf16.msra.mxu0 %v838_v48 }
  0xe5   : > { %v779_v24 = vpop.f32.mrb[0].mxu0 }
  0xe6   : > { %v423_v25 = vadd.f32 %v779_v24, %v734_v23  ;;  %v417_v26 = vpop.f32.mrb[1].mxu0 }
  0xe7   : > { %v418_v27 = vadd.f32 %v734_v23, %v417_v26 }
  0xe8   : > { %v429_v28 = vmul.f32 0.044715, %v423_v25  ;;  %v427_v43 = vmul.f32 0.5, %v423_v25 }
  0xe9   : > { %v428_v29 = vmul.f32 0.044715, %v418_v27  ;;  %v426_v41 = vmul.f32 0.5, %v418_v27 }
  0xea   : > { %v431_v30 = vmul.f32 %v429_v28, %v423_v25 }
  0xeb   : > { %v430_v31 = vmul.f32 %v428_v29, %v418_v27 }
  0xec   : > { %v433_v32 = vmul.f32 %v431_v30, %v423_v25 }
  0xed   : > { %v432_v33 = vmul.f32 %v430_v31, %v418_v27 }
  0xee   : > { %v435_v34 = vadd.f32 %v433_v32, %v423_v25 }
  0xef   : > { %v434_v35 = vadd.f32 %v432_v33, %v418_v27 }
  0xf0   : > { %v437_v36 = vmul.f32 0.7978846, %v435_v34 }
  0xf1   : > { %v436_v37 = vmul.f32 0.7978846, %v434_v35 }
  0xf2   : > { %850 = vtanh.f32 %v437_v36 }
  0xf3   : > { %852 = vtanh.f32 %v436_v37 }
  0xfc   : > { %v851_v38 = vpop.eup %850 }
  0xfd   : > { %v853_v39 = vpop.eup %852  ;;  %v441_v40 = vadd.f32 1.0, %v851_v38 }
  0xfe   : > { %v440_v42 = vadd.f32 1.0, %v853_v39 }
  0xff   : > { %v443_v45 = vmul.f32 %v441_v40, %v427_v43 }
 0x100   : > { %v442_v44 = vmul.f32 %v440_v42, %v426_v41 }
 0x102   : > { %796 = vmatprep.mubr.msk.f32.mxu1 %vm459_vm1, %v442_v44 }
 0x103   : > { %797 = vmatmul.mubr.msk.f32.vlgmr.msra.gmra.mrb[0].mxu1 %vm459_vm1, %v443_v45 }
 0x1d6   : > { %v798_v50 = vpop.f32.mrb[0].mxu1 }
 0x1d7   : > { %v532_v51 = vpop.f32.mrb[1].mxu1  ;;  %v538_v53 = vadd.f32 %v798_v50, %v737_v49 }
 0x1d8   : > { %v533_v52 = vadd.f32 %v737_v49, %v532_v51 }
 0x1da   : > { %807 = vmatprep.mubr.msk.f32.mxu0 %vm344_vm0, %v533_v52 }
 0x1db   : > { %808 = vmatmul.mubr.msk.f32.vlgmr.msra.gmra.mrb[2].mxu0 %vm344_vm0, %v538_v53 }
 0x2ae   : > { %v809_v55 = vpop.f32.mrb[2].mxu0 }
 0x2af   : > { %v630_v56 = vadd.f32 %v809_v55, %v740_v54  ;;  %v624_v57 = vpop.f32.mrb[3].mxu0 }
 0x2b0   : > { %v625_v58 = vadd.f32 %v740_v54, %v624_v57 }
 0x2b1   : > { %v744_v59 = vmul.f32 -1.442695, %v630_v56 }
 0x2b2   : > { %v743_v60 = vmul.f32 -1.442695, %v625_v58 }
 0x2b3   : > { %854 = vpow2.f32 %v744_v59 }
 0x2b4   : > { %856 = vpow2.f32 %v743_v60 }
 0x2bd   : > { %v855_v61 = vpop.eup %854 }
 0x2be   : > { %v857_v62 = vpop.eup %856  ;;  %v640_v63 = vadd.f32 1.0, %v855_v61 }
 0x2bf   : > { %v639_v0 = vadd.f32 1.0, %v857_v62 }
 0x2c0   : > { %858 = vrcp.f32 %v640_v63 }
 0x2c1   : > { %860 = vrcp.f32 %v639_v0 }
 0x2ca   : > { %v859_v1 = vpop.eup %858 }
 0x2cb   : > { %v861_v2 = vpop.eup %860  ;;  %v646_v3 = vmul.f32 %v859_v1, %v630_v56 }
 0x2cc   : > { %v645_v5 = vmul.f32 %v861_v2, %v625_v58 }
 0x2cd   : > { %v648_v7 = vmul.f32 %v646_v3, %v538_v53 }
 0x2ce   : > { %v647_v8 = vmul.f32 %v645_v5, %v533_v52 }
 0x2cf   : > { %v652_v9 = vadd.f32 %v650_v4, %v648_v7 }
 0x2d0   : > { %v651_v10 = vadd.f32 %v649_v6, %v647_v8 }
 0x2d1   : > { %654 = vst.msk [vmem:[%s329_s14 + $0x8] sm:$0xff] %vm344_vm0, %v652_v9 }
 0x2d2   : > { %653 = vst.msk [vmem:[%s329_s14] sm:$0xff] %vm344_vm0, %v651_v10 }
 0x2d3 PF: > { %s18_s27 = sadd.s32 1, %s868_s27  }
 0x2d4   : > { %p15_p4 = scmp.ge.s32.totalorder %s18_s27, 4  }
 0x2d6   :  { %17 = sbr.rel (!%p15_p4) target bundleno = 1 (0x1), region = 85 }

// kernel: _lambda_.20
= control target key start
LH: loop header
LB: loop body
LE: loop exit
PB: predicated region body
PF: predicated region fallthrough
CT: control target
= control target key end

     0   :  { %s806_s30 = smov 0   ;;  %s869_s0 = inlined_call_operand.vmem [shape: f32[8,2,32], index: 0, kind: input, shape index: {}]   ;;  %s870_s1 = inlined_call_operand.vmem [shape: f32[1,32], index: 1, kind: input, shape index: {}]   ;;  %s871_s2 = inlined_call_operand.vmem [shape: f32[1,32], index: 2, kind: input, shape index: {}]   ;;  %s872_s3 = inlined_call_operand.vmem [shape: f32[4,2], index: 3, kind: input, shape index: {}]   ;;  %s873_s4 = inlined_call_operand.vmem [shape: f32[4,1], index: 4, kind: input, shape index: {}]   ;;  %s874_s5 = inlined_call_operand.vmem [shape: f32[2,4], index: 5, kind: input, shape index: {}]   ;;  %s875_s6 = inlined_call_operand.vmem [shape: f32[2,1], index: 6, kind: input, shape index: {}]   ;;  %s876_s7 = inlined_call_operand.vmem [shape: f32[2,2], index: 7, kind: input, shape index: {}]   ;;  %s877_s8 = inlined_call_operand.vmem [shape: f32[2,1], index: 8, kind: input, shape index: {}]   ;;  %s878_s9 = inlined_call_operand.vmem [shape: f32[8,2,32], index: 9, kind: output, shape index: {}]  }
   0x1 LB: > { %s685_s10 = sadd.s32 4294967295, %s751_s30   ;;  %p689_p0 = scmp.ge.s32.totalorder %s751_s30, 1  ;;  %s751_s30 = sphi %s806_s30, %s19_s30  }
   0x2   : > { %p286_p1 = scmp.lt.s32.totalorder %s751_s30, 9 }
   0x4   : > { %p287_p2 = pnand %p689_p0, %p286_p1 }
   0x5   : > { %p320_p3 = scmp.lt.s32.totalorder (!%p287_p2), %s685_s10, 7  ;;  %vm331_vm0 = vcmask (!%p287_p2), 254976   ;;  %v753_v7 = vmov (!%p287_p2), 0.0   ;;  %vm754_vm1 = vmmov (!%p287_p2), 0   ;;  %v361_v8 = vld [vmem:[%s873_s4] sm:$0xf] (!%p287_p2) }
   0x6   : > { %290 = sbr.rel (%p287_p2) target bundleno = 1033 (0x409), region = 56  ;;  %709 = vmatprep.subr.mxu0 (!%p287_p2), %v753_v7  ;;  %714 = vmatprep.subr.mxu1 (!%p287_p2), %v753_v7  ;;  %v755_v9 = vmov (!%p287_p2), 0   ;;  %v455_v10 = vld [vmem:[%s875_s6] sm:$0x3] (!%p287_p2)  ;;  %vm371_vm2 = vcmask (!%p287_p2), 1041408   ;;  %vm367_vm3 = vcmask (!%p287_p2), 15360  }
   0x7   : > { %711 = vmatprep.mubr.msk.f32.mxu0 (!%p287_p2), %vm754_vm1, %v753_v7  ;;  %716 = vmatprep.mubr.msk.f32.mxu1 (!%p287_p2), %vm754_vm1, %v753_v7  ;;  %v692_v15 = vld [vmem:[%s870_s1] ss:$0 sm:$0xff] (!%p287_p2)  ;;  %vm465_vm4 = vcmask (!%p287_p2), 1043456   ;;  %vm461_vm5 = vcmask (!%p287_p2), 31744  }
   0x8   : > { %735 = vset.pattern.permute.xlu1 (!%p287_p2), %v755_v9  ;;  %736 = vset.pattern.permute.xlu0 (!%p287_p2), %v755_v9  ;;  %v693_v17 = vld [vmem:[%s871_s2] ss:$0 sm:$0xff] (!%p287_p2) }
   0x9   : > { %364 = vperm.xlu1 (!%p287_p2), %735, %v361_v8   ;;  %v360_v20 = vld [vmem:[%s872_s3] sm:$0xf] (!%p287_p2) }
   0xa   : > { %v454_v34 = vld [vmem:[%s874_s5] sm:$0x3] (!%p287_p2) }
   0xb   : > { %v540_v35 = vld [vmem:[%s877_s8] sm:$0x3] (!%p287_p2) }
   0xc   : > { %v539_v40 = vld [vmem:[%s876_s7] sm:$0x3] (!%p287_p2) }
   0xd   : > { %s880_s10 = smov (!%p320_p3, %s685_s10), 7  ;;  %458 = vperm.xlu1 %735, %v455_v10  }
   0xe   : > { %s690_s11 = sshll.u32 %s880_s10, 1 }
   0xf   : > { %s323_s14 = scalar_lea.vmem %s869_s0, %s690_s11  ;;  %s327_s15 = scalar_lea.vmem %s878_s9, %s690_s11 }
  0x10   : > { %v822_v0 = vld [vmem:[%s323_s14] sm:$0x3] }
  0x11   : > { %v332_v1 = vsel %vm331_vm0, %v822_v0, 0.0 }
  0x12   : > { %333 = vadd.xlane.f32.xlu0 %v332_v1 }
  0x88   : > { %v365_v21 = vpop.permute.xlu1 %364 }
  0x8c   : > { %v459_v36 = vpop.permute.xlu1 %458 }
  0x9f   : > { %v334_v2 = vpop.xlane.xlu0 %333 }
  0xa0   : > { %v336_v3 = vmul.f32 0.03125, %v334_v2 }
  0xa2   : > { %v337_v4 = vsub.f32 %v822_v0, %v336_v3 }
  0xa4   : > { %v338_v5 = vmul.f32 %v337_v4, %v337_v4 }
  0xa6   : > { %v339_v6 = vsel %vm331_vm0, %v338_v5, 0.0 }
  0xa7   : > { %340 = vadd.xlane.f32.xlu0 %v339_v6 }
  0xbd   : > { %543 = vperm.xlu0 %736, %v540_v35  }
 0x134   : > { %v341_v11 = vpop.xlane.xlu0 %340 }
 0x135   : > { %v342_v12 = vmul.f32 0.03125, %v341_v11 }
 0x137   : > { %v343_v13 = vadd.f32 1e-05, %v342_v12 }
 0x139   : > { %737 = vrsqrt.f32 %v343_v13 }
 0x13c   : > { %v544_v41 = vpop.permute.xlu0 %543 }
 0x143   : > { %v738_v14 = vpop.eup %737 }
 0x144   : > { %v345_v16 = vmul.f32 %v738_v14, %v337_v4 }
 0x146   : > { %v352_v18 = vmul.f32 %v692_v15, %v345_v16 }
 0x148   : > { %v359_v19 = vadd.f32 %v693_v17, %v352_v18 }
 0x14a   : > { %710 = vmatpush3.msk.msra.mxu0 %vm371_vm2, %v359_v19 }
 0x14b   : > { %712 = vmatmul.mubr.msk.f32.vlgmr.msra.gmra.mrb[0].mxu0 %vm367_vm3, %v360_v20  ;;  %719 = vmatprep.subr.mxu0 %v753_v7 }
 0x14c   : > { %721 = vmatprep.mubr.msk.f32.mxu0 %vm754_vm1, %v753_v7 }
 0x21e   : > { %v441_v22 = vpop.f32.mrb[0].mxu0 }
 0x21f   : > { %v442_v23 = vadd.f32 %v441_v22, %v365_v21  ;;  %v713_v24 = vpop.f32.mrb[1].mxu0 }
 0x221   : > { %v446_v25 = vmul.f32 0.044715, %v442_v23  ;;  %v445_v31 = vmul.f32 0.5, %v442_v23 }
 0x223   : > { %v447_v26 = vmul.f32 %v446_v25, %v442_v23 }
 0x225   : > { %v448_v27 = vmul.f32 %v447_v26, %v442_v23 }
 0x227   : > { %v449_v28 = vadd.f32 %v448_v27, %v442_v23 }
 0x229   : > { %v450_v29 = vmul.f32 0.7978846, %v449_v28 }
 0x22b   : > { %739 = vtanh.f32 %v450_v29 }
 0x235   : > { %v740_v30 = vpop.eup %739 }
 0x236   : > { %v452_v32 = vadd.f32 1.0, %v740_v30 }
 0x238   : > { %v453_v33 = vmul.f32 %v452_v32, %v445_v31 }
 0x23a   : > { %715 = vmatpush3.msk.msra.mxu1 %vm465_vm4, %v453_v33 }
 0x23b   : > { %717 = vmatmul.mubr.msk.f32.vlgmr.msra.gmra.mrb[0].mxu1 %vm461_vm5, %v454_v34 }
 0x30e   : > { %v535_v37 = vpop.f32.mrb[0].mxu1 }
 0x30f   : > { %v536_v38 = vadd.f32 %v535_v37, %v459_v36  ;;  %v718_v39 = vpop.f32.mrb[1].mxu1 }
 0x311   : > { %720 = vmatpush3.msk.msra.mxu0 %vm371_vm2, %v536_v38 }
 0x312   : > { %722 = vmatmul.mubr.msk.f32.vlgmr.msra.gmra.mrb[2].mxu0 %vm367_vm3, %v539_v40 }
 0x3e5   : > { %v618_v42 = vpop.f32.mrb[2].mxu0 }
 0x3e6   : > { %v619_v43 = vadd.f32 %v618_v42, %v544_v41  ;;  %v723_v44 = vpop.f32.mrb[3].mxu0 }
 0x3e8   : > { %v700_v45 = vmul.f32 -1.442695, %v619_v43 }
 0x3ea   : > { %741 = vpow2.f32 %v700_v45 }
 0x3f4   : > { %v742_v46 = vpop.eup %741 }
 0x3f5   : > { %v625_v47 = vadd.f32 1.0, %v742_v46 }
 0x3f7   : > { %743 = vrcp.f32 %v625_v47 }
 0x401   : > { %v744_v48 = vpop.eup %743 }
 0x402   : > { %v628_v49 = vmul.f32 %v744_v48, %v619_v43 }
 0x404   : > { %v629_v50 = vmul.f32 %v628_v49, %v536_v38 }
 0x406   : > { %v630_v51 = vadd.f32 %v629_v50, %v822_v0 }
 0x408   : > { %631 = vst.msk [vmem:[%s327_s15] sm:$0x3] %vm331_vm0, %v630_v51 }
 0x409 PF: > { %s19_s30 = sadd.s32 1, %s751_s30  }
 0x40a   : > { %p16_p4 = scmp.ge.s32.totalorder %s19_s30, 10  }
 0x40c   :  { %18 = sbr.rel (!%p16_p4) target bundleno = 1 (0x1), region = 86 }

// kernel: _lambda_.21
= control target key start
LH: loop header
LB: loop body
LE: loop exit
PB: predicated region body
PF: predicated region fallthrough
CT: control target
= control target key end

     0   :  { %s1044_s21 = smov 0   ;;  %s1154_s0 = inlined_call_operand.vmem [shape: f32[16,32], index: 0, kind: input, shape index: {}]   ;;  %s1155_s1 = inlined_call_operand.vmem [shape: f32[1,32], index: 1, kind: input, shape index: {}]   ;;  %s1156_s2 = inlined_call_operand.vmem [shape: f32[1,32], index: 2, kind: input, shape index: {}]   ;;  %s1157_s3 = inlined_call_operand.vmem [shape: f32[32,64], index: 3, kind: input, shape index: {}]   ;;  %s1158_s4 = inlined_call_operand.vmem [shape: f32[1,64], index: 4, kind: input, shape index: {}]   ;;  %s1159_s5 = inlined_call_operand.vmem [shape: f32[64,32], index: 5, kind: input, shape index: {}]   ;;  %s1160_s6 = inlined_call_operand.vmem [shape: f32[1,32], index: 6, kind: input, shape index: {}]   ;;  %s1161_s7 = inlined_call_operand.vmem [shape: f32[32,32], index: 7, kind: input, shape index: {}]   ;;  %s1162_s8 = inlined_call_operand.vmem [shape: f32[1,32], index: 8, kind: input, shape index: {}]   ;;  %s1163_s9 = inlined_call_operand.vmem [shape: f32[1,32], index: 9, kind: input, shape index: {}]   ;;  %s1164_s10 = inlined_call_operand.vmem [shape: f32[1,32], index: 10, kind: input, shape index: {}]   ;;  %s1165_s11 = inlined_call_operand.vmem [shape: f32[16,32], index: 11, kind: output, shape index: {0}]   ;;  %s1166_s12 = inlined_call_operand.vmem [shape: f32[16,32], index: 12, kind: output, shape index: {1}]  }
   0x1 LB: > { %s842_s22 = sadd.s32 4294967295, %s974_s21   ;;  %p846_p0 = scmp.ge.s32.totalorder %s974_s21, 1  ;;  %s974_s21 = sphi %s1044_s21, %s23_s21  }
   0x2   : > { %p364_p1 = scmp.lt.s32.totalorder %s974_s21, 3 }
   0x4   : > { %p365_p2 = pnand %p846_p0, %p364_p1 }
   0x5   : > { %p408_p3 = scmp.lt.s32.totalorder (!%p365_p2), %s842_s22, 1  ;;  %vm423_vm0 = vcmask (!%p365_p2), 261120   ;;  %v452_v7 = vld [vmem:[%s1157_s3] sm:$0xff] (!%p365_p2)  ;;  %v453_v8 = vld [vmem:[%s1157_s3 + $0x8] sm:$0xff] (!%p365_p2)  ;;  %v454_v9 = vld [vmem:[%s1157_s3 + $0x10] sm:$0xff] (!%p365_p2)  ;;  %v976_v10 = vmov (!%p365_p2), 0.0|0.0  }
   0x6   : > { %368 = sbr.rel (%p365_p2) target bundleno = 1343 (0x53f), region = 64  ;;  %923 = vmatprep.subr.bf16.mxu0 (!%p365_p2), %v976_v10  ;;  %v924_v11 = vpack.c.bf16 (!%p365_p2), %v453_v8, %v452_v7  ;;  %v455_v12 = vld [vmem:[%s1157_s3 + $0x18] sm:$0xff] (!%p365_p2)  ;;  %vm977_vm1 = vmmov (!%p365_p2), 0   ;;  %v978_v13 = vmov (!%p365_p2), 0.0   ;;  %929 = vmatprep.subr.bf16.mxu1 (!%p365_p2), %v976_v10  ;;  %v850_v19 = vld [vmem:[%s1155_s1] ss:$0 sm:$0xff] (!%p365_p2) }
   0x7   : > { %890 = vmatprep.mubr.msk.f32.mxu0 (!%p365_p2), %vm977_vm1, %v978_v13  ;;  %909 = vmatprep.mubr.msk.f32.mxu1 (!%p365_p2), %vm977_vm1, %v978_v13  ;;  %v927_v14 = vpack.c.bf16 (!%p365_p2), %v455_v12, %v454_v9  ;;  %v851_v21 = vld [vmem:[%s1156_s2] ss:$0 sm:$0xff] (!%p365_p2)  ;;  %v546_v25 = vld [vmem:[%s1159_s5 + $0x8] sm:$0xff] (!%p365_p2)  ;;  %v547_v26 = vld [vmem:[%s1159_s5 + $0x10] sm:$0xff] (!%p365_p2)  ;;  %vm560_vm2 = vcmask (!%p365_p2), 523264  }
   0x8   : > { %925 = vmatpush3.bf16.msra.mxu0 (!%p365_p2), %v924_v11  ;;  %v545_v24 = vld [vmem:[%s1159_s5] sm:$0xff] (!%p365_p2)  ;;  %v548_v28 = vld [vmem:[%s1159_s5 + $0x18] sm:$0xff] (!%p365_p2)  ;;  %v550_v31 = vld [vmem:[%s1159_s5 + $0x28] sm:$0xff] (!%p365_p2) }
   0x9   : > { %926 = vmatprep.subr.bf16.mxu0 (!%p365_p2), %v976_v10  ;;  %v930_v27 = vpack.c.bf16 (!%p365_p2), %v546_v25, %v545_v24  ;;  %v933_v29 = vpack.c.bf16 (!%p365_p2), %v548_v28, %v547_v26  ;;  %v549_v30 = vld [vmem:[%s1159_s5 + $0x20] sm:$0xff] (!%p365_p2)  ;;  %v551_v33 = vld [vmem:[%s1159_s5 + $0x30] sm:$0xff] (!%p365_p2)  ;;  %v552_v34 = vld [vmem:[%s1159_s5 + $0x38] sm:$0xff] (!%p365_p2) }
   0xa   : > { %v936_v32 = vpack.c.bf16 (!%p365_p2), %v550_v31, %v549_v30  ;;  %v939_v35 = vpack.c.bf16 (!%p365_p2), %v552_v34, %v551_v33  ;;  %v634_v36 = vld [vmem:[%s1161_s7] sm:$0xff] (!%p365_p2)  ;;  %v635_v37 = vld [vmem:[%s1161_s7 + $0x8] sm:$0xff] (!%p365_p2)  ;;  %v636_v52 = vld [vmem:[%s1161_s7 + $0x10] sm:$0xff] (!%p365_p2) }
   0xb   : > { %931 = vmatpush3.bf16.msra.mxu1 (!%p365_p2), %v930_v27  ;;  %v942_v38 = vpack.c.bf16 (!%p365_p2), %v635_v37, %v634_v36  ;;  %v852_v39 = vld [vmem:[%s1158_s4] ss:$0 sm:$0xff] (!%p365_p2)  ;;  %v637_v53 = vld [vmem:[%s1161_s7 + $0x18] sm:$0xff] (!%p365_p2) }
   0xc   : > { %928 = vmatpush3.bf16.msra.mxu0 (!%p365_p2), %v927_v14  ;;  %932 = vmatprep.subr.bf16.mxu1 (!%p365_p2), %v976_v10  ;;  %v945_v54 = vpack.c.bf16 (!%p365_p2), %v637_v53, %v636_v52  ;;  %v854_v55 = vld [vmem:[%s1160_s6] ss:$0 sm:$0xff] (!%p365_p2) }
   0xd   : > { %s1168_s22 = smov (!%p408_p3, %s842_s22), 1  ;;  %941 = vmatprep.subr.bf16.mxu0 %v976_v10  ;;  %v856_v59 = vld [vmem:[%s1162_s8] ss:$0 sm:$0xff] }
   0xe   : > { %s1052_s23 = sshll.u32 %s1168_s22, 3 }
   0xf   : > { %s411_s26 = scalar_lea.vmem %s1154_s0, %s1052_s23  ;;  %934 = vmatpush3.bf16.msra.mxu1 %v933_v29  ;;  %s415_s22 = scalar_lea.vmem %s1165_s11, %s1052_s23 }
  0x10   : > { %v1058_v0 = vld [vmem:[%s411_s26] sm:$0xff]  ;;  %935 = vmatprep.subr.bf16.mxu1 %v976_v10  ;;  %s419_s30 = scalar_lea.vmem %s1166_s12, %s1052_s23 }
  0x11   : > { %v424_v1 = vsel %vm423_vm0, %v1058_v0, 0.0 }
  0x12   : > { %425 = vadd.xlane.f32.xlu0 %v424_v1 }
  0x13   : > { %937 = vmatpush3.bf16.msra.mxu1 %v936_v32 }
  0x14   : > { %938 = vmatprep.subr.bf16.mxu1 %v976_v10 }
  0x17   : > { %940 = vmatpush3.bf16.msra.mxu1 %v939_v35 }
  0x9f   : > { %v426_v2 = vpop.xlane.xlu0 %425 }
  0xa0   : > { %v428_v3 = vmul.f32 0.03125, %v426_v2 }
  0xa2   : > { %v429_v4 = vsub.f32 %v1058_v0, %v428_v3 }
  0xa4   : > { %v430_v5 = vmul.f32 %v429_v4, %v429_v4 }
  0xa6   : > { %v431_v6 = vsel %vm423_vm0, %v430_v5, 0.0 }
  0xa7   : > { %432 = vadd.xlane.f32.xlu0 %v431_v6 }
 0x134   : > { %v433_v15 = vpop.xlane.xlu0 %432 }
 0x135   : > { %v434_v16 = vmul.f32 0.03125, %v433_v15 }
 0x137   : > { %v435_v17 = vadd.f32 1e-05, %v434_v16 }
 0x139   : > { %958 = vrsqrt.f32 %v435_v17 }
 0x143   : > { %v959_v18 = vpop.eup %958 }
 0x144   : > { %v437_v20 = vmul.f32 %v959_v18, %v429_v4  ;;  %v860_v18 = vld [vmem:[%s1164_s10] ss:$0 sm:$0xff] }
 0x146   : > { %v444_v22 = vmul.f32 %v850_v19, %v437_v20 }
 0x148   : > { %v451_v23 = vadd.f32 %v851_v21, %v444_v22 }
 0x14a   : > { %891 = vmatmul.mubr.msk.f32.vlgmr.msra.gmra.mrb[0].mxu0 %vm423_vm0, %v451_v23 }
 0x14b   : > { %920 = vmatprep.mubr.msk.f32.mxu0 %vm977_vm1, %v978_v13  ;;  %943 = vmatpush3.bf16.msra.mxu0 %v942_v38 }
 0x14c   : > { %944 = vmatprep.subr.bf16.mxu0 %v976_v10 }
 0x14f   : > { %946 = vmatpush3.bf16.msra.mxu0 %v945_v54 }
 0x21d   : > { %v532_v40 = vpop.f32.mrb[0].mxu0 }
 0x21e   : > { %v533_v41 = vadd.f32 %v852_v39, %v532_v40  ;;  %v892_v42 = vpop.f32.mrb[1].mxu0 }
 0x220   : > { %v537_v43 = vmul.f32 0.044715, %v533_v41  ;;  %v536_v49 = vmul.f32 0.5, %v533_v41 }
 0x222   : > { %v538_v44 = vmul.f32 %v537_v43, %v533_v41 }
 0x224   : > { %v539_v45 = vmul.f32 %v538_v44, %v533_v41 }
 0x226   : > { %v540_v46 = vadd.f32 %v539_v45, %v533_v41 }
 0x228   : > { %v541_v47 = vmul.f32 0.7978846, %v540_v46 }
 0x22a   : > { %960 = vtanh.f32 %v541_v47 }
 0x234   : > { %v961_v48 = vpop.eup %960 }
 0x235   : > { %v543_v50 = vadd.f32 1.0, %v961_v48 }
 0x237   : > { %v544_v51 = vmul.f32 %v543_v50, %v536_v49 }
 0x239   : > { %910 = vmatmul.mubr.msk.f32.vlgmr.msra.gmra.mrb[0].mxu1 %vm560_vm2, %v544_v51 }
 0x30c   : > { %v630_v56 = vpop.f32.mrb[0].mxu1 }
 0x30d   : > { %v631_v57 = vadd.f32 %v854_v55, %v630_v56  ;;  %v911_v58 = vpop.f32.mrb[1].mxu1 }
 0x30f   : > { %921 = vmatmul.mubr.msk.f32.vlgmr.msra.gmra.mrb[2].mxu0 %vm423_vm0, %v631_v57 }
 0x3e2   : > { %v714_v60 = vpop.f32.mrb[2].mxu0 }
 0x3e3   : > { %v715_v61 = vadd.f32 %v856_v59, %v714_v60  ;;  %v922_v62 = vpop.f32.mrb[3].mxu0 }
 0x3e5   : > { %v858_v63 = vmul.f32 -1.442695, %v715_v61 }
 0x3e7   : > { %962 = vpow2.f32 %v858_v63 }
 0x3f1   : > { %v963_v1 = vpop.eup %962 }
 0x3f2   : > { %v721_v2 = vadd.f32 1.0, %v963_v1 }
 0x3f4   : > { %964 = vrcp.f32 %v721_v2 }
 0x3fe   : > { %v965_v3 = vpop.eup %964 }
 0x3ff   : > { %v724_v4 = vmul.f32 %v965_v3, %v715_v61 }
 0x401   : > { %v725_v5 = vmul.f32 %v724_v4, %v631_v57 }
 0x403   : > { %v726_v6 = vadd.f32 %v725_v5, %v1058_v0  ;;  %v859_v0 = vld [vmem:[%s1163_s9] ss:$0 sm:$0xff] }
 0x405   : > { %v730_v7 = vsel %vm423_vm0, %v726_v6, 0.0  ;;  %727 = vst.msk [vmem:[%s415_s22] sm:$0xff] %vm423_vm0, %v726_v6 }
 0x406   : > { %731 = vadd.xlane.f32.xlu1 %v730_v7 }
 0x493   : > { %v732_v8 = vpop.xlane.xlu1 %731 }
 0x494   : > { %v733_v9 = vmul.f32 0.03125, %v732_v8 }
 0x496   : > { %v734_v10 = vsub.f32 %v726_v6, %v733_v9 }
 0x498   : > { %v735_v11 = vmul.f32 %v734_v10, %v734_v10 }
 0x49a   : > { %v736_v12 = vsel %vm423_vm0, %v735_v11, 0.0 }
 0x49b   : > { %737 = vadd.xlane.f32.xlu1 %v736_v12 }
 0x528   : > { %v738_v13 = vpop.xlane.xlu1 %737 }
 0x529   : > { %v739_v14 = vmul.f32 0.03125, %v738_v13 }
 0x52b   : > { %v740_v15 = vadd.f32 1e-05, %v739_v14 }
 0x52d   : > { %966 = vrsqrt.f32 %v740_v15 }
 0x537   : > { %v967_v16 = vpop.eup %966 }
 0x538   : > { %v742_v17 = vmul.f32 %v967_v16, %v734_v10 }
 0x53a   : > { %v749_v19 = vmul.f32 %v859_v0, %v742_v17 }
 0x53c   : > { %v756_v20 = vadd.f32 %v860_v18, %v749_v19 }
 0x53e   : > { %757 = vst.msk [vmem:[%s419_s30] sm:$0xff] %vm423_vm0, %v756_v20 }
 0x53f PF: > { %s23_s21 = sadd.s32 1, %s974_s21  }
 0x540   : > { %p20_p4 = scmp.ge.s32.totalorder %s23_s21, 4  }
 0x542   :  { %22 = sbr.rel (!%p20_p4) target bundleno = 1 (0x1), region = 106 }

// kernel: _lambda_.22
= control target key start
LH: loop header
LB: loop body
LE: loop exit
PB: predicated region body
PF: predicated region fallthrough
CT: control target
= control target key end

     0   :  { %s411_s9 = smov 0   ;;  %s413_s10 = smov 0   ;;  %s444_s0 = inlined_call_operand.vmem [shape: f32[4,4], index: 0, kind: input, shape index: {}]   ;;  %s445_s1 = inlined_call_operand.vmem [shape: f32[2,4,64], index: 1, kind: input, shape index: {}]   ;;  %s446_s2 = inlined_call_operand.vmem [shape: f32[2,4,64], index: 2, kind: output, shape index: {}]  }
   0x1   :  { %s415_s11 = smov 0  }
   0x2 LB: > { %s24_s12 = sadd.s32 1, %s388_s10  ;;  %p330_p0 = scmp.ge.s32.totalorder %s392_s11, 1  ;;  %s392_s11 = sphi %s415_s11, %s12_s11   ;;  %s388_s10 = sphi %s413_s10, %s448_s10   ;;  %s384_s9 = sphi %s411_s9, %s447_s9  }
   0x3   : > { %p26_p1 = scmp.ge.s32.totalorder %s24_s12, 2  ;;  %p130_p2 = scmp.lt.s32.totalorder %s392_s11, 3 }
   0x5   : > { %s450_s12 = smov (%p26_p1, %s24_s12), 0  ;;  %p131_p3 = pnand %p330_p0, %p130_p2 }
   0x6   : > { %p156_p4 = scmp.lt.s32.totalorder (!%p131_p3), %s384_s9, 1  ;;  %v394_v0 = vmov (!%p131_p3), 0.0   ;;  %vm395_vm0 = vmmov (!%p131_p3), 0   ;;  %vm176_vm1 = vcmask (!%p131_p3), 1043456   ;;  %v170_v1 = vld [vmem:[%s444_s0] sm:$0xf] (!%p131_p3) }
   0x7   : > { %134 = sbr.rel (%p131_p3) target bundleno = 232 (0xe8), region = 28  ;;  %339 = vmatprep.subr.mxu0 (!%p131_p3), %v394_v0  ;;  %341 = vmatprep.mubr.msk.f32.mxu0 (!%p131_p3), %vm395_vm0, %v394_v0  ;;  %vm172_vm2 = vcmask (!%p131_p3), 31744   ;;  %vm250_vm3 = vcmask (!%p131_p3), 519168  }
   0xe   : > { %s452_s9 = smov (!%p156_p4, %s384_s9), 1 }
   0xf   : > { %s331_s13 = sshll.u32 %s452_s9, 2 }
  0x10   : > { %s162_s16 = scalar_lea.vmem %s445_s1, %s331_s13  ;;  %s169_s21 = scalar_lea.vmem %s446_s2, %s331_s13 }
  0x11   : > { %v171_v2 = vld [vmem:[%s162_s16] sm:$0xf] }
  0x12   : > { %340 = vmatpush3.msk.msra.mxu0 %vm176_vm1, %v171_v2 }
  0x13   : > { %342 = vmatmul.mubr.msk.f32.vlgmr.msra.gmra.mrb[0].mxu0 %vm172_vm2, %v170_v1 }
  0xe6   : > { %v246_v3 = vpop.f32.mrb[0].mxu0 }
  0xe7   : > { %251 = vst.msk [vmem:[%s169_s21] sm:$0xf] %vm250_vm3, %v246_v3  ;;  %v343_v4 = vpop.f32.mrb[1].mxu0 }
  0xe8 PF: > { %s12_s11 = sadd.s32 1, %s392_s11   ;;  %s447_s9 = smov %s388_s10 }
  0xe9   : > { %p9_p5 = scmp.ge.s32.totalorder %s12_s11, 4   ;;  %s448_s10 = smov %s450_s12 }
  0xeb   :  { %11 = sbr.rel (!%p9_p5) target bundleno = 2 (0x2), region = 58 }

// kernel: _lambda_.24
= control target key start
LH: loop header
LB: loop body
LE: loop exit
PB: predicated region body
PF: predicated region fallthrough
CT: control target
= control target key end

     0   :  { %v155_v0 = vmov 0.0|0.0   ;;  %vm156_vm0 = vmmov 0   ;;  %v157_v4 = vmov 0.0   ;;  %vm30_vm1 = vcmask 523264   ;;  %s211_s1 = inlined_call_operand.vmem [shape: f32[64,32], index: 1, kind: input, shape index: {}]   ;;  %s212_s0 = inlined_call_operand.vmem [shape: f32[8,64], index: 0, kind: input, shape index: {}]   ;;  %s213_s2 = inlined_call_operand.vmem [shape: f32[1,32], index: 2, kind: input, shape index: {}]   ;;  %s214_s3 = inlined_call_operand.vmem [shape: f32[8,32], index: 3, kind: output, shape index: {}]  }
   0x1   :  { %140 = vmatprep.subr.bf16.mxu0 %v155_v0  ;;  %v15_v1 = vld [vmem:[%s211_s1] sm:$0xff]  ;;  %v16_v2 = vld [vmem:[%s211_s1 + $0x8] sm:$0xff]  ;;  %v17_v3 = vld [vmem:[%s211_s1 + $0x10] sm:$0xff]  ;;  %137 = vmatprep.mubr.msk.f32.mxu0 %vm156_vm0, %v157_v4  ;;  %vm104_vm2 = vcmask 261120  }
   0x2   :  { %v141_v5 = vpack.c.bf16 %v16_v2, %v15_v1  ;;  %v18_v6 = vld [vmem:[%s211_s1 + $0x18] sm:$0xff]  ;;  %v19_v8 = vld [vmem:[%s211_s1 + $0x20] sm:$0xff]  ;;  %v20_v9 = vld [vmem:[%s211_s1 + $0x28] sm:$0xff] }
   0x3   :  { %v144_v7 = vpack.c.bf16 %v18_v6, %v17_v3  ;;  %v147_v10 = vpack.c.bf16 %v20_v9, %v19_v8  ;;  %v21_v11 = vld [vmem:[%s211_s1 + $0x30] sm:$0xff]  ;;  %v22_v12 = vld [vmem:[%s211_s1 + $0x38] sm:$0xff]  ;;  %v14_v14 = vld [vmem:[%s212_s0] sm:$0xff] }
   0x4   :  { %142 = vmatpush3.bf16.msra.mxu0 %v141_v5  ;;  %v150_v13 = vpack.c.bf16 %v22_v12, %v21_v11  ;;  %v110_v15 = vld [vmem:[%s213_s2] ss:$0 sm:$0xff] }
   0x5   :  { %143 = vmatprep.subr.bf16.mxu0 %v155_v0 }
   0x8   :  { %145 = vmatpush3.bf16.msra.mxu0 %v144_v7 }
   0x9   :  { %146 = vmatprep.subr.bf16.mxu0 %v155_v0 }
   0xc   :  { %148 = vmatpush3.bf16.msra.mxu0 %v147_v10 }
   0xd   :  { %149 = vmatprep.subr.bf16.mxu0 %v155_v0 }
  0x10   :  { %151 = vmatpush3.bf16.msra.mxu0 %v150_v13 }
  0x13   :  { %138 = vmatmul.mubr.msk.f32.vlgmr.msra.gmra.mrb[0].mxu0 %vm30_vm1, %v14_v14 }
  0xe6   :  { %v100_v16 = vpop.f32.mrb[0].mxu0 }
  0xe7   :  { %v101_v17 = vadd.f32 %v110_v15, %v100_v16  ;;  %v139_v18 = vpop.f32.mrb[1].mxu0 }
  0xe9   :  { %105 = vst.msk [vmem:[%s214_s3] sm:$0xff] %vm104_vm2, %v101_v17 }

// kernel: _lambda_.23
= control target key start
LH: loop header
LB: loop body
LE: loop exit
PB: predicated region body
PF: predicated region fallthrough
CT: control target
= control target key end

     0   :  { %s836_s27 = smov 0   ;;  %s924_s0 = inlined_call_operand.vmem [shape: f32[16,32], index: 0, kind: input, shape index: {}]   ;;  %s925_s1 = inlined_call_operand.vmem [shape: f32[16,32], index: 1, kind: input, shape index: {}]   ;;  %s926_s2 = inlined_call_operand.vmem [shape: f32[32,64], index: 2, kind: input, shape index: {}]   ;;  %s927_s3 = inlined_call_operand.vmem [shape: f32[1,64], index: 3, kind: input, shape index: {}]   ;;  %s928_s4 = inlined_call_operand.vmem [shape: f32[64,32], index: 4, kind: input, shape index: {}]   ;;  %s929_s5 = inlined_call_operand.vmem [shape: f32[1,32], index: 5, kind: input, shape index: {}]   ;;  %s930_s6 = inlined_call_operand.vmem [shape: f32[32,32], index: 6, kind: input, shape index: {}]   ;;  %s931_s7 = inlined_call_operand.vmem [shape: f32[1,32], index: 7, kind: input, shape index: {}]   ;;  %s932_s8 = inlined_call_operand.vmem [shape: f32[16,32], index: 8, kind: output, shape index: {}]  }
   0x1 LB: > { %s662_s28 = sadd.s32 4294967295, %s786_s27   ;;  %p666_p0 = scmp.ge.s32.totalorder %s786_s27, 1  ;;  %s786_s27 = sphi %s836_s27, %s18_s27  }
   0x2   : > { %p270_p1 = scmp.lt.s32.totalorder %s786_s27, 3 }
   0x4   : > { %p271_p2 = pnand %p666_p0, %p270_p1 }
   0x5   : > { %v319_v0 = vld [vmem:[%s926_s2] sm:$0xff] (!%p271_p2)  ;;  %v320_v1 = vld [vmem:[%s926_s2 + $0x8] sm:$0xff] (!%p271_p2)  ;;  %v321_v2 = vld [vmem:[%s926_s2 + $0x10] sm:$0xff] (!%p271_p2)  ;;  %v788_v3 = vmov (!%p271_p2), 0.0|0.0   ;;  %vm789_vm0 = vmmov (!%p271_p2), 0   ;;  %v790_v6 = vmov (!%p271_p2), 0.0  }
   0x6   : > { %274 = sbr.rel (%p271_p2) target bundleno = 717 (0x2cd), region = 52  ;;  %739 = vmatprep.subr.bf16.mxu0 (!%p271_p2), %v788_v3  ;;  %v740_v4 = vpack.c.bf16 (!%p271_p2), %v320_v1, %v319_v0  ;;  %v322_v5 = vld [vmem:[%s926_s2 + $0x18] sm:$0xff] (!%p271_p2)  ;;  %706 = vmatprep.mubr.msk.f32.mxu0 (!%p271_p2), %vm789_vm0, %v790_v6  ;;  %p306_p3 = scmp.lt.s32.totalorder (!%p271_p2), %s662_s28, 1  ;;  %vm330_vm1 = vcmask (!%p271_p2), 261120   ;;  %v413_v9 = vld [vmem:[%s928_s4] sm:$0xff] (!%p271_p2)  ;;  %v414_v10 = vld [vmem:[%s928_s4 + $0x8] sm:$0xff] (!%p271_p2) }
   0x7   : > { %745 = vmatprep.subr.bf16.mxu1 (!%p271_p2), %v788_v3  ;;  %725 = vmatprep.mubr.msk.f32.mxu1 (!%p271_p2), %vm789_vm0, %v790_v6  ;;  %v743_v7 = vpack.c.bf16 (!%p271_p2), %v322_v5, %v321_v2  ;;  %v415_v11 = vld [vmem:[%s928_s4 + $0x10] sm:$0xff] (!%p271_p2)  ;;  %v746_v12 = vpack.c.bf16 (!%p271_p2), %v414_v10, %v413_v9  ;;  %v416_v13 = vld [vmem:[%s928_s4 + $0x18] sm:$0xff] (!%p271_p2)  ;;  %v417_v15 = vld [vmem:[%s928_s4 + $0x20] sm:$0xff] (!%p271_p2)  ;;  %vm428_vm2 = vcmask (!%p271_p2), 523264  }
   0x8   : > { %741 = vmatpush3.bf16.msra.mxu0 (!%p271_p2), %v740_v4  ;;  %v749_v14 = vpack.c.bf16 (!%p271_p2), %v416_v13, %v415_v11  ;;  %v418_v16 = vld [vmem:[%s928_s4 + $0x28] sm:$0xff] (!%p271_p2)  ;;  %v419_v18 = vld [vmem:[%s928_s4 + $0x30] sm:$0xff] (!%p271_p2)  ;;  %v420_v19 = vld [vmem:[%s928_s4 + $0x38] sm:$0xff] (!%p271_p2) }
   0x9   : > { %742 = vmatprep.subr.bf16.mxu0 (!%p271_p2), %v788_v3  ;;  %747 = vmatpush3.bf16.msra.mxu1 (!%p271_p2), %v746_v12  ;;  %v752_v17 = vpack.c.bf16 (!%p271_p2), %v418_v16, %v417_v15  ;;  %v755_v20 = vpack.c.bf16 (!%p271_p2), %v420_v19, %v419_v18  ;;  %v502_v21 = vld [vmem:[%s930_s6] sm:$0xff] (!%p271_p2)  ;;  %v503_v22 = vld [vmem:[%s930_s6 + $0x8] sm:$0xff] (!%p271_p2)  ;;  %v504_v37 = vld [vmem:[%s930_s6 + $0x10] sm:$0xff] (!%p271_p2) }
   0xa   : > { %748 = vmatprep.subr.bf16.mxu1 (!%p271_p2), %v788_v3  ;;  %v758_v23 = vpack.c.bf16 (!%p271_p2), %v503_v22, %v502_v21  ;;  %v670_v24 = vld [vmem:[%s927_s3] ss:$0 sm:$0xff] (!%p271_p2)  ;;  %v505_v38 = vld [vmem:[%s930_s6 + $0x18] sm:$0xff] (!%p271_p2) }
   0xb   : > { %v761_v39 = vpack.c.bf16 (!%p271_p2), %v505_v38, %v504_v37  ;;  %v672_v40 = vld [vmem:[%s929_s5] ss:$0 sm:$0xff] (!%p271_p2) }
   0xc   : > { %744 = vmatpush3.bf16.msra.mxu0 (!%p271_p2), %v743_v7  ;;  %v674_v44 = vld [vmem:[%s931_s7] ss:$0 sm:$0xff] (!%p271_p2) }
   0xd   : > { %s934_s28 = smov (!%p306_p3, %s662_s28), 1  ;;  %757 = vmatprep.subr.bf16.mxu0 %v788_v3  ;;  %750 = vmatpush3.bf16.msra.mxu1 %v749_v14 }
   0xe   : > { %s858_s15 = sshll.u32 %s934_s28, 3  ;;  %751 = vmatprep.subr.bf16.mxu1 %v788_v3 }
   0xf   : > { %s309_s18 = scalar_lea.vmem %s924_s0, %s858_s15  ;;  %s313_s10 = scalar_lea.vmem %s925_s1, %s858_s15 }
  0x10   : > { %v318_v8 = vld [vmem:[%s309_s18] sm:$0xff]  ;;  %s317_s13 = scalar_lea.vmem %s932_s8, %s858_s15 }
  0x11   : > { %707 = vmatmul.mubr.msk.f32.vlgmr.msra.gmra.mrb[0].mxu0 %vm330_vm1, %v318_v8  ;;  %753 = vmatpush3.bf16.msra.mxu1 %v752_v17  ;;  %v594_v53 = vld [vmem:[%s313_s10] sm:$0xff] }
  0x12   : > { %736 = vmatprep.mubr.msk.f32.mxu0 %vm789_vm0, %v790_v6  ;;  %754 = vmatprep.subr.bf16.mxu1 %v788_v3 }
  0x13   : > { %759 = vmatpush3.bf16.msra.mxu0 %v758_v23 }
  0x14   : > { %760 = vmatprep.subr.bf16.mxu0 %v788_v3 }
  0x15   : > { %756 = vmatpush3.bf16.msra.mxu1 %v755_v20 }
  0x17   : > { %762 = vmatpush3.bf16.msra.mxu0 %v761_v39 }
  0xe4   : > { %v400_v25 = vpop.f32.mrb[0].mxu0 }
  0xe5   : > { %v401_v26 = vadd.f32 %v670_v24, %v400_v25  ;;  %v708_v27 = vpop.f32.mrb[1].mxu0 }
  0xe7   : > { %v405_v28 = vmul.f32 0.044715, %v401_v26  ;;  %v404_v34 = vmul.f32 0.5, %v401_v26 }
  0xe9   : > { %v406_v29 = vmul.f32 %v405_v28, %v401_v26 }
  0xeb   : > { %v407_v30 = vmul.f32 %v406_v29, %v401_v26 }
  0xed   : > { %v408_v31 = vadd.f32 %v407_v30, %v401_v26 }
  0xef   : > { %v409_v32 = vmul.f32 0.7978846, %v408_v31 }
  0xf1   : > { %774 = vtanh.f32 %v409_v32 }
  0xfb   : > { %v775_v33 = vpop.eup %774 }
  0xfc   : > { %v411_v35 = vadd.f32 1.0, %v775_v33 }
  0xfe   : > { %v412_v36 = vmul.f32 %v411_v35, %v404_v34 }
 0x100   : > { %726 = vmatmul.mubr.msk.f32.vlgmr.msra.gmra.mrb[0].mxu1 %vm428_vm2, %v412_v36 }
 0x1d3   : > { %v498_v41 = vpop.f32.mrb[0].mxu1 }
 0x1d4   : > { %v499_v42 = vadd.f32 %v672_v40, %v498_v41  ;;  %v727_v43 = vpop.f32.mrb[1].mxu1 }
 0x1d6   : > { %737 = vmatmul.mubr.msk.f32.vlgmr.msra.gmra.mrb[2].mxu0 %vm330_vm1, %v499_v42 }
 0x2a9   : > { %v582_v45 = vpop.f32.mrb[2].mxu0 }
 0x2aa   : > { %v583_v46 = vadd.f32 %v674_v44, %v582_v45  ;;  %v738_v47 = vpop.f32.mrb[3].mxu0 }
 0x2ac   : > { %v676_v48 = vmul.f32 -1.442695, %v583_v46 }
 0x2ae   : > { %776 = vpow2.f32 %v676_v48 }
 0x2b8   : > { %v777_v49 = vpop.eup %776 }
 0x2b9   : > { %v589_v50 = vadd.f32 1.0, %v777_v49 }
 0x2bb   : > { %778 = vrcp.f32 %v589_v50 }
 0x2c5   : > { %v779_v51 = vpop.eup %778 }
 0x2c6   : > { %v592_v52 = vmul.f32 %v779_v51, %v583_v46 }
 0x2c8   : > { %v593_v54 = vmul.f32 %v592_v52, %v499_v42 }
 0x2ca   : > { %v595_v55 = vadd.f32 %v594_v53, %v593_v54 }
 0x2cc   : > { %596 = vst.msk [vmem:[%s317_s13] sm:$0xff] %vm330_vm1, %v595_v55 }
 0x2cd PF: > { %s18_s27 = sadd.s32 1, %s786_s27  }
 0x2ce   : > { %p15_p4 = scmp.ge.s32.totalorder %s18_s27, 4  }
 0x2d0   :  { %17 = sbr.rel (!%p15_p4) target bundleno = 1 (0x1), region = 85 }

// kernel: _lambda_.26
= control target key start
LH: loop header
LB: loop body
LE: loop exit
PB: predicated region body
PF: predicated region fallthrough
CT: control target
= control target key end

     0   :  { %s411_s9 = smov 0   ;;  %s413_s10 = smov 0   ;;  %s444_s0 = inlined_call_operand.vmem [shape: f32[4,4], index: 0, kind: input, shape index: {}]   ;;  %s445_s1 = inlined_call_operand.vmem [shape: f32[2,4,32], index: 1, kind: input, shape index: {}]   ;;  %s446_s2 = inlined_call_operand.vmem [shape: f32[2,4,32], index: 2, kind: output, shape index: {}]  }
   0x1   :  { %s415_s11 = smov 0  }
   0x2 LB: > { %s24_s12 = sadd.s32 1, %s388_s10  ;;  %p330_p0 = scmp.ge.s32.totalorder %s392_s11, 1  ;;  %s392_s11 = sphi %s415_s11, %s12_s11   ;;  %s388_s10 = sphi %s413_s10, %s448_s10   ;;  %s384_s9 = sphi %s411_s9, %s447_s9  }
   0x3   : > { %p26_p1 = scmp.ge.s32.totalorder %s24_s12, 2  ;;  %p130_p2 = scmp.lt.s32.totalorder %s392_s11, 3 }
   0x5   : > { %s450_s12 = smov (%p26_p1, %s24_s12), 0  ;;  %p131_p3 = pnand %p330_p0, %p130_p2 }
   0x6   : > { %p156_p4 = scmp.lt.s32.totalorder (!%p131_p3), %s384_s9, 1  ;;  %v394_v0 = vmov (!%p131_p3), 0.0   ;;  %vm395_vm0 = vmmov (!%p131_p3), 0   ;;  %vm176_vm1 = vcmask (!%p131_p3), 1043456   ;;  %v170_v1 = vld [vmem:[%s444_s0] sm:$0xf] (!%p131_p3) }
   0x7   : > { %134 = sbr.rel (%p131_p3) target bundleno = 232 (0xe8), region = 28  ;;  %339 = vmatprep.subr.mxu0 (!%p131_p3), %v394_v0  ;;  %341 = vmatprep.mubr.msk.f32.mxu0 (!%p131_p3), %vm395_vm0, %v394_v0  ;;  %vm172_vm2 = vcmask (!%p131_p3), 31744   ;;  %vm250_vm3 = vcmask (!%p131_p3), 257024  }
   0xe   : > { %s452_s9 = smov (!%p156_p4, %s384_s9), 1 }
   0xf   : > { %s331_s13 = sshll.u32 %s452_s9, 2 }
  0x10   : > { %s162_s16 = scalar_lea.vmem %s445_s1, %s331_s13  ;;  %s169_s21 = scalar_lea.vmem %s446_s2, %s331_s13 }
  0x11   : > { %v171_v2 = vld [vmem:[%s162_s16] sm:$0xf] }
  0x12   : > { %340 = vmatpush3.msk.msra.mxu0 %vm176_vm1, %v171_v2 }
  0x13   : > { %342 = vmatmul.mubr.msk.f32.vlgmr.msra.gmra.mrb[0].mxu0 %vm172_vm2, %v170_v1 }
  0xe6   : > { %v246_v3 = vpop.f32.mrb[0].mxu0 }
  0xe7   : > { %251 = vst.msk [vmem:[%s169_s21] sm:$0xf] %vm250_vm3, %v246_v3  ;;  %v343_v4 = vpop.f32.mrb[1].mxu0 }
  0xe8 PF: > { %s12_s11 = sadd.s32 1, %s392_s11   ;;  %s447_s9 = smov %s388_s10 }
  0xe9   : > { %p9_p5 = scmp.ge.s32.totalorder %s12_s11, 4   ;;  %s448_s10 = smov %s450_s12 }
  0xeb   :  { %11 = sbr.rel (!%p9_p5) target bundleno = 2 (0x2), region = 58 }

// kernel: _lambda_.25
= control target key start
LH: loop header
LB: loop body
LE: loop exit
PB: predicated region body
PF: predicated region fallthrough
CT: control target
= control target key end

     0   :  { %vm43_vm0 = vcmask 261120   ;;  %v494_v7 = vmov 0.0|0.0   ;;  %vm495_vm1 = vmmov 0   ;;  %v496_v11 = vmov 0.0   ;;  %s656_s0 = inlined_call_operand.vmem [shape: f32[8,32], index: 0, kind: input, shape index: {}]   ;;  %s657_s3 = inlined_call_operand.vmem [shape: f32[32,64], index: 3, kind: input, shape index: {}]   ;;  %s658_s1 = inlined_call_operand.vmem [shape: f32[1,32], index: 1, kind: input, shape index: {}]   ;;  %s659_s2 = inlined_call_operand.vmem [shape: f32[1,32], index: 2, kind: input, shape index: {}]   ;;  %s660_s5 = inlined_call_operand.vmem [shape: f32[64,32], index: 5, kind: input, shape index: {}]   ;;  %s661_s7 = inlined_call_operand.vmem [shape: f32[32,32], index: 7, kind: input, shape index: {}]   ;;  %s662_s4 = inlined_call_operand.vmem [shape: f32[1,64], index: 4, kind: input, shape index: {}]   ;;  %s663_s6 = inlined_call_operand.vmem [shape: f32[1,32], index: 6, kind: input, shape index: {}]   ;;  %s664_s8 = inlined_call_operand.vmem [shape: f32[1,32], index: 8, kind: input, shape index: {}]   ;;  %s665_s11 = inlined_call_operand.vmem [shape: f32[8,32], index: 11, kind: output, shape index: {0}]   ;;  %s666_s9 = inlined_call_operand.vmem [shape: f32[1,32], index: 9, kind: input, shape index: {}]   ;;  %s667_s10 = inlined_call_operand.vmem [shape: f32[1,32], index: 10, kind: input, shape index: {}]   ;;  %s668_s12 = inlined_call_operand.vmem [shape: f32[8,32], index: 12, kind: output, shape index: {1}]  }
   0x1   :  { %v565_v0 = vld [vmem:[%s656_s0] sm:$0xff]  ;;  %457 = vmatprep.subr.bf16.mxu0 %v494_v7  ;;  %v73_v9 = vld [vmem:[%s657_s3 + $0x8] sm:$0xff]  ;;  %v74_v10 = vld [vmem:[%s657_s3 + $0x10] sm:$0xff]  ;;  %424 = vmatprep.mubr.msk.f32.mxu0 %vm495_vm1, %v496_v11  ;;  %vm180_vm2 = vcmask 523264  }
   0x2   :  { %v44_v1 = vsel %vm43_vm0, %v565_v0, 0.0  ;;  %v72_v8 = vld [vmem:[%s657_s3] sm:$0xff]  ;;  %v75_v13 = vld [vmem:[%s657_s3 + $0x18] sm:$0xff]  ;;  %463 = vmatprep.subr.bf16.mxu1 %v494_v7  ;;  %443 = vmatprep.mubr.msk.f32.mxu1 %vm495_vm1, %v496_v11  ;;  %v166_v25 = vld [vmem:[%s660_s5 + $0x8] sm:$0xff] }
   0x3   :  { %45 = vadd.xlane.f32.xlu0 %v44_v1  ;;  %v458_v12 = vpack.c.bf16 %v73_v9, %v72_v8  ;;  %v461_v14 = vpack.c.bf16 %v75_v13, %v74_v10  ;;  %v386_v19 = vld [vmem:[%s658_s1] ss:$0 sm:$0xff]  ;;  %v167_v26 = vld [vmem:[%s660_s5 + $0x10] sm:$0xff]  ;;  %v168_v28 = vld [vmem:[%s660_s5 + $0x18] sm:$0xff] }
   0x4   :  { %v387_v21 = vld [vmem:[%s659_s2] ss:$0 sm:$0xff]  ;;  %v467_v29 = vpack.c.bf16 %v168_v28, %v167_v26  ;;  %v170_v31 = vld [vmem:[%s660_s5 + $0x28] sm:$0xff]  ;;  %v171_v33 = vld [vmem:[%s660_s5 + $0x30] sm:$0xff] }
   0x5   :  { %459 = vmatpush3.bf16.msra.mxu0 %v458_v12  ;;  %v165_v24 = vld [vmem:[%s660_s5] sm:$0xff]  ;;  %v172_v34 = vld [vmem:[%s660_s5 + $0x38] sm:$0xff]  ;;  %v255_v37 = vld [vmem:[%s661_s7 + $0x8] sm:$0xff] }
   0x6   :  { %460 = vmatprep.subr.bf16.mxu0 %v494_v7  ;;  %v464_v27 = vpack.c.bf16 %v166_v25, %v165_v24  ;;  %v169_v30 = vld [vmem:[%s660_s5 + $0x20] sm:$0xff]  ;;  %v473_v35 = vpack.c.bf16 %v172_v34, %v171_v33  ;;  %v256_v52 = vld [vmem:[%s661_s7 + $0x10] sm:$0xff]  ;;  %v257_v53 = vld [vmem:[%s661_s7 + $0x18] sm:$0xff] }
   0x7   :  { %v470_v32 = vpack.c.bf16 %v170_v31, %v169_v30  ;;  %v254_v36 = vld [vmem:[%s661_s7] sm:$0xff]  ;;  %v479_v54 = vpack.c.bf16 %v257_v53, %v256_v52 }
   0x8   :  { %465 = vmatpush3.bf16.msra.mxu1 %v464_v27  ;;  %v476_v38 = vpack.c.bf16 %v255_v37, %v254_v36  ;;  %v388_v39 = vld [vmem:[%s662_s4] ss:$0 sm:$0xff] }
   0x9   :  { %462 = vmatpush3.bf16.msra.mxu0 %v461_v14  ;;  %466 = vmatprep.subr.bf16.mxu1 %v494_v7  ;;  %v390_v55 = vld [vmem:[%s663_s6] ss:$0 sm:$0xff] }
   0xa   :  { %475 = vmatprep.subr.bf16.mxu0 %v494_v7  ;;  %v392_v59 = vld [vmem:[%s664_s8] ss:$0 sm:$0xff] }
   0xc   :  { %468 = vmatpush3.bf16.msra.mxu1 %v467_v29 }
   0xd   :  { %469 = vmatprep.subr.bf16.mxu1 %v494_v7 }
  0x10   :  { %471 = vmatpush3.bf16.msra.mxu1 %v470_v32 }
  0x11   :  { %472 = vmatprep.subr.bf16.mxu1 %v494_v7 }
  0x14   :  { %474 = vmatpush3.bf16.msra.mxu1 %v473_v35 }
  0x90   :  { %v46_v2 = vpop.xlane.xlu0 %45 }
  0x91   :  { %v48_v3 = vmul.f32 0.03125, %v46_v2 }
  0x93   :  { %v49_v4 = vsub.f32 %v565_v0, %v48_v3 }
  0x95   :  { %v50_v5 = vmul.f32 %v49_v4, %v49_v4 }
  0x97   :  { %v51_v6 = vsel %vm43_vm0, %v50_v5, 0.0 }
  0x98   :  { %52 = vadd.xlane.f32.xlu0 %v51_v6 }
 0x125   :  { %v53_v15 = vpop.xlane.xlu0 %52 }
 0x126   :  { %v54_v16 = vmul.f32 0.03125, %v53_v15 }
 0x128   :  { %v55_v17 = vadd.f32 1e-05, %v54_v16  ;;  %v395_v16 = vld [vmem:[%s666_s9] ss:$0 sm:$0xff] }
 0x12a   :  { %484 = vrsqrt.f32 %v55_v17 }
 0x134   :  { %v485_v18 = vpop.eup %484 }
 0x135   :  { %v57_v20 = vmul.f32 %v485_v18, %v49_v4  ;;  %v396_v18 = vld [vmem:[%s667_s10] ss:$0 sm:$0xff] }
 0x137   :  { %v64_v22 = vmul.f32 %v386_v19, %v57_v20 }
 0x139   :  { %v71_v23 = vadd.f32 %v387_v21, %v64_v22 }
 0x13b   :  { %425 = vmatmul.mubr.msk.f32.vlgmr.msra.gmra.mrb[0].mxu0 %vm43_vm0, %v71_v23 }
 0x13c   :  { %454 = vmatprep.mubr.msk.f32.mxu0 %vm495_vm1, %v496_v11  ;;  %477 = vmatpush3.bf16.msra.mxu0 %v476_v38 }
 0x13d   :  { %478 = vmatprep.subr.bf16.mxu0 %v494_v7 }
 0x140   :  { %480 = vmatpush3.bf16.msra.mxu0 %v479_v54 }
 0x20e   :  { %v152_v40 = vpop.f32.mrb[0].mxu0 }
 0x20f   :  { %v153_v41 = vadd.f32 %v388_v39, %v152_v40  ;;  %v426_v42 = vpop.f32.mrb[1].mxu0 }
 0x211   :  { %v157_v43 = vmul.f32 0.044715, %v153_v41  ;;  %v156_v49 = vmul.f32 0.5, %v153_v41 }
 0x213   :  { %v158_v44 = vmul.f32 %v157_v43, %v153_v41 }
 0x215   :  { %v159_v45 = vmul.f32 %v158_v44, %v153_v41 }
 0x217   :  { %v160_v46 = vadd.f32 %v159_v45, %v153_v41 }
 0x219   :  { %v161_v47 = vmul.f32 0.7978846, %v160_v46 }
 0x21b   :  { %486 = vtanh.f32 %v161_v47 }
 0x225   :  { %v487_v48 = vpop.eup %486 }
 0x226   :  { %v163_v50 = vadd.f32 1.0, %v487_v48 }
 0x228   :  { %v164_v51 = vmul.f32 %v163_v50, %v156_v49 }
 0x22a   :  { %444 = vmatmul.mubr.msk.f32.vlgmr.msra.gmra.mrb[0].mxu1 %vm180_vm2, %v164_v51 }
 0x2fd   :  { %v250_v56 = vpop.f32.mrb[0].mxu1 }
 0x2fe   :  { %v251_v57 = vadd.f32 %v390_v55, %v250_v56  ;;  %v445_v58 = vpop.f32.mrb[1].mxu1 }
 0x300   :  { %455 = vmatmul.mubr.msk.f32.vlgmr.msra.gmra.mrb[2].mxu0 %vm43_vm0, %v251_v57 }
 0x3d3   :  { %v334_v60 = vpop.f32.mrb[2].mxu0 }
 0x3d4   :  { %v335_v61 = vadd.f32 %v392_v59, %v334_v60  ;;  %v456_v62 = vpop.f32.mrb[3].mxu0 }
 0x3d6   :  { %v394_v63 = vmul.f32 -1.442695, %v335_v61 }
 0x3d8   :  { %488 = vpow2.f32 %v394_v63 }
 0x3e2   :  { %v489_v1 = vpop.eup %488 }
 0x3e3   :  { %v341_v2 = vadd.f32 1.0, %v489_v1 }
 0x3e5   :  { %490 = vrcp.f32 %v341_v2 }
 0x3ef   :  { %v491_v3 = vpop.eup %490 }
 0x3f0   :  { %v344_v4 = vmul.f32 %v491_v3, %v335_v61 }
 0x3f2   :  { %v345_v5 = vmul.f32 %v344_v4, %v251_v57 }
 0x3f4   :  { %v346_v6 = vadd.f32 %v345_v5, %v565_v0 }
 0x3f6   :  { %v350_v7 = vsel %vm43_vm0, %v346_v6, 0.0  ;;  %347 = vst.msk [vmem:[%s665_s11] sm:$0xff] %vm43_vm0, %v346_v6 }
 0x3f7   :  { %351 = vadd.xlane.f32.xlu1 %v350_v7 }
 0x484   :  { %v352_v8 = vpop.xlane.xlu1 %351 }
 0x485   :  { %v353_v9 = vmul.f32 0.03125, %v352_v8 }
 0x487   :  { %v354_v10 = vsub.f32 %v346_v6, %v353_v9 }
 0x489   :  { %v355_v11 = vmul.f32 %v354_v10, %v354_v10 }
 0x48b   :  { %v356_v12 = vsel %vm43_vm0, %v355_v11, 0.0 }
 0x48c   :  { %357 = vadd.xlane.f32.xlu1 %v356_v12 }
 0x519   :  { %v358_v13 = vpop.xlane.xlu1 %357 }
 0x51a   :  { %v359_v14 = vmul.f32 0.03125, %v358_v13 }
 0x51c   :  { %v360_v15 = vadd.f32 1e-05, %v359_v14 }
 0x51e   :  { %492 = vrsqrt.f32 %v360_v15 }
 0x528   :  { %v493_v0 = vpop.eup %492 }
 0x529   :  { %v362_v17 = vmul.f32 %v493_v0, %v354_v10 }
 0x52b   :  { %v369_v19 = vmul.f32 %v395_v16, %v362_v17 }
 0x52d   :  { %v376_v20 = vadd.f32 %v396_v18, %v369_v19 }
 0x52f   :  { %377 = vst.msk [vmem:[%s668_s12] sm:$0xff] %vm43_vm0, %v376_v20 }

// kernel: _lambda_.27
= control target key start
LH: loop header
LB: loop body
LE: loop exit
PB: predicated region body
PF: predicated region fallthrough
CT: control target
= control target key end

     0   :  { %v412_v0 = vmov 0.0|0.0   ;;  %vm413_vm0 = vmmov 0   ;;  %v414_v4 = vmov 0.0   ;;  %vm41_vm1 = vcmask 261120   ;;  %s532_s2 = inlined_call_operand.vmem [shape: f32[32,64], index: 2, kind: input, shape index: {}]   ;;  %s533_s0 = inlined_call_operand.vmem [shape: f32[8,32], index: 0, kind: input, shape index: {}]   ;;  %s534_s4 = inlined_call_operand.vmem [shape: f32[64,32], index: 4, kind: input, shape index: {}]   ;;  %s535_s6 = inlined_call_operand.vmem [shape: f32[32,32], index: 6, kind: input, shape index: {}]   ;;  %s536_s3 = inlined_call_operand.vmem [shape: f32[1,64], index: 3, kind: input, shape index: {}]   ;;  %s537_s5 = inlined_call_operand.vmem [shape: f32[1,32], index: 5, kind: input, shape index: {}]   ;;  %s538_s7 = inlined_call_operand.vmem [shape: f32[1,32], index: 7, kind: input, shape index: {}]   ;;  %s539_s1 = inlined_call_operand.vmem [shape: f32[8,32], index: 1, kind: input, shape index: {}]   ;;  %s540_s8 = inlined_call_operand.vmem [shape: f32[8,32], index: 8, kind: output, shape index: {}]  }
   0x1   :  { %379 = vmatprep.subr.bf16.mxu0 %v412_v0  ;;  %v30_v1 = vld [vmem:[%s532_s2] sm:$0xff]  ;;  %v31_v2 = vld [vmem:[%s532_s2 + $0x8] sm:$0xff]  ;;  %v32_v3 = vld [vmem:[%s532_s2 + $0x10] sm:$0xff]  ;;  %346 = vmatprep.mubr.msk.f32.mxu0 %vm413_vm0, %v414_v4  ;;  %vm139_vm2 = vcmask 523264  }
   0x2   :  { %v380_v5 = vpack.c.bf16 %v31_v2, %v30_v1  ;;  %v33_v6 = vld [vmem:[%s532_s2 + $0x18] sm:$0xff]  ;;  %385 = vmatprep.subr.bf16.mxu1 %v412_v0  ;;  %365 = vmatprep.mubr.msk.f32.mxu1 %vm413_vm0, %v414_v4  ;;  %v29_v8 = vld [vmem:[%s533_s0] sm:$0xff]  ;;  %v125_v10 = vld [vmem:[%s534_s4 + $0x8] sm:$0xff] }
   0x3   :  { %v383_v7 = vpack.c.bf16 %v33_v6, %v32_v3  ;;  %v124_v9 = vld [vmem:[%s534_s4] sm:$0xff]  ;;  %v126_v11 = vld [vmem:[%s534_s4 + $0x10] sm:$0xff]  ;;  %v127_v13 = vld [vmem:[%s534_s4 + $0x18] sm:$0xff] }
   0x4   :  { %381 = vmatpush3.bf16.msra.mxu0 %v380_v5  ;;  %v386_v12 = vpack.c.bf16 %v125_v10, %v124_v9  ;;  %v389_v14 = vpack.c.bf16 %v127_v13, %v126_v11  ;;  %v128_v15 = vld [vmem:[%s534_s4 + $0x20] sm:$0xff]  ;;  %v129_v16 = vld [vmem:[%s534_s4 + $0x28] sm:$0xff]  ;;  %v130_v18 = vld [vmem:[%s534_s4 + $0x30] sm:$0xff] }
   0x5   :  { %382 = vmatprep.subr.bf16.mxu0 %v412_v0  ;;  %v392_v17 = vpack.c.bf16 %v129_v16, %v128_v15  ;;  %v131_v19 = vld [vmem:[%s534_s4 + $0x38] sm:$0xff]  ;;  %v213_v21 = vld [vmem:[%s535_s6] sm:$0xff]  ;;  %v214_v22 = vld [vmem:[%s535_s6 + $0x8] sm:$0xff] }
   0x6   :  { %387 = vmatpush3.bf16.msra.mxu1 %v386_v12  ;;  %v395_v20 = vpack.c.bf16 %v131_v19, %v130_v18  ;;  %v398_v23 = vpack.c.bf16 %v214_v22, %v213_v21  ;;  %v312_v24 = vld [vmem:[%s536_s3] ss:$0 sm:$0xff]  ;;  %v215_v37 = vld [vmem:[%s535_s6 + $0x10] sm:$0xff]  ;;  %v216_v38 = vld [vmem:[%s535_s6 + $0x18] sm:$0xff] }
   0x7   :  { %388 = vmatprep.subr.bf16.mxu1 %v412_v0  ;;  %v401_v39 = vpack.c.bf16 %v216_v38, %v215_v37  ;;  %v314_v40 = vld [vmem:[%s537_s5] ss:$0 sm:$0xff] }
   0x8   :  { %384 = vmatpush3.bf16.msra.mxu0 %v383_v7  ;;  %v316_v44 = vld [vmem:[%s538_s7] ss:$0 sm:$0xff] }
   0x9   :  { %397 = vmatprep.subr.bf16.mxu0 %v412_v0  ;;  %v305_v53 = vld [vmem:[%s539_s1] sm:$0xff] }
   0xa   :  { %390 = vmatpush3.bf16.msra.mxu1 %v389_v14 }
   0xb   :  { %347 = vmatmul.mubr.msk.f32.vlgmr.msra.gmra.mrb[0].mxu0 %vm41_vm1, %v29_v8  ;;  %391 = vmatprep.subr.bf16.mxu1 %v412_v0 }
   0xc   :  { %376 = vmatprep.mubr.msk.f32.mxu0 %vm413_vm0, %v414_v4  ;;  %399 = vmatpush3.bf16.msra.mxu0 %v398_v23 }
   0xd   :  { %400 = vmatprep.subr.bf16.mxu0 %v412_v0 }
   0xe   :  { %393 = vmatpush3.bf16.msra.mxu1 %v392_v17 }
   0xf   :  { %394 = vmatprep.subr.bf16.mxu1 %v412_v0 }
  0x10   :  { %402 = vmatpush3.bf16.msra.mxu0 %v401_v39 }
  0x12   :  { %396 = vmatpush3.bf16.msra.mxu1 %v395_v20 }
  0xde   :  { %v111_v25 = vpop.f32.mrb[0].mxu0 }
  0xdf   :  { %v112_v26 = vadd.f32 %v312_v24, %v111_v25  ;;  %v348_v27 = vpop.f32.mrb[1].mxu0 }
  0xe1   :  { %v116_v28 = vmul.f32 0.044715, %v112_v26  ;;  %v115_v34 = vmul.f32 0.5, %v112_v26 }
  0xe3   :  { %v117_v29 = vmul.f32 %v116_v28, %v112_v26 }
  0xe5   :  { %v118_v30 = vmul.f32 %v117_v29, %v112_v26 }
  0xe7   :  { %v119_v31 = vadd.f32 %v118_v30, %v112_v26 }
  0xe9   :  { %v120_v32 = vmul.f32 0.7978846, %v119_v31 }
  0xeb   :  { %406 = vtanh.f32 %v120_v32 }
  0xf5   :  { %v407_v33 = vpop.eup %406 }
  0xf6   :  { %v122_v35 = vadd.f32 1.0, %v407_v33 }
  0xf8   :  { %v123_v36 = vmul.f32 %v122_v35, %v115_v34 }
  0xfa   :  { %366 = vmatmul.mubr.msk.f32.vlgmr.msra.gmra.mrb[0].mxu1 %vm139_vm2, %v123_v36 }
 0x1cd   :  { %v209_v41 = vpop.f32.mrb[0].mxu1 }
 0x1ce   :  { %v210_v42 = vadd.f32 %v314_v40, %v209_v41  ;;  %v367_v43 = vpop.f32.mrb[1].mxu1 }
 0x1d0   :  { %377 = vmatmul.mubr.msk.f32.vlgmr.msra.gmra.mrb[2].mxu0 %vm41_vm1, %v210_v42 }
 0x2a3   :  { %v293_v45 = vpop.f32.mrb[2].mxu0 }
 0x2a4   :  { %v294_v46 = vadd.f32 %v316_v44, %v293_v45  ;;  %v378_v47 = vpop.f32.mrb[3].mxu0 }
 0x2a6   :  { %v318_v48 = vmul.f32 -1.442695, %v294_v46 }
 0x2a8   :  { %408 = vpow2.f32 %v318_v48 }
 0x2b2   :  { %v409_v49 = vpop.eup %408 }
 0x2b3   :  { %v300_v50 = vadd.f32 1.0, %v409_v49 }
 0x2b5   :  { %410 = vrcp.f32 %v300_v50 }
 0x2bf   :  { %v411_v51 = vpop.eup %410 }
 0x2c0   :  { %v303_v52 = vmul.f32 %v411_v51, %v294_v46 }
 0x2c2   :  { %v304_v54 = vmul.f32 %v303_v52, %v210_v42 }
 0x2c4   :  { %v306_v55 = vadd.f32 %v305_v53, %v304_v54 }
 0x2c6   :  { %307 = vst.msk [vmem:[%s540_s8] sm:$0xff] %vm41_vm1, %v306_v55 }

</bundles_post_ra>
